<compile_context>
chip_gen: v5e
topology: v5e:2x2
jax: 0.10.0
libtpu: 0.0.40
codegen_flags: <defaults>
</compile_context>

<pallas_src>
import math

import jax
import jax.numpy as jnp
from jax import lax
from jax.experimental import pallas as pl
from jax.experimental.pallas import tpu as pltpu


def _gelu_exact(x):
    # nn.GELU() default (erf formulation), matching PyTorch exactly.
    return 0.5 * x * (1.0 + lax.erf(x / jnp.sqrt(jnp.float32(2.0))))


def make_transformer_block_kernel(nb, S, C, n_heads):
    """Kernel processing `nb` images (nb*S rows) per grid step."""
    hd = C // n_heads

    def kernel(x_ref, wqkv_ref, bqkv_ref, wp_ref, bp_ref,
               w1_ref, b1_ref, w2_ref, b2_ref, o_ref, oh_scr):
        x = x_ref[...]                                # (nb*S, C) f32
        x_bf = x.astype(jnp.bfloat16)                 # MXU-native operand

        # Fused QKV projection: one wide matmul instead of 3*n_heads narrow
        # ones (scale already folded into the Q columns / Q bias).
        qkv = jnp.dot(x_bf, wqkv_ref[...],
                      preferred_element_type=jnp.float32) + bqkv_ref[...]
        qkv = qkv.astype(jnp.bfloat16)                # single cast for all heads

        dn_qk = (((1,), (1,)), ((), ()))              # contract last dims

        # Per-image, per-head attention.  Each head writes its (S, hd) output
        # into the VMEM scratch at its lane offset -- no carried accumulator,
        # so the scheduler can overlap head h+1's MXU pushes with head h's
        # softmax (EUP/XLU).  Loop is small (nb*n_heads iters) and carries no
        # live values across iterations, so vreg pressure stays low.
        for n in range(nb):                           # static unroll
            r = n * S
            for h in range(n_heads):                  # static unroll
                q = qkv[r:r + S, h * hd:(h + 1) * hd]             # (S, hd) bf16
                k = qkv[r:r + S, C + h * hd:C + (h + 1) * hd]
                v = qkv[r:r + S, 2 * C + h * hd:2 * C + (h + 1) * hd]
                s = lax.dot_general(q, k, dimension_numbers=dn_qk,
                                    preferred_element_type=jnp.float32)  # (S,S)
                s = s - jnp.max(s, axis=-1, keepdims=True)
                p = jnp.exp(s)
                p = p / jnp.sum(p, axis=-1, keepdims=True)        # exact softmax
                oh = jnp.dot(p.astype(jnp.bfloat16), v,
                             preferred_element_type=jnp.float32)  # (S, hd) f32
                oh_scr[r:r + S, h * hd:(h + 1) * hd] = oh

        # One full-width output projection over all rows / all heads.
        attn = jnp.dot(oh_scr[...].astype(jnp.bfloat16), wp_ref[...],
                       preferred_element_type=jnp.float32) + bp_ref[...]

        x1 = x + attn                                 # residual 1 (f32)

        # MLP: 1x1 conv C->4C, exact GELU, 1x1 conv 4C->C (weights pre-T'd).
        h1 = _gelu_exact(jnp.dot(x1.astype(jnp.bfloat16), w1_ref[...],
                                 preferred_element_type=jnp.float32)
                         + b1_ref[...])               # (nb*S, 4C) f32
        mlp = jnp.dot(h1.astype(jnp.bfloat16), w2_ref[...],
                      preferred_element_type=jnp.float32) + b2_ref[...]

        o_ref[...] = x1 + mlp                         # residual 2
        # NOTE: for much larger S/C, tile attention (flash-style) and the MLP
        # over rows; budget the f32 scores + (tq,4C) h1 + double-buffered
        # activations against the *v7x* 64 MiB physical / 32 MiB scoped VMEM
        # (not v5e/v6e's 128 MiB), set vmem_limit_bytes explicitly, and give
        # the constant-index weight BlockSpecs pipeline_mode=pl.Buffered(1)
        # so they are not pointlessly double-buffered.
    return kernel


def _batch_blocks(n_images):
    # v7x has 2 TensorCores per chip: keep one image (block) per core.
    # v5e/v6e have a single TC: merge the whole batch into one grid step.
    try:
        kind = jax.devices()[0].device_kind.lower()
    except Exception:
        kind = ""
    blocks = 2 if ("v7" in kind or "7x" in kind) else 1
    if n_images % blocks != 0:
        blocks = 1
    return blocks


def transformer_block(x_nchw, params, n_heads):
    N, C, H, W = x_nchw.shape
    S = H * W
    hd = C // n_heads
    rows = N * S
    x2d = x_nchw.reshape(N, C, S).transpose(0, 2, 1).reshape(rows, C)  # (N*S, C)
    wq, bq, wk, bk, wv, bv, wp, bp, w1, b1, w2, b2 = params

    bf = jnp.bfloat16
    scale = 1.0 / math.sqrt(hd)

    # One-time wrapper-side prep (cheap XLA ops, outside the kernel):
    #  - fuse Q/K/V into a single (C, 3C) weight (x @ W layout) with the
    #    1/sqrt(hd) score scale folded into the Q columns and Q bias,
    #  - transpose the remaining conv weights to (in, out),
    #  - cast matmul weights to bf16; biases stay f32.
    wqkv = jnp.concatenate([(wq * scale).T, wk.T, wv.T], axis=1).astype(bf)  # (C, 3C)
    bqkv = jnp.concatenate([bq * scale, bk, bv]).reshape(1, 3 * C)           # f32
    wpt = wp.T.astype(bf)                              # (C, C)
    w1t = w1.T.astype(bf)                              # (C, 4C)
    w2t = w2.T.astype(bf)                              # (4C, C)
    bp2 = bp.reshape(1, C)
    b12 = b1.reshape(1, 4 * C)
    b22 = b2.reshape(1, C)

    G = _batch_blocks(N)                               # grid steps (1 or 2)
    NB = N // G                                        # images per grid step

    def full(shape):
        return pl.BlockSpec(shape, lambda i, _n=len(shape): (0,) * _n)

    out = pl.pallas_call(
        make_transformer_block_kernel(NB, S, C, n_heads),
        out_shape=jax.ShapeDtypeStruct((rows, C), jnp.float32),
        grid=(G,),
        in_specs=[
            pl.BlockSpec((NB * S, C), lambda i: (i, 0)),   # activations
            full((C, 3 * C)), full((1, 3 * C)),            # fused qkv conv
            full((C, C)), full((1, C)),                    # attn out proj
            full((C, 4 * C)), full((1, 4 * C)),            # mlp conv 1
            full((4 * C, C)), full((1, C)),                # mlp conv 2
        ],
        out_specs=pl.BlockSpec((NB * S, C), lambda i: (i, 0)),
        scratch_shapes=[pltpu.VMEM((NB * S, C), jnp.float32)],  # per-head outs
        compiler_params=pltpu.CompilerParams(
            dimension_semantics=("parallel",)),        # batch across TCs (v7x)
    )(x2d, wqkv, bqkv, wpt, bp2, w1t, b12, w2t, b22)
    return out.reshape(N, S, C).transpose(0, 2, 1).reshape(N, C, H, W)


def reference(x_nchw, params, n_heads):
    # Pure-JAX f32 reference mirroring the PyTorch module semantics.
    N, C, H, W = x_nchw.shape
    S = H * W
    x = x_nchw.reshape(N, C, S).transpose(0, 2, 1)
    wq, bq, wk, bk, wv, bv, wp, bp, w1, b1, w2, b2 = params
    hd = C // n_heads
    q = x @ wq.T + bq
    k = x @ wk.T + bk
    v = x @ wv.T + bv
    split = lambda t: t.reshape(N, S, n_heads, hd).transpose(0, 2, 1, 3)
    qh, kh, vh = split(q), split(k), split(v)
    s = jnp.einsum('nhsd,nhtd->nhst', qh, kh) / math.sqrt(hd)
    p = jax.nn.softmax(s, axis=-1)
    o = jnp.einsum('nhst,nhtd->nhsd', p, vh)
    o = o.transpose(0, 2, 1, 3).reshape(N, S, C)
    x1 = x + (o @ wp.T + bp)
    h1 = jax.nn.gelu(x1 @ w1.T + b1, approximate=False)
    out = x1 + (h1 @ w2.T + b2)
    return out.transpose(0, 2, 1).reshape(N, C, H, W)


if __name__ == "__main__":
    N, C, H, W = 2, 32, 8, 8
    n_heads = 4

    key = jax.random.PRNGKey(0)
    keys = jax.random.split(key, 16)

    def winit(k, shape, fan_in):
        bound = 1.0 / math.sqrt(fan_in)   # PyTorch Conv2d default init range
        return jax.random.uniform(k, shape, jnp.float32, -bound, bound)

    x = jax.random.normal(keys[0], (N, C, H, W), jnp.float32)
    params = (
        winit(keys[1], (C, C), C), winit(keys[2], (C,), C),          # q
        winit(keys[3], (C, C), C), winit(keys[4], (C,), C),          # k
        winit(keys[5], (C, C), C), winit(keys[6], (C,), C),          # v
        winit(keys[7], (C, C), C), winit(keys[8], (C,), C),          # proj
        winit(keys[9], (4 * C, C), C), winit(keys[10], (4 * C,), C), # mlp in
        winit(keys[11], (C, 4 * C), 4 * C), winit(keys[12], (C,), 4 * C),  # mlp out
    )

    y = transformer_block(x, params, n_heads)
    y = jax.block_until_ready(y)

    y_ref = reference(x, params, n_heads)
    assert y.shape == (N, C, H, W)
    # bf16 MXU operands (x, weights, qkv, p, h1) dominate the numerical error
    # vs the f32 reference; softmax division is now exact.
    assert jnp.allclose(y, y_ref, atol=3e-2, rtol=3e-2), "mismatch vs reference"
    print("KERNEL_OK")
</pallas_src>

<mosaic_0001>
module attributes {stable_mosaic.version = 11 : i64} {
  func.func @kernel(%arg0: i32, %arg1: memref<128x32xf32, #tpu.memory_space<vmem>>, %arg2: memref<32x96xbf16, #tpu.memory_space<vmem>>, %arg3: memref<1x96xf32, #tpu.memory_space<vmem>>, %arg4: memref<32x32xbf16, #tpu.memory_space<vmem>>, %arg5: memref<1x32xf32, #tpu.memory_space<vmem>>, %arg6: memref<32x128xbf16, #tpu.memory_space<vmem>>, %arg7: memref<1x128xf32, #tpu.memory_space<vmem>>, %arg8: memref<128x32xbf16, #tpu.memory_space<vmem>>, %arg9: memref<1x32xf32, #tpu.memory_space<vmem>>, %arg10: memref<128x32xf32, #tpu.memory_space<vmem>>, %arg11: memref<128x32xf32, #tpu.memory_space<vmem>>) attributes {dimension_semantics = [#tpu.dimension_semantics<parallel>], iteration_bounds = array<i64: 1>, scalar_prefetch = 0 : i64, scratch_operands = 1 : i64, tpu.core_type = #tpu.core_type<tc>, window_params = [{transform_indices = @transform_0, window_bounds = array<i64: 128, 32>}, {pipeline_mode = #tpu.pipeline_mode<synchronous>, transform_indices = @transform_1, window_bounds = array<i64: 32, 96>}, {pipeline_mode = #tpu.pipeline_mode<synchronous>, transform_indices = @transform_2, window_bounds = array<i64: 1, 96>}, {pipeline_mode = #tpu.pipeline_mode<synchronous>, transform_indices = @transform_3, window_bounds = array<i64: 32, 32>}, {pipeline_mode = #tpu.pipeline_mode<synchronous>, transform_indices = @transform_4, window_bounds = array<i64: 1, 32>}, {pipeline_mode = #tpu.pipeline_mode<synchronous>, transform_indices = @transform_5, window_bounds = array<i64: 32, 128>}, {pipeline_mode = #tpu.pipeline_mode<synchronous>, transform_indices = @transform_6, window_bounds = array<i64: 1, 128>}, {pipeline_mode = #tpu.pipeline_mode<synchronous>, transform_indices = @transform_7, window_bounds = array<i64: 128, 32>}, {pipeline_mode = #tpu.pipeline_mode<synchronous>, transform_indices = @transform_8, window_bounds = array<i64: 1, 32>}, {transform_indices = @transform_9, window_bounds = array<i64: 128, 32>}]} {
    %c0 = arith.constant 0 : index
    %c0_0 = arith.constant 0 : index
    %0 = vector.load %arg1[%c0, %c0_0] : memref<128x32xf32, #tpu.memory_space<vmem>>, vector<128x32xf32>
    %1 = arith.truncf %0 : vector<128x32xf32> to vector<128x32xbf16>
    %c0_1 = arith.constant 0 : index
    %c0_2 = arith.constant 0 : index
    %2 = vector.load %arg2[%c0_1, %c0_2] : memref<32x96xbf16, #tpu.memory_space<vmem>>, vector<32x96xbf16>
    %cst = arith.constant dense<0.000000e+00> : vector<128x96xf32>
    %3 = tpu.matmul %1, %2, %cst {dimension_numbers = #tpu.dot_dimension_numbers<[1], [0], [0], [1], [0, 0, 1, 1], [], []>} : vector<128x32xbf16>, vector<32x96xbf16>, vector<128x96xf32> -> vector<128x96xf32>
    %c0_3 = arith.constant 0 : index
    %c0_4 = arith.constant 0 : index
    %4 = vector.load %arg3[%c0_3, %c0_4] : memref<1x96xf32, #tpu.memory_space<vmem>>, vector<1x96xf32>
    %5 = vector.broadcast %4 : vector<1x96xf32> to vector<128x96xf32>
    %6 = arith.addf %3, %5 : vector<128x96xf32>
    %7 = arith.truncf %6 : vector<128x96xf32> to vector<128x96xbf16>
    %8 = vector.extract_strided_slice %7 {offsets = [0, 0], sizes = [64, 8], strides = [1, 1]} : vector<128x96xbf16> to vector<64x8xbf16>
    %9 = vector.extract_strided_slice %7 {offsets = [0, 32], sizes = [64, 8], strides = [1, 1]} : vector<128x96xbf16> to vector<64x8xbf16>
    %10 = vector.extract_strided_slice %7 {offsets = [0, 64], sizes = [64, 8], strides = [1, 1]} : vector<128x96xbf16> to vector<64x8xbf16>
    %cst_5 = arith.constant dense<0.000000e+00> : vector<64x64xf32>
    %11 = tpu.matmul %8, %9, %cst_5 {dimension_numbers = #tpu.dot_dimension_numbers<[1], [1], [0], [0], [0, 0, 1, 0], [], []>} : vector<64x8xbf16>, vector<64x8xbf16>, vector<64x64xf32> -> vector<64x64xf32>
    %cst_6 = arith.constant dense<0xFF800000> : vector<64xf32>
    %12 = vector.multi_reduction <maximumf>, %11, %cst_6 [1] : vector<64x64xf32> to vector<64xf32>
    %13 = vector.shape_cast %12 : vector<64xf32> to vector<64x1xf32>
    %14 = vector.broadcast %13 : vector<64x1xf32> to vector<64x64xf32>
    %15 = arith.subf %11, %14 : vector<64x64xf32>
    %16 = math.exp %15 : vector<64x64xf32>
    %cst_7 = arith.constant dense<0.000000e+00> : vector<64xf32>
    %17 = vector.multi_reduction <add>, %16, %cst_7 [1] : vector<64x64xf32> to vector<64xf32>
    %18 = vector.shape_cast %17 : vector<64xf32> to vector<64x1xf32>
    %19 = vector.broadcast %18 : vector<64x1xf32> to vector<64x64xf32>
    %20 = arith.divf %16, %19 : vector<64x64xf32>
    %21 = arith.truncf %20 : vector<64x64xf32> to vector<64x64xbf16>
    %cst_8 = arith.constant dense<0.000000e+00> : vector<64x8xf32>
    %22 = tpu.matmul %21, %10, %cst_8 {dimension_numbers = #tpu.dot_dimension_numbers<[1], [0], [0], [1], [0, 0, 1, 1], [], []>} : vector<64x64xbf16>, vector<64x8xbf16>, vector<64x8xf32> -> vector<64x8xf32>
    %c0_9 = arith.constant 0 : index
    %c0_10 = arith.constant 0 : index
    %23 = vector.load %arg11[%c0_9, %c0_10] : memref<128x32xf32, #tpu.memory_space<vmem>>, vector<64x8xf32>
    tpu.vector_store %arg11[%c0_9, %c0_10], %22 {strides = array<i32>} : memref<128x32xf32, #tpu.memory_space<vmem>>, vector<64x8xf32>,
    %24 = vector.extract_strided_slice %7 {offsets = [0, 8], sizes = [64, 8], strides = [1, 1]} : vector<128x96xbf16> to vector<64x8xbf16>
    %25 = vector.extract_strided_slice %7 {offsets = [0, 40], sizes = [64, 8], strides = [1, 1]} : vector<128x96xbf16> to vector<64x8xbf16>
    %26 = vector.extract_strided_slice %7 {offsets = [0, 72], sizes = [64, 8], strides = [1, 1]} : vector<128x96xbf16> to vector<64x8xbf16>
    %cst_11 = arith.constant dense<0.000000e+00> : vector<64x64xf32>
    %27 = tpu.matmul %24, %25, %cst_11 {dimension_numbers = #tpu.dot_dimension_numbers<[1], [1], [0], [0], [0, 0, 1, 0], [], []>} : vector<64x8xbf16>, vector<64x8xbf16>, vector<64x64xf32> -> vector<64x64xf32>
    %cst_12 = arith.constant dense<0xFF800000> : vector<64xf32>
    %28 = vector.multi_reduction <maximumf>, %27, %cst_12 [1] : vector<64x64xf32> to vector<64xf32>
    %29 = vector.shape_cast %28 : vector<64xf32> to vector<64x1xf32>
    %30 = vector.broadcast %29 : vector<64x1xf32> to vector<64x64xf32>
    %31 = arith.subf %27, %30 : vector<64x64xf32>
    %32 = math.exp %31 : vector<64x64xf32>
    %cst_13 = arith.constant dense<0.000000e+00> : vector<64xf32>
    %33 = vector.multi_reduction <add>, %32, %cst_13 [1] : vector<64x64xf32> to vector<64xf32>
    %34 = vector.shape_cast %33 : vector<64xf32> to vector<64x1xf32>
    %35 = vector.broadcast %34 : vector<64x1xf32> to vector<64x64xf32>
    %36 = arith.divf %32, %35 : vector<64x64xf32>
    %37 = arith.truncf %36 : vector<64x64xf32> to vector<64x64xbf16>
    %cst_14 = arith.constant dense<0.000000e+00> : vector<64x8xf32>
    %38 = tpu.matmul %37, %26, %cst_14 {dimension_numbers = #tpu.dot_dimension_numbers<[1], [0], [0], [1], [0, 0, 1, 1], [], []>} : vector<64x64xbf16>, vector<64x8xbf16>, vector<64x8xf32> -> vector<64x8xf32>
    %c0_15 = arith.constant 0 : index
    %c8 = arith.constant 8 : index
    %39 = vector.load %arg11[%c0_15, %c8] : memref<128x32xf32, #tpu.memory_space<vmem>>, vector<64x8xf32>
    tpu.vector_store %arg11[%c0_15, %c8], %38 {strides = array<i32>} : memref<128x32xf32, #tpu.memory_space<vmem>>, vector<64x8xf32>,
    %40 = vector.extract_strided_slice %7 {offsets = [0, 16], sizes = [64, 8], strides = [1, 1]} : vector<128x96xbf16> to vector<64x8xbf16>
    %41 = vector.extract_strided_slice %7 {offsets = [0, 48], sizes = [64, 8], strides = [1, 1]} : vector<128x96xbf16> to vector<64x8xbf16>
    %42 = vector.extract_strided_slice %7 {offsets = [0, 80], sizes = [64, 8], strides = [1, 1]} : vector<128x96xbf16> to vector<64x8xbf16>
    %cst_16 = arith.constant dense<0.000000e+00> : vector<64x64xf32>
    %43 = tpu.matmul %40, %41, %cst_16 {dimension_numbers = #tpu.dot_dimension_numbers<[1], [1], [0], [0], [0, 0, 1, 0], [], []>} : vector<64x8xbf16>, vector<64x8xbf16>, vector<64x64xf32> -> vector<64x64xf32>
    %cst_17 = arith.constant dense<0xFF800000> : vector<64xf32>
    %44 = vector.multi_reduction <maximumf>, %43, %cst_17 [1] : vector<64x64xf32> to vector<64xf32>
    %45 = vector.shape_cast %44 : vector<64xf32> to vector<64x1xf32>
    %46 = vector.broadcast %45 : vector<64x1xf32> to vector<64x64xf32>
    %47 = arith.subf %43, %46 : vector<64x64xf32>
    %48 = math.exp %47 : vector<64x64xf32>
    %cst_18 = arith.constant dense<0.000000e+00> : vector<64xf32>
    %49 = vector.multi_reduction <add>, %48, %cst_18 [1] : vector<64x64xf32> to vector<64xf32>
    %50 = vector.shape_cast %49 : vector<64xf32> to vector<64x1xf32>
    %51 = vector.broadcast %50 : vector<64x1xf32> to vector<64x64xf32>
    %52 = arith.divf %48, %51 : vector<64x64xf32>
    %53 = arith.truncf %52 : vector<64x64xf32> to vector<64x64xbf16>
    %cst_19 = arith.constant dense<0.000000e+00> : vector<64x8xf32>
    %54 = tpu.matmul %53, %42, %cst_19 {dimension_numbers = #tpu.dot_dimension_numbers<[1], [0], [0], [1], [0, 0, 1, 1], [], []>} : vector<64x64xbf16>, vector<64x8xbf16>, vector<64x8xf32> -> vector<64x8xf32>
    %c0_20 = arith.constant 0 : index
    %c16 = arith.constant 16 : index
    %55 = vector.load %arg11[%c0_20, %c16] : memref<128x32xf32, #tpu.memory_space<vmem>>, vector<64x8xf32>
    tpu.vector_store %arg11[%c0_20, %c16], %54 {strides = array<i32>} : memref<128x32xf32, #tpu.memory_space<vmem>>, vector<64x8xf32>,
    %56 = vector.extract_strided_slice %7 {offsets = [0, 24], sizes = [64, 8], strides = [1, 1]} : vector<128x96xbf16> to vector<64x8xbf16>
    %57 = vector.extract_strided_slice %7 {offsets = [0, 56], sizes = [64, 8], strides = [1, 1]} : vector<128x96xbf16> to vector<64x8xbf16>
    %58 = vector.extract_strided_slice %7 {offsets = [0, 88], sizes = [64, 8], strides = [1, 1]} : vector<128x96xbf16> to vector<64x8xbf16>
    %cst_21 = arith.constant dense<0.000000e+00> : vector<64x64xf32>
    %59 = tpu.matmul %56, %57, %cst_21 {dimension_numbers = #tpu.dot_dimension_numbers<[1], [1], [0], [0], [0, 0, 1, 0], [], []>} : vector<64x8xbf16>, vector<64x8xbf16>, vector<64x64xf32> -> vector<64x64xf32>
    %cst_22 = arith.constant dense<0xFF800000> : vector<64xf32>
    %60 = vector.multi_reduction <maximumf>, %59, %cst_22 [1] : vector<64x64xf32> to vector<64xf32>
    %61 = vector.shape_cast %60 : vector<64xf32> to vector<64x1xf32>
    %62 = vector.broadcast %61 : vector<64x1xf32> to vector<64x64xf32>
    %63 = arith.subf %59, %62 : vector<64x64xf32>
    %64 = math.exp %63 : vector<64x64xf32>
    %cst_23 = arith.constant dense<0.000000e+00> : vector<64xf32>
    %65 = vector.multi_reduction <add>, %64, %cst_23 [1] : vector<64x64xf32> to vector<64xf32>
    %66 = vector.shape_cast %65 : vector<64xf32> to vector<64x1xf32>
    %67 = vector.broadcast %66 : vector<64x1xf32> to vector<64x64xf32>
    %68 = arith.divf %64, %67 : vector<64x64xf32>
    %69 = arith.truncf %68 : vector<64x64xf32> to vector<64x64xbf16>
    %cst_24 = arith.constant dense<0.000000e+00> : vector<64x8xf32>
    %70 = tpu.matmul %69, %58, %cst_24 {dimension_numbers = #tpu.dot_dimension_numbers<[1], [0], [0], [1], [0, 0, 1, 1], [], []>} : vector<64x64xbf16>, vector<64x8xbf16>, vector<64x8xf32> -> vector<64x8xf32>
    %c0_25 = arith.constant 0 : index
    %c24 = arith.constant 24 : index
    %71 = vector.load %arg11[%c0_25, %c24] : memref<128x32xf32, #tpu.memory_space<vmem>>, vector<64x8xf32>
    tpu.vector_store %arg11[%c0_25, %c24], %70 {strides = array<i32>} : memref<128x32xf32, #tpu.memory_space<vmem>>, vector<64x8xf32>,
    %72 = vector.extract_strided_slice %7 {offsets = [64, 0], sizes = [64, 8], strides = [1, 1]} : vector<128x96xbf16> to vector<64x8xbf16>
    %73 = vector.extract_strided_slice %7 {offsets = [64, 32], sizes = [64, 8], strides = [1, 1]} : vector<128x96xbf16> to vector<64x8xbf16>
    %74 = vector.extract_strided_slice %7 {offsets = [64, 64], sizes = [64, 8], strides = [1, 1]} : vector<128x96xbf16> to vector<64x8xbf16>
    %cst_26 = arith.constant dense<0.000000e+00> : vector<64x64xf32>
    %75 = tpu.matmul %72, %73, %cst_26 {dimension_numbers = #tpu.dot_dimension_numbers<[1], [1], [0], [0], [0, 0, 1, 0], [], []>} : vector<64x8xbf16>, vector<64x8xbf16>, vector<64x64xf32> -> vector<64x64xf32>
    %cst_27 = arith.constant dense<0xFF800000> : vector<64xf32>
    %76 = vector.multi_reduction <maximumf>, %75, %cst_27 [1] : vector<64x64xf32> to vector<64xf32>
    %77 = vector.shape_cast %76 : vector<64xf32> to vector<64x1xf32>
    %78 = vector.broadcast %77 : vector<64x1xf32> to vector<64x64xf32>
    %79 = arith.subf %75, %78 : vector<64x64xf32>
    %80 = math.exp %79 : vector<64x64xf32>
    %cst_28 = arith.constant dense<0.000000e+00> : vector<64xf32>
    %81 = vector.multi_reduction <add>, %80, %cst_28 [1] : vector<64x64xf32> to vector<64xf32>
    %82 = vector.shape_cast %81 : vector<64xf32> to vector<64x1xf32>
    %83 = vector.broadcast %82 : vector<64x1xf32> to vector<64x64xf32>
    %84 = arith.divf %80, %83 : vector<64x64xf32>
    %85 = arith.truncf %84 : vector<64x64xf32> to vector<64x64xbf16>
    %cst_29 = arith.constant dense<0.000000e+00> : vector<64x8xf32>
    %86 = tpu.matmul %85, %74, %cst_29 {dimension_numbers = #tpu.dot_dimension_numbers<[1], [0], [0], [1], [0, 0, 1, 1], [], []>} : vector<64x64xbf16>, vector<64x8xbf16>, vector<64x8xf32> -> vector<64x8xf32>
    %c64 = arith.constant 64 : index
    %c0_30 = arith.constant 0 : index
    %87 = vector.load %arg11[%c64, %c0_30] : memref<128x32xf32, #tpu.memory_space<vmem>>, vector<64x8xf32>
    tpu.vector_store %arg11[%c64, %c0_30], %86 {strides = array<i32>} : memref<128x32xf32, #tpu.memory_space<vmem>>, vector<64x8xf32>,
    %88 = vector.extract_strided_slice %7 {offsets = [64, 8], sizes = [64, 8], strides = [1, 1]} : vector<128x96xbf16> to vector<64x8xbf16>
    %89 = vector.extract_strided_slice %7 {offsets = [64, 40], sizes = [64, 8], strides = [1, 1]} : vector<128x96xbf16> to vector<64x8xbf16>
    %90 = vector.extract_strided_slice %7 {offsets = [64, 72], sizes = [64, 8], strides = [1, 1]} : vector<128x96xbf16> to vector<64x8xbf16>
    %cst_31 = arith.constant dense<0.000000e+00> : vector<64x64xf32>
    %91 = tpu.matmul %88, %89, %cst_31 {dimension_numbers = #tpu.dot_dimension_numbers<[1], [1], [0], [0], [0, 0, 1, 0], [], []>} : vector<64x8xbf16>, vector<64x8xbf16>, vector<64x64xf32> -> vector<64x64xf32>
    %cst_32 = arith.constant dense<0xFF800000> : vector<64xf32>
    %92 = vector.multi_reduction <maximumf>, %91, %cst_32 [1] : vector<64x64xf32> to vector<64xf32>
    %93 = vector.shape_cast %92 : vector<64xf32> to vector<64x1xf32>
    %94 = vector.broadcast %93 : vector<64x1xf32> to vector<64x64xf32>
    %95 = arith.subf %91, %94 : vector<64x64xf32>
    %96 = math.exp %95 : vector<64x64xf32>
    %cst_33 = arith.constant dense<0.000000e+00> : vector<64xf32>
    %97 = vector.multi_reduction <add>, %96, %cst_33 [1] : vector<64x64xf32> to vector<64xf32>
    %98 = vector.shape_cast %97 : vector<64xf32> to vector<64x1xf32>
    %99 = vector.broadcast %98 : vector<64x1xf32> to vector<64x64xf32>
    %100 = arith.divf %96, %99 : vector<64x64xf32>
    %101 = arith.truncf %100 : vector<64x64xf32> to vector<64x64xbf16>
    %cst_34 = arith.constant dense<0.000000e+00> : vector<64x8xf32>
    %102 = tpu.matmul %101, %90, %cst_34 {dimension_numbers = #tpu.dot_dimension_numbers<[1], [0], [0], [1], [0, 0, 1, 1], [], []>} : vector<64x64xbf16>, vector<64x8xbf16>, vector<64x8xf32> -> vector<64x8xf32>
    %c64_35 = arith.constant 64 : index
    %c8_36 = arith.constant 8 : index
    %103 = vector.load %arg11[%c64_35, %c8_36] : memref<128x32xf32, #tpu.memory_space<vmem>>, vector<64x8xf32>
    tpu.vector_store %arg11[%c64_35, %c8_36], %102 {strides = array<i32>} : memref<128x32xf32, #tpu.memory_space<vmem>>, vector<64x8xf32>,
    %104 = vector.extract_strided_slice %7 {offsets = [64, 16], sizes = [64, 8], strides = [1, 1]} : vector<128x96xbf16> to vector<64x8xbf16>
    %105 = vector.extract_strided_slice %7 {offsets = [64, 48], sizes = [64, 8], strides = [1, 1]} : vector<128x96xbf16> to vector<64x8xbf16>
    %106 = vector.extract_strided_slice %7 {offsets = [64, 80], sizes = [64, 8], strides = [1, 1]} : vector<128x96xbf16> to vector<64x8xbf16>
    %cst_37 = arith.constant dense<0.000000e+00> : vector<64x64xf32>
    %107 = tpu.matmul %104, %105, %cst_37 {dimension_numbers = #tpu.dot_dimension_numbers<[1], [1], [0], [0], [0, 0, 1, 0], [], []>} : vector<64x8xbf16>, vector<64x8xbf16>, vector<64x64xf32> -> vector<64x64xf32>
    %cst_38 = arith.constant dense<0xFF800000> : vector<64xf32>
    %108 = vector.multi_reduction <maximumf>, %107, %cst_38 [1] : vector<64x64xf32> to vector<64xf32>
    %109 = vector.shape_cast %108 : vector<64xf32> to vector<64x1xf32>
    %110 = vector.broadcast %109 : vector<64x1xf32> to vector<64x64xf32>
    %111 = arith.subf %107, %110 : vector<64x64xf32>
    %112 = math.exp %111 : vector<64x64xf32>
    %cst_39 = arith.constant dense<0.000000e+00> : vector<64xf32>
    %113 = vector.multi_reduction <add>, %112, %cst_39 [1] : vector<64x64xf32> to vector<64xf32>
    %114 = vector.shape_cast %113 : vector<64xf32> to vector<64x1xf32>
    %115 = vector.broadcast %114 : vector<64x1xf32> to vector<64x64xf32>
    %116 = arith.divf %112, %115 : vector<64x64xf32>
    %117 = arith.truncf %116 : vector<64x64xf32> to vector<64x64xbf16>
    %cst_40 = arith.constant dense<0.000000e+00> : vector<64x8xf32>
    %118 = tpu.matmul %117, %106, %cst_40 {dimension_numbers = #tpu.dot_dimension_numbers<[1], [0], [0], [1], [0, 0, 1, 1], [], []>} : vector<64x64xbf16>, vector<64x8xbf16>, vector<64x8xf32> -> vector<64x8xf32>
    %c64_41 = arith.constant 64 : index
    %c16_42 = arith.constant 16 : index
    %119 = vector.load %arg11[%c64_41, %c16_42] : memref<128x32xf32, #tpu.memory_space<vmem>>, vector<64x8xf32>
    tpu.vector_store %arg11[%c64_41, %c16_42], %118 {strides = array<i32>} : memref<128x32xf32, #tpu.memory_space<vmem>>, vector<64x8xf32>,
    %120 = vector.extract_strided_slice %7 {offsets = [64, 24], sizes = [64, 8], strides = [1, 1]} : vector<128x96xbf16> to vector<64x8xbf16>
    %121 = vector.extract_strided_slice %7 {offsets = [64, 56], sizes = [64, 8], strides = [1, 1]} : vector<128x96xbf16> to vector<64x8xbf16>
    %122 = vector.extract_strided_slice %7 {offsets = [64, 88], sizes = [64, 8], strides = [1, 1]} : vector<128x96xbf16> to vector<64x8xbf16>
    %cst_43 = arith.constant dense<0.000000e+00> : vector<64x64xf32>
    %123 = tpu.matmul %120, %121, %cst_43 {dimension_numbers = #tpu.dot_dimension_numbers<[1], [1], [0], [0], [0, 0, 1, 0], [], []>} : vector<64x8xbf16>, vector<64x8xbf16>, vector<64x64xf32> -> vector<64x64xf32>
    %cst_44 = arith.constant dense<0xFF800000> : vector<64xf32>
    %124 = vector.multi_reduction <maximumf>, %123, %cst_44 [1] : vector<64x64xf32> to vector<64xf32>
    %125 = vector.shape_cast %124 : vector<64xf32> to vector<64x1xf32>
    %126 = vector.broadcast %125 : vector<64x1xf32> to vector<64x64xf32>
    %127 = arith.subf %123, %126 : vector<64x64xf32>
    %128 = math.exp %127 : vector<64x64xf32>
    %cst_45 = arith.constant dense<0.000000e+00> : vector<64xf32>
    %129 = vector.multi_reduction <add>, %128, %cst_45 [1] : vector<64x64xf32> to vector<64xf32>
    %130 = vector.shape_cast %129 : vector<64xf32> to vector<64x1xf32>
    %131 = vector.broadcast %130 : vector<64x1xf32> to vector<64x64xf32>
    %132 = arith.divf %128, %131 : vector<64x64xf32>
    %133 = arith.truncf %132 : vector<64x64xf32> to vector<64x64xbf16>
    %cst_46 = arith.constant dense<0.000000e+00> : vector<64x8xf32>
    %134 = tpu.matmul %133, %122, %cst_46 {dimension_numbers = #tpu.dot_dimension_numbers<[1], [0], [0], [1], [0, 0, 1, 1], [], []>} : vector<64x64xbf16>, vector<64x8xbf16>, vector<64x8xf32> -> vector<64x8xf32>
    %c64_47 = arith.constant 64 : index
    %c24_48 = arith.constant 24 : index
    %135 = vector.load %arg11[%c64_47, %c24_48] : memref<128x32xf32, #tpu.memory_space<vmem>>, vector<64x8xf32>
    tpu.vector_store %arg11[%c64_47, %c24_48], %134 {strides = array<i32>} : memref<128x32xf32, #tpu.memory_space<vmem>>, vector<64x8xf32>,
    %c0_49 = arith.constant 0 : index
    %c0_50 = arith.constant 0 : index
    %136 = vector.load %arg11[%c0_49, %c0_50] : memref<128x32xf32, #tpu.memory_space<vmem>>, vector<128x32xf32>
    %137 = arith.truncf %136 : vector<128x32xf32> to vector<128x32xbf16>
    %c0_51 = arith.constant 0 : index
    %c0_52 = arith.constant 0 : index
    %138 = vector.load %arg4[%c0_51, %c0_52] : memref<32x32xbf16, #tpu.memory_space<vmem>>, vector<32x32xbf16>
    %cst_53 = arith.constant dense<0.000000e+00> : vector<128x32xf32>
    %139 = tpu.matmul %137, %138, %cst_53 {dimension_numbers = #tpu.dot_dimension_numbers<[1], [0], [0], [1], [0, 0, 1, 1], [], []>} : vector<128x32xbf16>, vector<32x32xbf16>, vector<128x32xf32> -> vector<128x32xf32>
    %c0_54 = arith.constant 0 : index
    %c0_55 = arith.constant 0 : index
    %140 = vector.load %arg5[%c0_54, %c0_55] : memref<1x32xf32, #tpu.memory_space<vmem>>, vector<1x32xf32>
    %141 = vector.broadcast %140 : vector<1x32xf32> to vector<128x32xf32>
    %142 = arith.addf %139, %141 : vector<128x32xf32>
    %143 = arith.addf %0, %142 : vector<128x32xf32>
    %144 = arith.truncf %143 : vector<128x32xf32> to vector<128x32xbf16>
    %c0_56 = arith.constant 0 : index
    %c0_57 = arith.constant 0 : index
    %145 = vector.load %arg6[%c0_56, %c0_57] : memref<32x128xbf16, #tpu.memory_space<vmem>>, vector<32x128xbf16>
    %cst_58 = arith.constant dense<0.000000e+00> : vector<128x128xf32>
    %146 = tpu.matmul %144, %145, %cst_58 {dimension_numbers = #tpu.dot_dimension_numbers<[1], [0], [0], [1], [0, 0, 1, 1], [], []>} : vector<128x32xbf16>, vector<32x128xbf16>, vector<128x128xf32> -> vector<128x128xf32>
    %c0_59 = arith.constant 0 : index
    %c0_60 = arith.constant 0 : index
    %147 = vector.load %arg7[%c0_59, %c0_60] : memref<1x128xf32, #tpu.memory_space<vmem>>, vector<1x128xf32>
    %148 = vector.broadcast %147 : vector<1x128xf32> to vector<128x128xf32>
    %149 = arith.addf %146, %148 : vector<128x128xf32>
    %cst_61 = arith.constant 5.000000e-01 : f32
    %150 = vector.broadcast %cst_61 : f32 to vector<128x128xf32>
    %151 = arith.mulf %150, %149 : vector<128x128xf32>
    %cst_62 = arith.constant 2.000000e+00 : f32
    %152 = math.sqrt %cst_62 : f32
    %153 = vector.broadcast %152 : f32 to vector<128x128xf32>
    %154 = arith.divf %149, %153 : vector<128x128xf32>
    %155 = math.erf %154 : vector<128x128xf32>
    %cst_63 = arith.constant 1.000000e+00 : f32
    %156 = vector.broadcast %cst_63 : f32 to vector<128x128xf32>
    %157 = arith.addf %156, %155 : vector<128x128xf32>
    %158 = arith.mulf %151, %157 : vector<128x128xf32>
    %159 = arith.truncf %158 : vector<128x128xf32> to vector<128x128xbf16>
    %c0_64 = arith.constant 0 : index
    %c0_65 = arith.constant 0 : index
    %160 = vector.load %arg8[%c0_64, %c0_65] : memref<128x32xbf16, #tpu.memory_space<vmem>>, vector<128x32xbf16>
    %cst_66 = arith.constant dense<0.000000e+00> : vector<128x32xf32>
    %161 = tpu.matmul %159, %160, %cst_66 {dimension_numbers = #tpu.dot_dimension_numbers<[1], [0], [0], [1], [0, 0, 1, 1], [], []>} : vector<128x128xbf16>, vector<128x32xbf16>, vector<128x32xf32> -> vector<128x32xf32>
    %c0_67 = arith.constant 0 : index
    %c0_68 = arith.constant 0 : index
    %162 = vector.load %arg9[%c0_67, %c0_68] : memref<1x32xf32, #tpu.memory_space<vmem>>, vector<1x32xf32>
    %163 = vector.broadcast %162 : vector<1x32xf32> to vector<128x32xf32>
    %164 = arith.addf %161, %163 : vector<128x32xf32>
    %165 = arith.addf %143, %164 : vector<128x32xf32>
    %c0_69 = arith.constant 0 : index
    %c0_70 = arith.constant 0 : index
    %166 = vector.load %arg10[%c0_69, %c0_70] : memref<128x32xf32, #tpu.memory_space<vmem>>, vector<128x32xf32>
    tpu.vector_store %arg10[%c0_69, %c0_70], %165 {strides = array<i32>} : memref<128x32xf32, #tpu.memory_space<vmem>>, vector<128x32xf32>,
    return
  }
  func.func @transform_0(%arg0: i32) -> (i32, i32) {
    %c0_i32 = arith.constant 0 : i32
    %c0_i32_0 = arith.constant 0 : i32
    return %arg0, %c0_i32 : i32, i32
  }
  func.func @transform_1(%arg0: i32) -> (i32, i32) {
    %c0_i32 = arith.constant 0 : i32
    %c0_i32_0 = arith.constant 0 : i32
    %c0_i32_1 = arith.constant 0 : i32
    return %c0_i32, %c0_i32_0 : i32, i32
  }
  func.func @transform_2(%arg0: i32) -> (i32, i32) {
    %c0_i32 = arith.constant 0 : i32
    %c0_i32_0 = arith.constant 0 : i32
    %c0_i32_1 = arith.constant 0 : i32
    return %c0_i32, %c0_i32_0 : i32, i32
  }
  func.func @transform_3(%arg0: i32) -> (i32, i32) {
    %c0_i32 = arith.constant 0 : i32
    %c0_i32_0 = arith.constant 0 : i32
    %c0_i32_1 = arith.constant 0 : i32
    return %c0_i32, %c0_i32_0 : i32, i32
  }
  func.func @transform_4(%arg0: i32) -> (i32, i32) {
    %c0_i32 = arith.constant 0 : i32
    %c0_i32_0 = arith.constant 0 : i32
    %c0_i32_1 = arith.constant 0 : i32
    return %c0_i32, %c0_i32_0 : i32, i32
  }
  func.func @transform_5(%arg0: i32) -> (i32, i32) {
    %c0_i32 = arith.constant 0 : i32
    %c0_i32_0 = arith.constant 0 : i32
    %c0_i32_1 = arith.constant 0 : i32
    return %c0_i32, %c0_i32_0 : i32, i32
  }
  func.func @transform_6(%arg0: i32) -> (i32, i32) {
    %c0_i32 = arith.constant 0 : i32
    %c0_i32_0 = arith.constant 0 : i32
    %c0_i32_1 = arith.constant 0 : i32
    return %c0_i32, %c0_i32_0 : i32, i32
  }
  func.func @transform_7(%arg0: i32) -> (i32, i32) {
    %c0_i32 = arith.constant 0 : i32
    %c0_i32_0 = arith.constant 0 : i32
    %c0_i32_1 = arith.constant 0 : i32
    return %c0_i32, %c0_i32_0 : i32, i32
  }
  func.func @transform_8(%arg0: i32) -> (i32, i32) {
    %c0_i32 = arith.constant 0 : i32
    %c0_i32_0 = arith.constant 0 : i32
    %c0_i32_1 = arith.constant 0 : i32
    return %c0_i32, %c0_i32_0 : i32, i32
  }
  func.func @transform_9(%arg0: i32) -> (i32, i32) {
    %c0_i32 = arith.constant 0 : i32
    %c0_i32_0 = arith.constant 0 : i32
    return %arg0, %c0_i32 : i32, i32
  }
}

</mosaic_0001>

<bundles_post_ra>
// kernel: tpu_custom_call.1
= control target key start
LH: loop header
LB: loop body
LE: loop exit
PB: predicated region body
PF: predicated region fallthrough
CT: control target
= control target key end

     0   :  { %vm77_vm0 = vcmask 261120   ;;  %s4602_s24 = smov 64   ;;  %s4603_s25 = smov 120   ;;  %vm195_vm1 = vcmask 64512   ;;  %vm249_vm2 = vcmask 523264   ;;  %s7385_s1 = inlined_call_operand.vmem [shape: bf16[32,96], index: 1, kind: input, shape index: {}]   ;;  %s7386_s0 = inlined_call_operand.vmem [shape: f32[128,32], index: 0, kind: input, shape index: {}]   ;;  %s7387_s2 = inlined_call_operand.vmem [shape: f32[1,96], index: 2, kind: input, shape index: {}]   ;;  %s7388_s3 = inlined_call_operand.vmem [shape: bf16[32,32], index: 3, kind: input, shape index: {}]   ;;  %s7389_s4 = inlined_call_operand.vmem [shape: f32[1,32], index: 4, kind: input, shape index: {}]   ;;  %s7390_s5 = inlined_call_operand.vmem [shape: bf16[32,128], index: 5, kind: input, shape index: {}]   ;;  %s7391_s6 = inlined_call_operand.vmem [shape: f32[1,128], index: 6, kind: input, shape index: {}]   ;;  %s7392_s7 = inlined_call_operand.vmem [shape: bf16[128,32], index: 7, kind: input, shape index: {}]   ;;  %s7393_s8 = inlined_call_operand.vmem [shape: f32[1,32], index: 8, kind: input, shape index: {}]   ;;  %s7394_s9 = inlined_call_operand.vmem [shape: f32[128,32], index: 9, kind: output, shape index: {}]  }
   0x1   :  { %v4263_v0 = vld [vmem:[%s7385_s1 + $0x8] sm:$0xff]  ;;  %v4262_v1 = vld [vmem:[%s7385_s1] sm:$0xff]  ;;  %v35_v5 = vld [vmem:[%s7386_s0 + $0x10] sm:$0xff]  ;;  %s4605_s26 = smov 72   ;;  %s4606_s27 = smov 80  }
   0x2   :  { %108 = vmatpush.bf16.msra.mxu0 %v4263_v0  ;;  %v33_v2 = vld [vmem:[%s7386_s0] sm:$0xff]  ;;  %v34_v3 = vld [vmem:[%s7386_s0 + $0x8] sm:$0xff]  ;;  %v36_v6 = vld [vmem:[%s7386_s0 + $0x18] sm:$0xff]  ;;  %s4607_s28 = smov 88   ;;  %s4608_s29 = smov 112  }
   0x3   :  { %v49_v4 = vpack.c.bf16 %v34_v3, %v33_v2  ;;  %v50_v7 = vpack.c.bf16 %v36_v6, %v35_v5  ;;  %v37_v8 = vld [vmem:[%s7386_s0 + $0x20] sm:$0xff]  ;;  %v38_v9 = vld [vmem:[%s7386_s0 + $0x28] sm:$0xff]  ;;  %v39_v11 = vld [vmem:[%s7386_s0 + $0x30] sm:$0xff]  ;;  %s4609_s30 = smov 56   ;;  %s4610_s10 = smov 104  }
   0x4   :  { %v51_v10 = vpack.c.bf16 %v38_v9, %v37_v8  ;;  %v40_v12 = vld [vmem:[%s7386_s0 + $0x38] sm:$0xff]  ;;  %v41_v14 = vld [vmem:[%s7386_s0 + $0x40] sm:$0xff]  ;;  %v42_v15 = vld [vmem:[%s7386_s0 + $0x48] sm:$0xff]  ;;  %s4611_s11 = smov 48   ;;  %s4612_s12 = smov 40  }
   0x5   :  { %v52_v13 = vpack.c.bf16 %v40_v12, %v39_v11  ;;  %v53_v16 = vpack.c.bf16 %v42_v15, %v41_v14  ;;  %v43_v17 = vld [vmem:[%s7386_s0 + $0x50] sm:$0xff]  ;;  %v44_v18 = vld [vmem:[%s7386_s0 + $0x58] sm:$0xff]  ;;  %v45_v20 = vld [vmem:[%s7386_s0 + $0x60] sm:$0xff]  ;;  %s4613_s13 = smov 8   ;;  %s4614_s14 = smov 16  }
   0x6   :  { %109 = vmatpush.bf16.msra.mxu0 %v4262_v1  ;;  %v54_v19 = vpack.c.bf16 %v44_v18, %v43_v17  ;;  %v46_v21 = vld [vmem:[%s7386_s0 + $0x68] sm:$0xff]  ;;  %v47_v23 = vld [vmem:[%s7386_s0 + $0x70] sm:$0xff]  ;;  %v48_v24 = vld [vmem:[%s7386_s0 + $0x78] sm:$0xff]  ;;  %s4615_s15 = smov 24  }
   0x7   :  { %v55_v22 = vpack.c.bf16 %v46_v21, %v45_v20  ;;  %v56_v25 = vpack.c.bf16 %v48_v24, %v47_v23  ;;  %v4732_v27 = vld [vmem:[%s7387_s2] ss:$0 sm:$0xff]  ;;  %s4604_s2 = smov 96  }
   0x9   :  { %4110 = vmatmul.msk.bf16.vlgmr.msra.gmra.mxu0 %vm77_vm0, %v49_v4 }
  0x19   :  { %4111 = vmatmul.msk.bf16.gmra.mxu0 %vm77_vm0, %v50_v7 }
  0x29   :  { %4112 = vmatmul.msk.bf16.gmra.mxu0 %vm77_vm0, %v51_v10 }
  0x39   :  { %4113 = vmatmul.msk.bf16.gmra.mxu0 %vm77_vm0, %v52_v13 }
  0x49   :  { %4114 = vmatmul.msk.bf16.gmra.mxu0 %vm77_vm0, %v53_v16 }
  0x59   :  { %4115 = vmatmul.msk.bf16.gmra.mxu0 %vm77_vm0, %v54_v19 }
  0x69   :  { %4116 = vmatmul.msk.bf16.gmra.mxu0 %vm77_vm0, %v55_v22 }
  0x79   :  { %4117 = vmatmul.msk.bf16.gmra.mxu0 %vm77_vm0, %v56_v25 }
  0x86   :  { %v111_v26 = vpop.f32.mrf.mxu0 }
  0x87   :  { %v112_v28 = vadd.f32 %v4732_v27, %v111_v26 }
  0x89   :  { %v151_v30 = vpack.c.bf16 %v112_v28, %v112_v28 }
  0x8b   :  { %v175_v33 = vunpack.c.l.b16 %v151_v30 }
  0x8e   :  { %v113_v29 = vpop.f32.mrf.mxu0 }
  0x8f   :  { %v114_v31 = vadd.f32 %v4732_v27, %v113_v29 }
  0x91   :  { %v152_v32 = vpack.c.bf16 %v114_v31, %v114_v31 }
  0x93   :  { %v176_v34 = vunpack.c.l.b16 %v152_v32 }
  0x95   :  { %v4736_v35 = vpack.c.b16 %v176_v34, %v175_v33 }
  0x96   :  { %v116_v36 = vpop.f32.mrf.mxu0 }
  0x97   :  { %446 = vrot.lane.b32.xlu0 %v4736_v35, %s4602_s24  ;;  %507 = vrot.lane.b32.xlu2 %v4736_v35, %s4603_s25  ;;  %v117_v37 = vadd.f32 %v4732_v27, %v116_v36 }
  0x98   :  { %187 = vrot.lane.b32.xlu1 %v4736_v35, %s4604_s2 }
  0x99   :  { %v153_v38 = vpack.c.bf16 %v117_v37, %v117_v37 }
  0x9b   :  { %v177_v41 = vunpack.c.l.b16 %v153_v38 }
  0x9e   :  { %v118_v39 = vpop.f32.mrf.mxu0 }
  0x9f   :  { %v119_v40 = vadd.f32 %v4732_v27, %v118_v39  ;;  %1233 = vrot.lane.b32.xlu0 %v4736_v35, %s4605_s26  ;;  %874 = vrot.lane.b32.xlu2 %v4736_v35, %s4606_s27 }
  0xa0   :  { %515 = vrot.lane.b32.xlu1 %v4736_v35, %s4607_s28 }
  0xa1   :  { %v154_v42 = vpack.c.bf16 %v119_v40, %v119_v40 }
  0xa3   :  { %v178_v43 = vunpack.c.l.b16 %v154_v42 }
  0xa5   :  { %v4752_v44 = vpack.c.b16 %v178_v43, %v177_v41 }
  0xa6   :  { %v121_v45 = vpop.f32.mrf.mxu0 }
  0xa7   :  { %866 = vrot.lane.b32.xlu0 %v4736_v35, %s4608_s29  ;;  %1235 = vrot.lane.b32.xlu2 %v4752_v44, %s4605_s26  ;;  %v122_v46 = vadd.f32 %v4732_v27, %v121_v45 }
  0xa8   :  { %772 = vrot.lane.b32.xlu1 %v4736_v35, %s4609_s30 }
  0xa9   :  { %v155_v47 = vpack.c.bf16 %v122_v46, %v122_v46 }
  0xab   :  { %v179_v50 = vunpack.c.l.b16 %v155_v47 }
  0xae   :  { %v123_v48 = vpop.f32.mrf.mxu0 }
  0xaf   :  { %v124_v49 = vadd.f32 %v4732_v27, %v123_v48  ;;  %517 = vrot.lane.b32.xlu0 %v4752_v44, %s4607_s28  ;;  %1227 = vrot.lane.b32.xlu2 %v4752_v44, %s4610_s10 }
  0xb0   :  { %189 = vrot.lane.b32.xlu1 %v4752_v44, %s4604_s2 }
  0xb1   :  { %v156_v51 = vpack.c.bf16 %v124_v49, %v124_v49 }
  0xb3   :  { %v180_v52 = vunpack.c.l.b16 %v156_v51 }
  0xb5   :  { %v4768_v53 = vpack.c.b16 %v180_v52, %v179_v50 }
  0xb6   :  { %v126_v54 = vpop.f32.mrf.mxu0 }
  0xb7   :  { %509 = vrot.lane.b32.xlu0 %v4752_v44, %s4603_s25  ;;  %519 = vrot.lane.b32.xlu2 %v4768_v53, %s4607_s28  ;;  %v127_v56 = vadd.f32 %v4732_v27, %v126_v54 }
  0xb8   :  { %1225 = vrot.lane.b32.xlu1 %v4736_v35, %s4610_s10 }
  0xb9   :  { %v157_v58 = vpack.c.bf16 %v127_v56, %v127_v56 }
  0xbb   :  { %v181_v60 = vunpack.c.l.b16 %v157_v58 }
  0xbe   :  { %v128_v55 = vpop.f32.mrf.mxu0 }
  0xbf   :  { %448 = vrot.lane.b32.xlu0 %v4752_v44, %s4602_s24  ;;  %776 = vrot.lane.b32.xlu2 %v4768_v53, %s4609_s30  ;;  %v129_v57 = vadd.f32 %v4732_v27, %v128_v55 }
  0xc0   :  { %774 = vrot.lane.b32.xlu1 %v4752_v44, %s4609_s30 }
  0xc1   :  { %v158_v59 = vpack.c.bf16 %v129_v57, %v129_v57 }
  0xc3   :  { %v182_v61 = vunpack.c.l.b16 %v158_v59 }
  0xc5   :  { %v4790_v62 = vpack.c.b16 %v182_v61, %v181_v60 }
  0xc6   :  { %v131_v63 = vpop.f32.mrf.mxu0 }
  0xc7   :  { %191 = vrot.lane.b32.xlu0 %v4768_v53, %s4604_s2  ;;  %870 = vrot.lane.b32.xlu2 %v4768_v53, %s4608_s29  ;;  %v132_v2 = vadd.f32 %v4732_v27, %v131_v63 }
  0xc8   :  { %876 = vrot.lane.b32.xlu1 %v4752_v44, %s4606_s27 }
  0xc9   :  { %v159_v4 = vpack.c.bf16 %v132_v2, %v132_v2 }
  0xcb   :  { %v1592_v6 = vunpack.c.l.b16 %v159_v4 }
  0xce   :  { %v133_v0 = vpop.f32.mrf.mxu0 }
  0xcf   :  { %878 = vrot.lane.b32.xlu0 %v4768_v53, %s4606_s27  ;;  %521 = vrot.lane.b32.xlu2 %v4790_v62, %s4607_s28  ;;  %v134_v3 = vadd.f32 %v4732_v27, %v133_v0 }
  0xd0   :  { %868 = vrot.lane.b32.xlu1 %v4752_v44, %s4608_s29 }
  0xd1   :  { %v160_v5 = vpack.c.bf16 %v134_v3, %v134_v3 }
  0xd3   :  { %v1593_v7 = vunpack.c.l.b16 %v160_v5 }
  0xd5   :  { %v4818_v9 = vpack.c.b16 %v1593_v7, %v1592_v6 }
  0xd6   :  { %v136_v1 = vpop.f32.mrf.mxu0 }
  0xd7   :  { %1229 = vrot.lane.b32.xlu0 %v4768_v53, %s4610_s10  ;;  %513 = vrot.lane.b32.xlu2 %v4790_v62, %s4603_s25  ;;  %v137_v10 = vadd.f32 %v4732_v27, %v136_v1 }
  0xd8   :  { %511 = vrot.lane.b32.xlu1 %v4768_v53, %s4603_s25 }
  0xd9   :  { %v161_v14 = vpack.c.bf16 %v137_v10, %v137_v10 }
  0xdb   :  { %v1594_v16 = vunpack.c.l.b16 %v161_v14 }
  0xde   :  { %v138_v8 = vpop.f32.mrf.mxu0 }
  0xdf   :  { %193 = vrot.lane.b32.xlu0 %v4790_v62, %s4604_s2  ;;  %1239 = vrot.lane.b32.xlu2 %v4790_v62, %s4605_s26  ;;  %v139_v11 = vadd.f32 %v4732_v27, %v138_v8 }
  0xe0   :  { %450 = vrot.lane.b32.xlu1 %v4768_v53, %s4602_s24 }
  0xe1   :  { %v162_v15 = vpack.c.bf16 %v139_v11, %v139_v11 }
  0xe3   :  { %v1595_v17 = vunpack.c.l.b16 %v162_v15 }
  0xe5   :  { %v4838_v19 = vpack.c.b16 %v1595_v17, %v1594_v16 }
  0xe6   :  { %v141_v13 = vpop.f32.mrf.mxu0 }
  0xe7   :  { %452 = vrot.lane.b32.xlu0 %v4790_v62, %s4602_s24  ;;  %872 = vrot.lane.b32.xlu2 %v4790_v62, %s4608_s29  ;;  %v142_v21 = vadd.f32 %v4732_v27, %v141_v13 }
  0xe8   :  { %1237 = vrot.lane.b32.xlu1 %v4768_v53, %s4605_s26 }
  0xe9   :  { %v163_v24 = vpack.c.bf16 %v142_v21, %v142_v21 }
  0xeb   :  { %v1596_v26 = vunpack.c.l.b16 %v163_v24 }
  0xee   :  { %v143_v20 = vpop.f32.mrf.mxu0 }
  0xef   :  { %778 = vrot.lane.b32.xlu0 %v4790_v62, %s4609_s30  ;;  %1604 = vrot.lane.b32.xlu2 %v4818_v9, %s4604_s2  ;;  %v144_v22 = vadd.f32 %v4732_v27, %v143_v20 }
  0xf0   :  { %1930 = vrot.lane.b32.xlu1 %v4818_v9, %s4607_s28 }
  0xf1   :  { %v4828_v12 = vpop.permute.xlu2 %507  ;;  %v164_v25 = vpack.c.bf16 %v144_v22, %v144_v22 }
  0xf3   :  { %v1597_v28 = vunpack.c.l.b16 %v164_v25 }
  0xf5   :  { %v4862_v33 = vpack.c.b16 %v1597_v28, %v1596_v26 }
  0xf6   :  { %v146_v32 = vpop.f32.mrf.mxu0 }
  0xf7   :  { %880 = vrot.lane.b32.xlu0 %v4790_v62, %s4606_s27  ;;  %2288 = vrot.lane.b32.xlu2 %v4818_v9, %s4606_s27  ;;  %7418 = vst [vmem:[#allocation4_spill] sm:$0xff] %v4862_v33  ;;  %v147_v39 = vadd.f32 %v4732_v27, %v146_v32 }
  0xf8   :  { %2646 = vrot.lane.b32.xlu1 %v4818_v9, %s4605_s26 }
  0xf9   :  { %v4836_v18 = vpop.permute.xlu2 %874  ;;  %v165_v45 = vpack.c.bf16 %v147_v39, %v147_v39 }
  0xfb   :  { %v1598_v47 = vunpack.c.l.b16 %v165_v45 }
  0xfe   :  { %v148_v38 = vpop.f32.mrf.mxu0 }
  0xff   :  { %1231 = vrot.lane.b32.xlu0 %v4790_v62, %s4610_s10  ;;  %2638 = vrot.lane.b32.xlu2 %v4818_v9, %s4610_s10  ;;  %v149_v40 = vadd.f32 %v4732_v27, %v148_v38 }
 0x100   :  { %1606 = vrot.lane.b32.xlu1 %v4838_v19, %s4604_s2 }
 0x101   :  { %v4848_v23 = vpop.permute.xlu2 %1235  ;;  %v166_v46 = vpack.c.bf16 %v149_v40, %v149_v40 }
 0x103   :  { %v1599_v48 = vunpack.c.l.b16 %v166_v46 }
 0x105   :  { %v4894_v51 = vpack.c.b16 %v1599_v48, %v1598_v47 }
 0x107   :  { %1922 = vrot.lane.b32.xlu0 %v4818_v9, %s4603_s25  ;;  %1924 = vrot.lane.b32.xlu2 %v4838_v19, %s4603_s25  ;;  %7419 = vst [vmem:[#allocation5_spill] sm:$0xff] %v4894_v51 }
 0x108   :  { %2282 = vrot.lane.b32.xlu1 %v4838_v19, %s4608_s29 }
 0x109   :  { %v4856_v29 = vpop.permute.xlu0 %446  ;;  %v4858_v30 = vpop.permute.xlu2 %1227 }
 0x10a   :  { %7417 = vst [vmem:[#allocation3_spill] sm:$0xff] %v4858_v30  ;;  %v4860_v31 = vpop.permute.xlu1 %187 }
 0x10b   :  { %v209_v22 = vsel %vm195_vm1, %v4860_v31, 0 }
 0x10f   :  { %2280 = vrot.lane.b32.xlu0 %v4818_v9, %s4608_s29  ;;  %2290 = vrot.lane.b32.xlu2 %v4838_v19, %s4606_s27 }
 0x110   :  { %1934 = vrot.lane.b32.xlu1 %v4862_v33, %s4607_s28 }
 0x111   :  { %v4870_v34 = vpop.permute.xlu0 %1233  ;;  %v520_v36 = vpop.permute.xlu2 %519 }
 0x112   :  { %v516_v37 = vpop.permute.xlu1 %515  ;;  %v542_v59 = vsel %vm195_vm1, %v520_v36, 0 }
 0x113   :  { %v536_v2 = vsel %vm195_vm1, %v516_v37, 0 }
 0x117   :  { %1932 = vrot.lane.b32.xlu0 %v4838_v19, %s4607_s28  ;;  %1608 = vrot.lane.b32.xlu2 %v4862_v33, %s4604_s2 }
 0x118   :  { %2292 = vrot.lane.b32.xlu1 %v4862_v33, %s4606_s27 }
 0x119   :  { %v4880_v41 = vpop.permute.xlu0 %866  ;;  %v4882_v42 = vpop.permute.xlu2 %776 }
 0x11a   :  { %v4884_v43 = vpop.permute.xlu1 %772 }
 0x11f   :  { %2648 = vrot.lane.b32.xlu0 %v4838_v19, %s4605_s26  ;;  %2284 = vrot.lane.b32.xlu2 %v4862_v33, %s4608_s29 }
 0x120   :  { %2642 = vrot.lane.b32.xlu1 %v4862_v33, %s4610_s10 }
 0x121   :  { %v518_v27 = vpop.permute.xlu0 %517  ;;  %v4892_v49 = vpop.permute.xlu2 %870 }
 0x122   :  { %v190_v50 = vpop.permute.xlu1 %189  ;;  %v539_v63 = vsel %vm195_vm1, %v518_v27, 0 }
 0x123   :  { %v212_v16 = vsel %vm195_vm1, %v190_v50, 0 }
 0x127   :  { %2640 = vrot.lane.b32.xlu0 %v4838_v19, %s4610_s10  ;;  %2652 = vrot.lane.b32.xlu2 %v4894_v51, %s4605_s26 }
 0x128   :  { %1610 = vrot.lane.b32.xlu1 %v4894_v51, %s4604_s2 }
 0x129   :  { %v510_v52 = vpop.permute.xlu0 %509  ;;  %v522_v54 = vpop.permute.xlu2 %521 }
 0x12a   :  { %v4902_v55 = vpop.permute.xlu1 %1225  ;;  %v545_v56 = vsel %vm195_vm1, %v522_v54, 0 }
 0x12b   :  { %7420 = vst [vmem:[#allocation6_spill] sm:$0xff] %v4902_v55  ;;  %551 = vmatpush.bf16.xpose.msra.mxu3 %v545_v56 }
 0x12f   :  { %1926 = vrot.lane.b32.xlu0 %v4862_v33, %s4603_s25 }
 0x130   :  { %2294 = vrot.lane.b32.xlu1 %v4894_v51, %s4606_s27 }
 0x131   :  { %v449_v57 = vpop.permute.xlu0 %448  ;;  %v514_v5 = vpop.permute.xlu2 %513 }
 0x132   :  { %v775_v58 = vpop.permute.xlu1 %774 }
 0x133   :  { %552 = vmatpush.bf16.xpose.msra.mxu3 %v542_v59 }
 0x137   :  { %2650 = vrot.lane.b32.xlu0 %v4862_v33, %s4605_s26 }
 0x138   :  { %1928 = vrot.lane.b32.xlu1 %v4894_v51, %s4603_s25 }
 0x139   :  { %v192_v60 = vpop.permute.xlu0 %191  ;;  %v4929_v11 = vpop.permute.xlu2 %1239 }
 0x13a   :  { %v877_v61 = vpop.permute.xlu1 %876  ;;  %v215_v14 = vsel %vm195_vm1, %v192_v60, 0 }
 0x13b   :  { %553 = vmatpush.bf16.xpose.msra.mxu3 %v539_v63  ;;  %v898_v37 = vsel %vm195_vm1, %v877_v61, 0 }
 0x13f   :  { %1936 = vrot.lane.b32.xlu0 %v4894_v51, %s4607_s28 }
 0x140   :  { %2644 = vrot.lane.b32.xlu1 %v4894_v51, %s4610_s10 }
 0x141   :  { %v879_v0 = vpop.permute.xlu0 %878  ;;  %v4938_v17 = vpop.permute.xlu2 %872 }
 0x142   :  { %v4919_v1 = vpop.permute.xlu1 %868 }
 0x143   :  { %554 = vmatpush.bf16.xpose.msra.mxu3 %v536_v2 }
 0x147   :  { %2286 = vrot.lane.b32.xlu0 %v4894_v51, %s4608_s29 }
 0x149   :  { %v4924_v3 = vpop.permute.xlu0 %1229  ;;  %v1605_v25 = vpop.permute.xlu2 %1604 }
 0x14a   :  { %7421 = vst [vmem:[#allocation7_spill] sm:$0xff] %v4924_v3  ;;  %v512_v4 = vpop.permute.xlu1 %511  ;;  %4126 = vmatmul.msk.bf16.vlgmr.msra.gmra.mxu3 %vm195_vm1, %v4828_v12  ;;  %v1625_v63 = vsel %vm195_vm1, %v1605_v25, 0 }
 0x151   :  { %v194_v6 = vpop.permute.xlu0 %193  ;;  %v2289_v31 = vpop.permute.xlu2 %2288 }
 0x152   :  { %v451_v7 = vpop.permute.xlu1 %450  ;;  %v218_v8 = vsel %vm195_vm1, %v194_v6, 0 }
 0x153   :  { %224 = vmatpush.bf16.xpose.msra.mxu1 %v218_v8 }
 0x159   :  { %v453_v10 = vpop.permute.xlu0 %452  ;;  %v4958_v38 = vpop.permute.xlu2 %2638 }
 0x15a   :  { %v4931_v13 = vpop.permute.xlu1 %1237  ;;  %474 = vmatpush.bf16.msra.mxu2 %v453_v10  ;;  %4127 = vmatmul.msk.bf16.gmra.mxu3 %vm195_vm1, %v510_v52 }
 0x15b   :  { %225 = vmatpush.bf16.xpose.msra.mxu1 %v215_v14 }
 0x15e   :  { %475 = vmatpush.bf16.msra.mxu2 %v451_v7 }
 0x161   :  { %v779_v15 = vpop.permute.xlu0 %778  ;;  %v1925_v45 = vpop.permute.xlu2 %1924 }
 0x162   :  { %v4935_v12 = vpop.permute.xlu1 %1930  ;;  %476 = vmatpush.bf16.msra.mxu2 %v449_v57 }
 0x163   :  { %226 = vmatpush.bf16.xpose.msra.mxu1 %v212_v16  ;;  %v1951_v10 = vsel %vm195_vm1, %v4935_v12, 0 }
 0x166   :  { %477 = vmatpush.bf16.msra.mxu2 %v4856_v29  ;;  %v901_v29 = vsel %vm195_vm1, %v879_v0, 0 }
 0x169   :  { %v881_v20 = vpop.permute.xlu0 %880  ;;  %v2291_v27 = vpop.permute.xlu2 %2290 }
 0x16a   :  { %800 = vmatpush.bf16.msrb.mxu2 %v779_v15  ;;  %v4941_v21 = vpop.permute.xlu1 %2646  ;;  %4128 = vmatmul.msk.bf16.gmra.mxu3 %vm195_vm1, %v512_v4  ;;  %v904_v24 = vsel %vm195_vm1, %v881_v20, 0  ;;  %v2309_v15 = vsel %vm195_vm1, %v2289_v31, 0 }
 0x16b   :  { %227 = vmatpush.bf16.xpose.msra.mxu1 %v209_v22  ;;  %v2667_v25 = vsel %vm195_vm1, %v4941_v21, 0 }
 0x16e   :  { %801 = vmatpush.bf16.msrb.mxu2 %v4882_v42  ;;  %v895_v42 = vsel %vm195_vm1, %v4836_v18, 0 }
 0x171   :  { %v4948_v26 = vpop.permute.xlu0 %1231  ;;  %v1609_v56 = vpop.permute.xlu2 %1608 }
 0x172   :  { %802 = vmatpush.bf16.msrb.mxu2 %v775_v58  ;;  %7422 = vst [vmem:[#allocation8_spill] sm:$0xff] %v4948_v26  ;;  %v1607_v28 = vpop.permute.xlu1 %1606  ;;  %4118 = vmatmul.msk.bf16.vlgmr.msra.gmra.mxu1 %vm195_vm1, %v4736_v35  ;;  %v1631_v18 = vsel %vm195_vm1, %v1609_v56, 0 }
 0x173   :  { %910 = vmatpush.bf16.xpose.msrb.mxu1 %v904_v24  ;;  %v1628_v59 = vsel %vm195_vm1, %v1607_v28, 0 }
 0x176   :  { %803 = vmatpush.bf16.msrb.mxu2 %v4884_v43 }
 0x179   :  { %v1923_v32 = vpop.permute.xlu0 %1922  ;;  %v4984_v6 = vpop.permute.xlu2 %2284 }
 0x17a   :  { %v4954_v36 = vpop.permute.xlu1 %2282  ;;  %4129 = vmatmul.msk.bf16.gmra.mxu3 %vm195_vm1, %v514_v5 }
 0x17b   :  { %911 = vmatpush.bf16.xpose.msrb.mxu1 %v901_v29 }
 0x181   :  { %v4960_v39 = vpop.permute.xlu0 %2280  ;;  %v2653_v8 = vpop.permute.xlu2 %2652 }
 0x182   :  { %v1935_v40 = vpop.permute.xlu1 %1934  ;;  %4119 = vmatmul.msk.bf16.gmra.mxu1 %vm195_vm1, %v4752_v44  ;;  %v2676_v14 = vsel %vm195_vm1, %v2653_v8, 0 }
 0x183   :  { %912 = vmatpush.bf16.xpose.msrb.mxu1 %v898_v37  ;;  %v1957_v4 = vsel %vm195_vm1, %v1935_v40, 0 }
 0x189   :  { %v1933_v43 = vpop.permute.xlu0 %1932 }
 0x18a   :  { %v2293_v46 = vpop.permute.xlu1 %2292  ;;  %v1954_v7 = vsel %vm195_vm1, %v1933_v43, 0 }
 0x18b   :  { %913 = vmatpush.bf16.xpose.msrb.mxu1 %v895_v42  ;;  %v2315_v5 = vsel %vm195_vm1, %v2293_v46, 0 }
 0x191   :  { %v2649_v47 = vpop.permute.xlu0 %2648 }
 0x192   :  { %v4966_v48 = vpop.permute.xlu1 %2642  ;;  %4120 = vmatmul.msk.bf16.gmra.mxu1 %vm195_vm1, %v4768_v53  ;;  %v2670_v24 = vsel %vm195_vm1, %v2649_v47, 0 }
 0x199   :  { %v4970_v50 = vpop.permute.xlu0 %2640 }
 0x19a   :  { %v1611_v52 = vpop.permute.xlu1 %1610 }
 0x19b   :  { %v1634_v54 = vsel %vm195_vm1, %v1611_v52, 0 }
 0x19c   :  { %1640 = vmatpush.bf16.xpose.msra.mxu1 %v1634_v54 }
 0x1a1   :  { %v1927_v57 = vpop.permute.xlu0 %1926 }
 0x1a2   :  { %4121 = vmatmul.msk.bf16.gmra.mxu1 %vm195_vm1, %v4790_v62  ;;  %v2295_v60 = vpop.permute.xlu1 %2294 }
 0x1a3   :  { %v2318_v0 = vsel %vm195_vm1, %v2295_v60, 0 }
 0x1a4   :  { %1641 = vmatpush.bf16.xpose.msra.mxu1 %v1631_v18 }
 0x1a9   :  { %v2651_v58 = vpop.permute.xlu0 %2650 }
 0x1aa   :  { %v2673_v20 = vsel %vm195_vm1, %v2651_v58, 0  ;;  %v1929_v37 = vpop.permute.xlu1 %1928 }
 0x1ac   :  { %1642 = vmatpush.bf16.xpose.msra.mxu1 %v1628_v59 }
 0x1b1   :  { %v1937_v61 = vpop.permute.xlu0 %1936 }
 0x1b2   :  { %4134 = vmatmul.msk.bf16.vlgmr.msrb.gmra.mxu1 %vm195_vm1, %v4880_v41  ;;  %v1960_v2 = vsel %vm195_vm1, %v1937_v61, 0  ;;  %v2312_v41 = vsel %vm195_vm1, %v2291_v27, 0 }
 0x1b3   :  { %1966 = vmatpush.bf16.xpose.msrb.mxu0 %v1960_v2 }
 0x1b4   :  { %1643 = vmatpush.bf16.xpose.msra.mxu1 %v1625_v63 }
 0x1bb   :  { %1967 = vmatpush.bf16.xpose.msrb.mxu0 %v1957_v4 }
 0x1bc   :  { %2324 = vmatpush.bf16.xpose.msrb.mxu1 %v2318_v0 }
 0x1c2   :  { %4135 = vmatmul.msk.bf16.gmra.mxu1 %vm195_vm1, %v4919_v1 }
 0x1c3   :  { %1968 = vmatpush.bf16.xpose.msrb.mxu0 %v1954_v7 }
 0x1c4   :  { %2325 = vmatpush.bf16.xpose.msrb.mxu1 %v2315_v5 }
 0x1cb   :  { %1969 = vmatpush.bf16.xpose.msrb.mxu0 %v1951_v10 }
 0x1cc   :  { %2326 = vmatpush.bf16.xpose.msrb.mxu1 %v2312_v41 }
 0x1cd   :  { %v4994_v16 = vpop.f32.mrf.mxu3 }
 0x1ce   :  { %v576_v1 = vsel %vm249_vm2, %v4994_v16, -inf }
 0x1cf   :  { %577 = vmax.xlane.f32.xlu2 %v576_v1 }
 0x1d2   :  { %4136 = vmatmul.msk.bf16.gmra.mxu1 %vm195_vm1, %v4892_v49  ;;  %4158 = vmatmul.msk.bf16.vlgmr.msrb.gmra.mxu0 %vm195_vm1, %v1923_v32 }
 0x1d3   :  { %2682 = vmatpush.bf16.xpose.msra.mxu0 %v2676_v14  ;;  %v2645_v14 = vpop.permute.xlu1 %2644 }
 0x1d4   :  { %2327 = vmatpush.bf16.xpose.msrb.mxu1 %v2309_v15 }
 0x1d5   :  { %v5002_v12 = vpop.f32.mrf.mxu3 }
 0x1d6   :  { %v579_v22 = vsel %vm249_vm2, %v5002_v12, -inf }
 0x1d7   :  { %580 = vmax.xlane.f32.xlu2 %v579_v22 }
 0x1db   :  { %2683 = vmatpush.bf16.xpose.msra.mxu0 %v2673_v20 }
 0x1dd   :  { %v5012_v49 = vpop.f32.mrf.mxu3 }
 0x1e2   :  { %4137 = vmatmul.msk.bf16.gmra.mxu1 %vm195_vm1, %v4938_v17  ;;  %4159 = vmatmul.msk.bf16.gmra.mxu0 %vm195_vm1, %v1925_v45  ;;  %v582_v45 = vsel %vm249_vm2, %v5012_v49, -inf }
 0x1e3   :  { %2684 = vmatpush.bf16.xpose.msra.mxu0 %v2670_v24 }
 0x1e5   :  { %v5021_v21 = vpop.f32.mrf.mxu3 }
 0x1e6   :  { %v585_v17 = vsel %vm249_vm2, %v5021_v21, -inf }
 0x1eb   :  { %2685 = vmatpush.bf16.xpose.msra.mxu0 %v2667_v25 }
 0x1ed   :  { %v5040_v46 = vpop.f32.mrf.mxu3 }
 0x1ee   :  { %v588_v18 = vsel %vm249_vm2, %v5040_v46, -inf }
 0x1ef   :  { %v5014_v28 = vpop.f32.mrf.mxu1 }
 0x1f0   :  { %v250_v29 = vsel %vm249_vm2, %v5014_v28, -inf }
 0x1f1   :  { %251 = vmax.xlane.f32.xlu0 %v250_v29  ;;  %v2287_v29 = vpop.permute.xlu0 %2286 }
 0x1f2   :  { %4150 = vmatmul.msk.bf16.vlgmr.msra.gmra.mxu1 %vm195_vm1, %v4818_v9  ;;  %4160 = vmatmul.msk.bf16.gmra.mxu0 %vm195_vm1, %v1927_v57 }
 0x1f5   :  { %v5052_v54 = vpop.f32.mrf.mxu3 }
 0x1f6   :  { %v591_v60 = vsel %vm249_vm2, %v5052_v54, -inf }
 0x1f7   :  { %v5023_v31 = vpop.f32.mrf.mxu1 }
 0x1f8   :  { %v253_v32 = vsel %vm249_vm2, %v5023_v31, -inf }
 0x1f9   :  { %586 = vmax.xlane.f32.xlu0 %v585_v17  ;;  %254 = vmax.xlane.f32.xlu1 %v253_v32 }
 0x1fd   :  { %v5060_v58 = vpop.f32.mrf.mxu3 }
 0x1ff   :  { %v5029_v40 = vpop.f32.mrf.mxu1 }
 0x200   :  { %v256_v42 = vsel %vm249_vm2, %v5029_v40, -inf }
 0x201   :  { %257 = vmax.xlane.f32.xlu2 %v256_v42 }
 0x202   :  { %4151 = vmatmul.msk.bf16.gmra.mxu1 %vm195_vm1, %v4838_v19  ;;  %4161 = vmatmul.msk.bf16.gmra.mxu0 %vm195_vm1, %v1929_v37 }
 0x205   :  { %v5078_v2 = vpop.f32.mrf.mxu3 }
 0x206   :  { %v597_v5 = vsel %vm249_vm2, %v5078_v2, -inf }
 0x207   :  { %v5036_v43 = vpop.f32.mrf.mxu1 }
 0x208   :  { %v259_v27 = vsel %vm249_vm2, %v5036_v43, -inf }
 0x209   :  { %583 = vmax.xlane.f32.xlu2 %v582_v45 }
 0x20f   :  { %v5042_v47 = vpop.f32.mrf.mxu1 }
 0x210   :  { %v262_v52 = vsel %vm249_vm2, %v5042_v47, -inf }
 0x211   :  { %260 = vmax.xlane.f32.xlu2 %v259_v27  ;;  %263 = vmax.xlane.f32.xlu0 %v262_v52 }
 0x212   :  { %4152 = vmatmul.msk.bf16.gmra.mxu1 %vm195_vm1, %v4862_v33  ;;  %4174 = vmatmul.msk.bf16.vlgmr.msra.gmra.mxu0 %vm195_vm1, %v4958_v38  ;;  %v594_v38 = vsel %vm249_vm2, %v5060_v58, -inf }
 0x217   :  { %v5054_v56 = vpop.f32.mrf.mxu1 }
 0x218   :  { %v265_v57 = vsel %vm249_vm2, %v5054_v56, -inf }
 0x219   :  { %266 = vmax.xlane.f32.xlu1 %v265_v57  ;;  %589 = vmax.xlane.f32.xlu2 %v588_v18 }
 0x21f   :  { %v5062_v59 = vpop.f32.mrf.mxu1 }
 0x220   :  { %v268_v0 = vsel %vm249_vm2, %v5062_v59, -inf }
 0x221   :  { %592 = vmax.xlane.f32.xlu2 %v591_v60  ;;  %595 = vmax.xlane.f32.xlu1 %v594_v38 }
 0x222   :  { %4153 = vmatmul.msk.bf16.gmra.mxu1 %vm195_vm1, %v4894_v51  ;;  %4175 = vmatmul.msk.bf16.gmra.mxu0 %vm195_vm1, %v4970_v50 }
 0x227   :  { %v5072_v61 = vpop.f32.mrf.mxu1 }
 0x228   :  { %v271_v63 = vsel %vm249_vm2, %v5072_v61, -inf }
 0x229   :  { %272 = vmax.xlane.f32.xlu0 %v271_v63  ;;  %269 = vmax.xlane.f32.xlu2 %v268_v0 }
 0x22f   :  { %v5080_v4 = vpop.f32.mrf.mxu1 }
 0x230   :  { %v935_v41 = vsel %vm249_vm2, %v5080_v4, -inf }
 0x231   :  { %598 = vmax.xlane.f32.xlu0 %v597_v5 }
 0x232   :  { %4166 = vmatmul.msk.bf16.vlgmr.msrb.gmra.mxu1 %vm195_vm1, %v4960_v39  ;;  %4176 = vmatmul.msk.bf16.gmra.mxu0 %vm195_vm1, %v4966_v48 }
 0x237   :  { %v5088_v50 = vpop.f32.mrf.mxu1 }
 0x238   :  { %v938_v7 = vsel %vm249_vm2, %v5088_v50, -inf }
 0x239   :  { %939 = vmax.xlane.f32.xlu2 %v938_v7  ;;  %936 = vmax.xlane.f32.xlu0 %v935_v41 }
 0x23f   :  { %v5094_v8 = vpop.f32.mrf.mxu1 }
 0x240   :  { %v941_v10 = vsel %vm249_vm2, %v5094_v8, -inf }
 0x241   :  { %942 = vmax.xlane.f32.xlu2 %v941_v10 }
 0x242   :  { %4167 = vmatmul.msk.bf16.gmra.mxu1 %vm195_vm1, %v4954_v36  ;;  %4177 = vmatmul.msk.bf16.gmra.mxu0 %vm195_vm1, %v2645_v14  ;;  %v578_v20 = vpop.xlane.xlu2 %577 }
 0x243   :  { %v600_v36 = vsub.f32 %v4994_v16, %v578_v20 }
 0x245   :  { %v608_v25 = vmul.f32 1.442695, %v600_v36 }
 0x247   :  { %v5101_v39 = vpop.f32.mrf.mxu1  ;;  %4295 = vpow2.f32 %v608_v25 }
 0x248   :  { %v944_v48 = vsel %vm249_vm2, %v5101_v39, -inf }
 0x249   :  { %945 = vmax.xlane.f32.xlu2 %v944_v48 }
 0x24d   :  { %v5121_v16 = vpop.eup %4295 }
 0x24e   :  { %v624_v57 = vsel %vm249_vm2, %v5121_v16, 0.0 }
 0x24f   :  { %v5105_v15 = vpop.f32.mrf.mxu1 }
 0x250   :  { %v947_v1 = vsel %vm249_vm2, %v5105_v15, -inf }
 0x251   :  { %948 = vmax.xlane.f32.xlu2 %v947_v1 }
 0x252   :  { %4168 = vmatmul.msk.bf16.gmra.mxu1 %vm195_vm1, %v4984_v6  ;;  %v581_v6 = vpop.xlane.xlu2 %580 }
 0x253   :  { %v601_v45 = vsub.f32 %v5002_v12, %v581_v6 }
 0x255   :  { %v610_v60 = vmul.f32 1.442695, %v601_v45 }
 0x257   :  { %v5112_v22 = vpop.f32.mrf.mxu1 }
 0x258   :  { %v950_v24 = vsel %vm249_vm2, %v5112_v22, -inf }
 0x259   :  { %951 = vmax.xlane.f32.xlu1 %v950_v24 }
 0x25f   :  { %v5116_v17 = vpop.f32.mrf.mxu1 }
 0x260   :  { %v953_v32 = vsel %vm249_vm2, %v5116_v17, -inf }
 0x261   :  { %954 = vmax.xlane.f32.xlu2 %v953_v32 }
 0x262   :  { %4169 = vmatmul.msk.bf16.gmra.mxu1 %vm195_vm1, %v2287_v29 }
 0x264   :  { %v252_v37 = vpop.xlane.xlu0 %251 }
 0x265   :  { %v274_v42 = vsub.f32 %v5014_v28, %v252_v37 }
 0x267   :  { %v282_v27 = vmul.f32 1.442695, %v274_v42  ;;  %v5125_v52 = vpop.f32.mrf.mxu1 }
 0x268   :  { %7423 = vst [vmem:[#allocation9_spill] sm:$0xff] %v5125_v52  ;;  %v956_v18 = vsel %vm249_vm2, %v5125_v52, -inf }
 0x269   :  { %4297 = vpow2.f32 %v282_v27  ;;  %625 = vadd.xlane.f32.xlu2 %v624_v57  ;;  %957 = vmax.xlane.f32.xlu0 %v956_v18 }
 0x26a   :  { %4299 = vpow2.f32 %v610_v60 }
 0x26c   :  { %v255_v38 = vpop.xlane.xlu1 %254  ;;  %v587_v57 = vpop.xlane.xlu0 %586 }
 0x26d   :  { %v275_v63 = vsub.f32 %v5023_v31, %v255_v38  ;;  %v603_v18 = vsub.f32 %v5021_v21, %v587_v57 }
 0x26f   :  { %v5132_v0 = vpop.eup %4297  ;;  %v284_v12 = vmul.f32 1.442695, %v275_v63  ;;  %v614_v60 = vmul.f32 1.442695, %v603_v18 }
 0x270   :  { %v298_v28 = vsel %vm249_vm2, %v5132_v0, 0.0  ;;  %v5136_v7 = vpop.eup %4299 }
 0x271   :  { %299 = vadd.xlane.f32.xlu1 %v298_v28  ;;  %4301 = vpow2.f32 %v284_v12  ;;  %v627_v31 = vsel %vm249_vm2, %v5136_v7, 0.0 }
 0x274   :  { %v258_v5 = vpop.xlane.xlu2 %257 }
 0x275   :  { %v276_v41 = vsub.f32 %v5029_v40, %v258_v5 }
 0x277   :  { %v286_v10 = vmul.f32 1.442695, %v276_v41  ;;  %v5139_v14 = vpop.eup %4301 }
 0x278   :  { %v301_v48 = vsel %vm249_vm2, %v5139_v14, 0.0 }
 0x279   :  { %4303 = vpow2.f32 %v286_v10  ;;  %628 = vadd.xlane.f32.xlu1 %v627_v31  ;;  %302 = vadd.xlane.f32.xlu2 %v301_v48 }
 0x27c   :  { %v584_v1 = vpop.xlane.xlu2 %583 }
 0x27d   :  { %v602_v20 = vsub.f32 %v5012_v49, %v584_v1 }
 0x27f   :  { %v5146_v36 = vpop.eup %4303  ;;  %v612_v24 = vmul.f32 1.442695, %v602_v20 }
 0x280   :  { %v304_v40 = vsel %vm249_vm2, %v5146_v36, 0.0 }
 0x281   :  { %4305 = vpow2.f32 %v612_v24  ;;  %305 = vadd.xlane.f32.xlu2 %v304_v40 }
 0x284   :  { %v261_v25 = vpop.xlane.xlu2 %260  ;;  %v264_v63 = vpop.xlane.xlu0 %263 }
 0x285   :  { %v277_v29 = vsub.f32 %v5036_v43, %v261_v25  ;;  %v278_v12 = vsub.f32 %v5042_v47, %v264_v63 }
 0x287   :  { %v5151_v32 = vpop.eup %4305  ;;  %v288_v6 = vmul.f32 1.442695, %v277_v29  ;;  %v290_v28 = vmul.f32 1.442695, %v278_v12 }
 0x288   :  { %v630_v37 = vsel %vm249_vm2, %v5151_v32, 0.0 }
 0x289   :  { %4307 = vpow2.f32 %v288_v6  ;;  %631 = vadd.xlane.f32.xlu0 %v630_v37 }
 0x28a   :  { %4309 = vpow2.f32 %v614_v60 }
 0x28b   :  { %4311 = vpow2.f32 %v290_v28 }
 0x28c   :  { %v590_v45 = vpop.xlane.xlu2 %589  ;;  %v267_v41 = vpop.xlane.xlu1 %266 }
 0x28d   :  { %v604_v21 = vsub.f32 %v5040_v46, %v590_v45  ;;  %v5189_v46 = vpop.f32.mrf.mxu1 }
 0x28e   :  { %7424 = vst [vmem:[#allocation10_spill] sm:$0xff] %v5189_v46 }
 0x28f   :  { %v5155_v49 = vpop.eup %4307  ;;  %v616_v47 = vmul.f32 1.442695, %v604_v21 }
 0x290   :  { %v307_v42 = vsel %vm249_vm2, %v5155_v49, 0.0  ;;  %v5172_v10 = vpop.eup %4309 }
 0x291   :  { %308 = vadd.xlane.f32.xlu1 %v307_v42  ;;  %v633_v48 = vsel %vm249_vm2, %v5172_v10, 0.0  ;;  %v5180_v20 = vpop.eup %4311 }
 0x294   :  { %v593_v43 = vpop.xlane.xlu2 %592 }
 0x295   :  { %v605_v5 = vsub.f32 %v5052_v54, %v593_v43  ;;  %v5203_v43 = vpop.xlane.xlu1 %595  ;;  %v5209_v18 = vpop.f32.mrf.mxu1 }
 0x296   :  { %v1668_v63 = vsel %vm249_vm2, %v5209_v18, -inf }
 0x297   :  { %v618_v31 = vmul.f32 1.442695, %v605_v5 }
 0x299   :  { %1135 = vrot.lane.b32.xlu2 %v4768_v53, %s4611_s11  ;;  %4313 = vpow2.f32 %v618_v31 }
 0x29c   :  { %v270_v27 = vpop.xlane.xlu2 %269 }
 0x29d   :  { %1496 = vrot.lane.b32.xlu0 %v4790_v62, %s4612_s12  ;;  %v280_v24 = vsub.f32 %v5062_v59, %v270_v27  ;;  %v5205_v27 = vpop.f32.mrf.mxu0 }
 0x29e   :  { %v1991_v57 = vsel %vm249_vm2, %v5205_v27, -inf }
 0x29f   :  { %v5187_v40 = vpop.eup %4313  ;;  %v294_v25 = vmul.f32 1.442695, %v280_v24 }
 0x2a0   :  { %v639_v29 = vsel %vm249_vm2, %v5187_v40, 0.0 }
 0x2a5   :  { %1494 = vrot.lane.b32.xlu0 %v4768_v53, %s4612_s12  ;;  %v5225_v21 = vpop.f32.mrf.mxu0 }
 0x2aa   :  { %1137 = vrot.lane.b32.xlu1 %v4790_v62, %s4611_s11  ;;  %v279_v62 = vsub.f32 %v5054_v56, %v267_v41  ;;  %v310_v56 = vsel %vm249_vm2, %v5180_v20, 0.0  ;;  %v1665_v41 = vsel %vm249_vm2, %v5189_v46, -inf }
 0x2ac   :  { %v5168_v38 = vpop.xlane.xlu2 %939  ;;  %v292_v1 = vmul.f32 1.442695, %v279_v62 }
 0x2ae   :  { %4315 = vpow2.f32 %v292_v1  ;;  %v1994_v1 = vsel %vm249_vm2, %v5225_v21, -inf }
 0x2af   :  { %4317 = vpow2.f32 %v616_v47 }
 0x2b0   :  { %4319 = vpow2.f32 %v294_v25 }
 0x2b4   :  { %v5174_v53 = vpop.xlane.xlu2 %942  ;;  %v5193_v6 = vpop.eup %4315 }
 0x2b5   :  { %v5195_v37 = vpop.eup %4317  ;;  %v313_v59 = vsel %vm249_vm2, %v5193_v6, 0.0 }
 0x2b6   :  { %v636_v45 = vsel %vm249_vm2, %v5195_v37, 0.0  ;;  %v5211_v60 = vpop.eup %4319 }
 0x2b7   :  { %v316_v28 = vsel %vm249_vm2, %v5211_v60, 0.0 }
 0x2bc   :  { %v5182_v54 = vpop.xlane.xlu2 %945 }
 0x2c2   :  { %634 = vadd.xlane.f32.xlu2 %v633_v48 }
 0x2c4   :  { %v5199_v42 = vpop.xlane.xlu2 %948 }
 0x2ca   :  { %311 = vadd.xlane.f32.xlu2 %v310_v56 }
 0x2cc   :  { %v5219_v5 = vpop.xlane.xlu1 %951 }
 0x2cf   :  { %640 = vadd.xlane.f32.xlu0 %v639_v29 }
 0x2d2   :  { %314 = vadd.xlane.f32.xlu2 %v313_v59 }
 0x2d4   :  { %637 = vadd.xlane.f32.xlu1 %v636_v45  ;;  %v5215_v12 = vpop.xlane.xlu2 %954 }
 0x2d7   :  { %1992 = vmax.xlane.f32.xlu0 %v1991_v57 }
 0x2da   :  { %1669 = vmax.xlane.f32.xlu2 %v1668_v63 }
 0x2dc   :  { %317 = vadd.xlane.f32.xlu1 %v316_v28  ;;  %v5223_v31 = vpop.xlane.xlu2 %625 }
 0x2e4   :  { %1666 = vmax.xlane.f32.xlu1 %v1665_v41  ;;  %v300_v62 = vpop.xlane.xlu1 %299 }
 0x2e5   :  { %4321 = vrcp.f32 %v300_v62  ;;  %v333_v63 = vand.u32 2147483648, %v300_v62  ;;  %vm327_vm4 = vweird.f32 %v300_v62  ;;  %v331_v41 = vand.u32 2147483647, %v300_v62 }
 0x2e7   :  { %v334_v3 = vor.u32 1.1754944e-38, %v333_v63  ;;  %vm332_vm8 = vcmp.eq.f32.partialorder %v331_v41, 8.507059e+37  ;;  %v5243_v63 = vpop.f32.mrf.mxu0 }
 0x2eb   :  { %v4322_v48 = vpop.eup %4321  ;;  %1492 = vrot.lane.b32.xlu0 %v4752_v44, %s4612_s12 }
 0x2ec   :  { %v323_v47 = vmul.f32 %v4322_v48, %v300_v62  ;;  %1995 = vmax.xlane.f32.xlu1 %v1994_v1  ;;  %v303_v24 = vpop.xlane.xlu2 %302  ;;  %vm328_vm3 = vweird.f32 %v4322_v48  ;;  %v5236_v30 = vpop.xlane.xlu1 %628 }
 0x2ed   :  { %4323 = vrcp.f32 %v303_v24  ;;  %v348_v26 = vand.u32 2147483648, %v303_v24  ;;  %vm329_vm5 = vmor %vm327_vm4, %vm328_vm3  ;;  %vm342_vm7 = vweird.f32 %v303_v24 }
 0x2ee   :  { %v324_v56 = vsub.f32 1.0, %v323_v47 }
 0x2f0   :  { %v325_v25 = vmul.f32 %v4322_v48, %v324_v56  ;;  %v346_v56 = vand.u32 2147483647, %v303_v24 }
 0x2f2   :  { %1133 = vrot.lane.b32.xlu2 %v4752_v44, %s4611_s11  ;;  %v326_v57 = vadd.f32 %v4322_v48, %v325_v25  ;;  %vm347_vm10 = vcmp.eq.f32.partialorder %v346_v56, 8.507059e+37 }
 0x2f3   :  { %v4324_v29 = vpop.eup %4323 }
 0x2f4   :  { %v338_v59 = vmul.f32 %v4324_v29, %v303_v24  ;;  %v5233_v45 = vpop.xlane.xlu2 %305  ;;  %v330_v47 = vsel %vm329_vm5, %v4322_v48, %v326_v57  ;;  %vm343_vm6 = vweird.f32 %v4324_v29  ;;  %v1263_v24 = vsel %vm195_vm1, %v4929_v11, 0 }
 0x2f5   :  { %4325 = vrcp.f32 %v5233_v45  ;;  %v335_v55 = vsel %vm332_vm8, %v334_v3, %v330_v47  ;;  %vm344_vm9 = vmor %vm342_vm7, %vm343_vm6  ;;  %v1260_v11 = vsel %vm195_vm1, %v4931_v13, 0  ;;  %v5255_v47 = vpop.f32.mrf.mxu0  ;;  %vm357_vm12 = vweird.f32 %v5233_v45 }
 0x2f6   :  { %v339_v28 = vsub.f32 1.0, %v338_v59  ;;  %v349_v59 = vor.u32 1.1754944e-38, %v348_v26  ;;  %v5246_v26 = vpop.f32.mrf.mxu1 }
 0x2f8   :  { %v340_v1 = vmul.f32 %v4324_v29, %v339_v28  ;;  %v336_v28 = vmul.f32 %v5132_v0, %v335_v55 }
 0x2fa   :  { %v341_v44 = vadd.f32 %v4324_v29, %v340_v1  ;;  %v363_v1 = vand.u32 2147483648, %v5233_v45 }
 0x2fb   :  { %v4326_v25 = vpop.eup %4325 }
 0x2fc   :  { %v345_v46 = vsel %vm344_vm9, %v4324_v29, %v341_v44  ;;  %v353_v62 = vmul.f32 %v4326_v25, %v5233_v45  ;;  %vm358_vm11 = vweird.f32 %v4326_v25  ;;  %v361_v44 = vand.u32 2147483647, %v5233_v45 }
 0x2fd   :  { %v350_v52 = vsel %vm347_vm10, %v349_v59, %v345_v46  ;;  %vm359_vm13 = vmor %vm357_vm12, %vm358_vm11  ;;  %v1257_v45 = vsel %vm195_vm1, %v4848_v23, 0 }
 0x2fe   :  { %v351_v48 = vmul.f32 %v5139_v14, %v350_v52  ;;  %v354_v41 = vsub.f32 1.0, %v353_v62  ;;  %v606_v52 = vsub.f32 %v5060_v58, %v5203_v43  ;;  %v5259_v59 = vpop.f32.mrf.mxu1  ;;  %v273_v58 = vpop.xlane.xlu0 %272  ;;  %vm362_vm3 = vcmp.eq.f32.partialorder %v361_v44, 8.507059e+37 }
 0x300   :  { %v442_v57 = vpack.c.bf16 %v351_v48, %v336_v28  ;;  %v355_v55 = vmul.f32 %v4326_v25, %v354_v41  ;;  %v620_v29 = vmul.f32 1.442695, %v606_v52  ;;  %v364_v48 = vor.u32 1.1754944e-38, %v363_v1  ;;  %v5270_v1 = vpop.f32.mrf.mxu0 }
 0x301   :  { %v1671_v52 = vsel %vm249_vm2, %v5246_v26, -inf  ;;  %7425 = vst [vmem:[#allocation11_spill] sm:$0xff] %v5270_v1 }
 0x302   :  { %4122 = vmatmul.msk.bf16.vlgmr.msra.gmra.mxu2 %vm249_vm2, %v442_v57  ;;  %v356_v46 = vadd.f32 %v4326_v25, %v355_v55  ;;  %v281_v57 = vsub.f32 %v5072_v61, %v273_v58  ;;  %v1136_v58 = vpop.permute.xlu2 %1135 }
 0x303   :  { %1269 = vmatpush.bf16.xpose.msra.mxu2 %v1263_v24 }
 0x304   :  { %v309_v3 = vpop.xlane.xlu1 %308  ;;  %v360_v13 = vsel %vm359_vm13, %v4326_v25, %v356_v46 }
 0x305   :  { %4327 = vrcp.f32 %v309_v3  ;;  %1490 = vrot.lane.b32.xlu1 %v4736_v35, %s4612_s12  ;;  %v378_v43 = vand.u32 2147483648, %v309_v3  ;;  %v376_v28 = vand.u32 2147483647, %v309_v3  ;;  %vm372_vm15 = vweird.f32 %v309_v3 }
 0x306   :  { %4329 = vpow2.f32 %v620_v29  ;;  %v365_v41 = vsel %vm362_vm3, %v364_v48, %v360_v13  ;;  %v1997_v13 = vsel %vm249_vm2, %v5243_v63, -inf }
 0x307   :  { %v379_v55 = vor.u32 1.1754944e-38, %v378_v43  ;;  %vm377_vm5 = vcmp.eq.f32.partialorder %v376_v28, 8.507059e+37  ;;  %v366_v61 = vmul.f32 %v5146_v36, %v365_v41 }
 0x308   :  { %v5283_v43 = vpop.f32.mrf.mxu0 }
 0x309   :  { %7427 = vst [vmem:[#allocation13_spill] sm:$0xff] %v5283_v43 }
 0x30b   :  { %v4328_v0 = vpop.eup %4327  ;;  %1270 = vmatpush.bf16.xpose.msra.mxu2 %v1260_v11  ;;  %v296_v11 = vmul.f32 1.442695, %v281_v57 }
 0x30c   :  { %v368_v14 = vmul.f32 %v4328_v0, %v309_v3  ;;  %vm373_vm14 = vweird.f32 %v4328_v0  ;;  %v5268_v46 = vpop.eup %4329 }
 0x30d   :  { %vm374_vm4 = vmor %vm372_vm15, %vm373_vm14  ;;  %4331 = vpow2.f32 %v296_v11  ;;  %v642_v23 = vsel %vm249_vm2, %v5268_v46, 0.0 }
 0x30e   :  { %v369_v56 = vsub.f32 1.0, %v368_v14 }
 0x310   :  { %v370_v62 = vmul.f32 %v4328_v0, %v369_v56  ;;  %v5272_v56 = vpop.f32.mrf.mxu1 }
 0x311   :  { %7426 = vst [vmem:[#allocation12_spill] sm:$0xff] %v5272_v56 }
 0x312   :  { %v371_v24 = vadd.f32 %v4328_v0, %v370_v62 }
 0x313   :  { %1271 = vmatpush.bf16.xpose.msra.mxu2 %v1257_v45  ;;  %v5281_v44 = vpop.eup %4331 }
 0x314   :  { %v375_v14 = vsel %vm374_vm4, %v4328_v0, %v371_v24  ;;  %v1254_v0 = vsel %vm195_vm1, %v4870_v34, 0  ;;  %v319_v62 = vsel %vm249_vm2, %v5281_v44, 0.0  ;;  %v2006_v34 = vsel %vm249_vm2, %v5283_v43, -inf  ;;  %v5301_v24 = vpop.f32.mrf.mxu0 }
 0x315   :  { %1672 = vmax.xlane.f32.xlu0 %v1671_v52  ;;  %v380_v25 = vsel %vm377_vm5, %v379_v55, %v375_v14  ;;  %7429 = vst [vmem:[#allocation15_spill] sm:$0xff] %v5301_v24  ;;  %v2009_v55 = vsel %vm249_vm2, %v5301_v24, -inf }
 0x316   :  { %v381_v3 = vmul.f32 %v5155_v49, %v380_v25  ;;  %v1677_v49 = vsel %vm249_vm2, %v5272_v56, -inf  ;;  %v961_v56 = vsub.f32 %v5094_v8, %v5174_v53 }
 0x318   :  { %v443_v29 = vpack.c.bf16 %v381_v3, %v366_v61  ;;  %v5291_v28 = vpop.f32.mrf.mxu1 }
 0x319   :  { %7428 = vst [vmem:[#allocation14_spill] sm:$0xff] %v5291_v28  ;;  %v1680_v57 = vsel %vm249_vm2, %v5291_v28, -inf }
 0x31a   :  { %4123 = vmatmul.msk.bf16.gmra.mxu2 %vm249_vm2, %v443_v29 }
 0x31b   :  { %643 = vadd.xlane.f32.xlu2 %v642_v23  ;;  %1272 = vmatpush.bf16.xpose.msra.mxu2 %v1254_v0 }
 0x31c   :  { %v1138_v36 = vpop.permute.xlu1 %1137 }
 0x31d   :  { %1678 = vmax.xlane.f32.xlu0 %v1677_v49  ;;  %1159 = vmatpush.bf16.msrb.mxu3 %v1138_v36 }
 0x321   :  { %1160 = vmatpush.bf16.msrb.mxu3 %v1136_v58 }
 0x323   :  { %320 = vadd.xlane.f32.xlu2 %v319_v62 }
 0x325   :  { %2007 = vmax.xlane.f32.xlu0 %v2006_v34 }
 0x32f   :  { %1998 = vmax.xlane.f32.xlu1 %v1997_v13 }
 0x335   :  { %v5293_v48 = vpop.xlane.xlu2 %634 }
 0x337   :  { %1681 = vmax.xlane.f32.xlu1 %v1680_v57 }
 0x339   :  { %1865 = vrot.lane.b32.xlu0 %v4862_v33, %s4602_s24 }
 0x33b   :  { %1131 = vrot.lane.b32.xlu2 %v4736_v35, %s4611_s11 }
 0x33d   :  { %v312_v41 = vpop.xlane.xlu2 %311 }
 0x33e   :  { %4333 = vrcp.f32 %v312_v41  ;;  %v393_v35 = vand.u32 2147483648, %v312_v41  ;;  %vm387_vm7 = vweird.f32 %v312_v41  ;;  %v391_v36 = vand.u32 2147483647, %v312_v41 }
 0x33f   :  { %2010 = vmax.xlane.f32.xlu1 %v2009_v55  ;;  %v5307_v55 = vpop.f32.mrf.mxu1 }
 0x340   :  { %v394_v13 = vor.u32 1.1754944e-38, %v393_v35  ;;  %vm392_vm11 = vcmp.eq.f32.partialorder %v391_v36, 8.507059e+37  ;;  %7430 = vst [vmem:[#allocation16_spill] sm:$0xff] %v5307_v55  ;;  %v960_v36 = vsub.f32 %v5088_v50, %v5168_v38  ;;  %v962_v50 = vsub.f32 %v5101_v39, %v5182_v54 }
 0x341   :  { %v965_v39 = vsub.f32 %v5116_v17, %v5215_v12 }
 0x344   :  { %v4334_v45 = vpop.eup %4333 }
 0x345   :  { %v383_v52 = vmul.f32 %v4334_v45, %v312_v41  ;;  %v315_v14 = vpop.xlane.xlu2 %314  ;;  %vm388_vm6 = vweird.f32 %v4334_v45 }
 0x346   :  { %4335 = vrcp.f32 %v315_v14  ;;  %v408_v49 = vand.u32 2147483648, %v315_v14  ;;  %vm389_vm8 = vmor %vm387_vm7, %vm388_vm6  ;;  %v406_v34 = vand.u32 2147483647, %v315_v14  ;;  %vm402_vm10 = vweird.f32 %v315_v14 }
 0x347   :  { %v384_v25 = vsub.f32 1.0, %v383_v52 }
 0x348   :  { %vm407_vm13 = vcmp.eq.f32.partialorder %v406_v34, 8.507059e+37  ;;  %v5335_v34 = vpop.xlane.xlu1 %637 }
 0x349   :  { %v385_v11 = vmul.f32 %v4334_v45, %v384_v25  ;;  %v409_v25 = vor.u32 1.1754944e-38, %v408_v49  ;;  %v969_v49 = vmul.f32 1.442695, %v960_v36 }
 0x34b   :  { %v386_v23 = vadd.f32 %v4334_v45, %v385_v11  ;;  %v599_v11 = vpop.xlane.xlu0 %598 }
 0x34c   :  { %v4336_v61 = vpop.eup %4335 }
 0x34d   :  { %v398_v3 = vmul.f32 %v4336_v61, %v315_v14  ;;  %v5305_v29 = vpop.xlane.xlu2 %1669  ;;  %v390_v62 = vsel %vm389_vm8, %v4334_v45, %v386_v23  ;;  %vm403_vm9 = vweird.f32 %v4336_v61 }
 0x34e   :  { %v395_v52 = vsel %vm392_vm11, %v394_v13, %v390_v62  ;;  %vm404_vm12 = vmor %vm402_vm10, %vm403_vm9  ;;  %v1683_v13 = vsel %vm249_vm2, %v5307_v55, -inf  ;;  %vm668_vm11 = vweird.f32 %v5236_v30 }
 0x34f   :  { %v399_v0 = vsub.f32 1.0, %v398_v3  ;;  %v396_v45 = vmul.f32 %v5180_v20, %v395_v52  ;;  %v607_v3 = vsub.f32 %v5078_v2, %v599_v11  ;;  %v5351_v11 = vpop.f32.mrf.mxu0 }
 0x350   :  { %v5347_v38 = vpop.xlane.xlu1 %317  ;;  %7432 = vst [vmem:[#allocation18_spill] sm:$0xff] %v5351_v11 }
 0x351   :  { %v400_v58 = vmul.f32 %v4336_v61, %v399_v0  ;;  %v622_v35 = vmul.f32 1.442695, %v607_v3  ;;  %v5315_v0 = vpop.f32.mrf.mxu1  ;;  %vm417_vm15 = vweird.f32 %v5347_v38 }
 0x352   :  { %7431 = vst [vmem:[#allocation17_spill] sm:$0xff] %v5315_v0 }
 0x353   :  { %v401_v57 = vadd.f32 %v4336_v61, %v400_v58  ;;  %4337 = vpow2.f32 %v622_v35  ;;  %v2003_v58 = vsel %vm249_vm2, %v5270_v1, -inf }
 0x354   :  { %4339 = vpow2.f32 %v969_v49 }
 0x355   :  { %v1134_v24 = vpop.permute.xlu2 %1133  ;;  %v405_v43 = vsel %vm404_vm12, %v4336_v61, %v401_v57  ;;  %v5327_v61 = vpop.xlane.xlu0 %936 }
 0x356   :  { %1161 = vmatpush.bf16.msrb.mxu3 %v1134_v24  ;;  %v410_v41 = vsel %vm407_vm13, %v409_v25, %v405_v43  ;;  %v1686_v24 = vsel %vm249_vm2, %v5315_v0, -inf  ;;  %v1674_v43 = vsel %vm249_vm2, %v5259_v59, -inf  ;;  %vm653_vm13 = vweird.f32 %v5223_v31 }
 0x357   :  { %v411_v14 = vmul.f32 %v5193_v6, %v410_v41  ;;  %v2000_v6 = vsel %vm249_vm2, %v5255_v47, -inf  ;;  %v973_v41 = vmul.f32 1.442695, %v962_v50 }
 0x358   :  { %1867 = vrot.lane.b32.xlu1 %v4894_v51, %s4602_s24  ;;  %v5365_v35 = vpop.xlane.xlu1 %1666 }
 0x359   :  { %v444_v23 = vpack.c.bf16 %v411_v14, %v396_v45  ;;  %v5321_v20 = vpop.eup %4337  ;;  %v2012_v45 = vsel %vm249_vm2, %v5351_v11, -inf  ;;  %v5355_v14 = vpop.f32.mrf.mxu1  ;;  %4341 = vpow2.f32 %v973_v41 }
 0x35a   :  { %v645_v2 = vsel %vm249_vm2, %v5321_v20, 0.0  ;;  %v5339_v57 = vpop.eup %4339  ;;  %7433 = vst [vmem:[#allocation19_spill] sm:$0xff] %v5355_v14  ;;  %v2349_v54 = vsel %vm249_vm2, %v5355_v14, -inf  ;;  %4343 = vrcp.f32 %v5347_v38 }
 0x35b   :  { %4124 = vmatmul.msk.bf16.gmra.mxu2 %vm249_vm2, %v444_v23  ;;  %v986_v25 = vsel %vm249_vm2, %v5339_v57, 0.0 }
 0x35d   :  { %v5333_v62 = vpop.xlane.xlu0 %957 }
 0x363   :  { %1687 = vmax.xlane.f32.xlu0 %v1686_v24  ;;  %v979_v24 = vmul.f32 1.442695, %v965_v39 }
 0x364   :  { %1675 = vmax.xlane.f32.xlu2 %v1674_v43  ;;  %v5367_v43 = vpop.eup %4341 }
 0x365   :  { %v5341_v52 = vpop.xlane.xlu0 %631  ;;  %v4344_v36 = vpop.eup %4343  ;;  %4345 = vpow2.f32 %v979_v24  ;;  %v992_v17 = vsel %vm249_vm2, %v5367_v43, 0.0 }
 0x366   :  { %v413_v12 = vmul.f32 %v4344_v36, %v5347_v38  ;;  %4347 = vrcp.f32 %v5236_v30  ;;  %vm418_vm14 = vweird.f32 %v4344_v36 }
 0x367   :  { %vm5402_vm3 = vmor %vm417_vm15, %vm418_vm14 }
 0x368   :  { %v414_v50 = vsub.f32 1.0, %v413_v12 }
 0x36a   :  { %v415_v39 = vmul.f32 %v4344_v36, %v414_v50 }
 0x36b   :  { %646 = vadd.xlane.f32.xlu0 %v645_v2 }
 0x36c   :  { %2001 = vmax.xlane.f32.xlu2 %v2000_v6  ;;  %v416_v12 = vadd.f32 %v4344_v36, %v415_v39 }
 0x36d   :  { %v5357_v3 = vpop.permute.xlu0 %1496 }
 0x374   :  { %2004 = vmax.xlane.f32.xlu2 %v2003_v58  ;;  %v1996_v58 = vpop.xlane.xlu1 %1995 }
 0x375   :  { %v5371_v49 = vpop.permute.xlu0 %1494 }
 0x37c   :  { %1684 = vmax.xlane.f32.xlu2 %v1683_v13  ;;  %v5377_v13 = vpop.eup %4345 }
 0x37d   :  { %7434 = vst [vmem:[#allocation20_spill] sm:$0xff] %v5377_v13  ;;  %v5386_v24 = vpop.eup %4347 }
 0x37e   :  { %v664_v50 = vmul.f32 %v5386_v24, %v5236_v30  ;;  %vm669_vm9 = vweird.f32 %v5386_v24 }
 0x37f   :  { %2191 = vrot.lane.b32.xlu0 %v4862_v33, %s4609_s30  ;;  %vm5444_vm12 = vmor %vm668_vm11, %vm669_vm9 }
 0x382   :  { %987 = vadd.xlane.f32.xlu1 %v986_v25  ;;  %v2016_v25 = vsub.f32 %v5225_v21, %v1996_v58 }
 0x384   :  { %2013 = vmax.xlane.f32.xlu2 %v2012_v45  ;;  %v5381_v45 = vpop.xlane.xlu0 %640 }
 0x385   :  { %v479_v23 = vpop.f32.mrf.mxu2 }
 0x386   :  { %499 = vst.msk [vmem:[#allocation2] sm:$0xff] %vm195_vm1, %v479_v23  ;;  %v1001_v23 = vsel %vm249_vm2, %v5377_v13, 0.0  ;;  %v5412_v13 = vpop.permute.xlu1 %1490 }
 0x38a   :  { %2350 = vmax.xlane.f32.xlu1 %v2349_v54  ;;  %v2025_v54 = vmul.f32 1.442695, %v2016_v25  ;;  %v421_v25 = vand.u32 2147483647, %v5347_v38 }
 0x38c   :  { %v5400_v14 = vpop.xlane.xlu0 %1992  ;;  %vm422_vm5 = vcmp.eq.f32.partialorder %v421_v25, 8.507059e+37 }
 0x38d   :  { %v481_v2 = vpop.f32.mrf.mxu2 }
 0x38e   :  { %v5369_v6 = vpop.xlane.xlu2 %643  ;;  %500 = vst.msk [vmem:[#allocation2 + $0x8] sm:$0xff] %vm195_vm1, %v481_v2 }
 0x392   :  { %993 = vadd.xlane.f32.xlu1 %v992_v17 }
 0x396   :  { %v321_v41 = vpop.xlane.xlu2 %320 }
 0x397   :  { %4349 = vrcp.f32 %v321_v41  ;;  %v436_v55 = vand.u32 2147483647, %v321_v41  ;;  %vm432_vm6 = vweird.f32 %v321_v41 }
 0x398   :  { %4351 = vrcp.f32 %v5223_v31 }
 0x399   :  { %4353 = vpow2.f32 %v2025_v54  ;;  %v438_v54 = vand.u32 2147483648, %v321_v41  ;;  %vm437_vm8 = vcmp.eq.f32.partialorder %v436_v55, 8.507059e+37 }
 0x39a   :  { %1002 = vadd.xlane.f32.xlu1 %v1001_v23  ;;  %v423_v23 = vand.u32 2147483648, %v5347_v38  ;;  %v665_v38 = vsub.f32 1.0, %v664_v50  ;;  %4355 = vrcp.f32 %v5293_v48  ;;  %v971_v50 = vmul.f32 1.442695, %v961_v56 }
 0x39b   :  { %4357 = vrcp.f32 %v5341_v52  ;;  %v674_v56 = vand.u32 2147483648, %v5236_v30 }
 0x39c   :  { %2193 = vrot.lane.b32.xlu2 %v4894_v51, %s4609_s30  ;;  %v424_v0 = vor.u32 1.1754944e-38, %v423_v23  ;;  %4359 = vpow2.f32 %v971_v50 }
 0x39d   :  { %v484_v2 = vpop.f32.mrf.mxu2  ;;  %v4350_v17 = vpop.eup %4349 }
 0x39e   :  { %501 = vst.msk [vmem:[#allocation2 + $0x10] sm:$0xff] %vm195_vm1, %v484_v2  ;;  %v5391_v21 = vpop.eup %4351  ;;  %v428_v58 = vmul.f32 %v4350_v17, %v321_v41  ;;  %v1132_v33 = vpop.permute.xlu2 %1131  ;;  %vm433_vm4 = vweird.f32 %v4350_v17 }
 0x39f   :  { %1162 = vmatpush.bf16.msrb.mxu3 %v1132_v33  ;;  %v649_v2 = vmul.f32 %v5391_v21, %v5223_v31  ;;  %v420_v33 = vsel %vm5402_vm3, %v4344_v36, %v416_v12  ;;  %v5408_v28 = vpop.eup %4353  ;;  %vm434_vm7 = vmor %vm432_vm6, %vm433_vm4  ;;  %v439_v36 = vor.u32 1.1754944e-38, %v438_v54  ;;  %vm654_vm10 = vweird.f32 %v5391_v21 }
 0x3a0   :  { %v429_v51 = vsub.f32 1.0, %v428_v58  ;;  %v2042_v41 = vsel %vm249_vm2, %v5408_v28, 0.0  ;;  %vm655_vm14 = vmor %vm653_vm13, %vm654_vm10  ;;  %vm713_vm13 = vweird.f32 %v5335_v34 }
 0x3a1   :  { %v650_v12 = vsub.f32 1.0, %v649_v2  ;;  %v5430_v2 = vpop.eup %4355 }
 0x3a2   :  { %v430_v11 = vmul.f32 %v4350_v17, %v429_v51  ;;  %v425_v51 = vsel %vm422_vm5, %v424_v0, %v420_v33  ;;  %v5422_v0 = vpop.permute.xlu0 %1492  ;;  %v672_v33 = vand.u32 2147483647, %v5236_v30  ;;  %vm699_vm4 = vweird.f32 %v5430_v2 }
 0x3a3   :  { %v426_v8 = vmul.f32 %v5211_v60, %v425_v51  ;;  %v963_v60 = vsub.f32 %v5105_v15, %v5199_v42  ;;  %v657_v42 = vand.u32 2147483647, %v5223_v31  ;;  %vm698_vm5 = vweird.f32 %v5293_v48 }
 0x3a4   :  { %v431_v1 = vadd.f32 %v4350_v17, %v430_v11  ;;  %v666_v11 = vmul.f32 %v5386_v24, %v665_v38  ;;  %v5441_v38 = vpop.eup %4357  ;;  %vm673_vm15 = vcmp.eq.f32.partialorder %v672_v33, 8.507059e+37  ;;  %v2015_v33 = vsub.f32 %v5205_v27, %v5400_v14 }
 0x3a5   :  { %v486_v58 = vpop.f32.mrf.mxu2  ;;  %vm658_vm3 = vcmp.eq.f32.partialorder %v657_v42, 8.507059e+37  ;;  %v704_v42 = vand.u32 2147483648, %v5293_v48  ;;  %vm684_vm6 = vweird.f32 %v5441_v38  ;;  %v702_v14 = vand.u32 2147483647, %v5293_v48 }
 0x3a6   :  { %502 = vst.msk [vmem:[#allocation2 + $0x18] sm:$0xff] %vm195_vm1, %v486_v58  ;;  %v435_v39 = vsel %vm434_vm7, %v4350_v17, %v431_v1  ;;  %v651_v1 = vmul.f32 %v5391_v21, %v650_v12  ;;  %v5425_v17 = vpop.f32.mrf.mxu0  ;;  %v667_v25 = vadd.f32 %v5386_v24, %v666_v11  ;;  %v659_v58 = vand.u32 2147483648, %v5223_v31  ;;  %v5464_v11 = vpop.eup %4359  ;;  %vm5502_vm7 = vmor %vm698_vm5, %vm699_vm4 }
 0x3a7   :  { %v440_v23 = vsel %vm437_vm8, %v439_v36, %v435_v39  ;;  %v2707_v15 = vsel %vm249_vm2, %v5425_v17, -inf  ;;  %v694_v36 = vmul.f32 %v5430_v2, %v5293_v48  ;;  %v675_v12 = vor.u32 1.1754944e-38, %v674_v56 }
 0x3a8   :  { %v441_v53 = vmul.f32 %v5281_v44, %v440_v23  ;;  %v5435_v44 = vpop.xlane.xlu1 %1998  ;;  %v652_v54 = vadd.f32 %v5391_v21, %v651_v1  ;;  %v671_v30 = vsel %vm5444_vm12, %v5386_v24, %v667_v25  ;;  %v679_v23 = vmul.f32 %v5441_v38, %v5341_v52 }
 0x3a9   :  { %2043 = vadd.xlane.f32.xlu0 %v2042_v41  ;;  %v975_v41 = vmul.f32 1.442695, %v963_v60  ;;  %v660_v24 = vor.u32 1.1754944e-38, %v659_v58  ;;  %v695_v50 = vsub.f32 1.0, %v694_v36  ;;  %vm683_vm8 = vweird.f32 %v5341_v52 }
 0x3aa   :  { %v445_v55 = vpack.c.bf16 %v441_v53, %v426_v8  ;;  %v5457_v39 = vpop.xlane.xlu0 %1672  ;;  %v656_v31 = vsel %vm655_vm14, %v5391_v21, %v652_v54  ;;  %v959_v8 = vsub.f32 %v5080_v4, %v5327_v61  ;;  %v676_v53 = vsel %vm673_vm15, %v675_v12, %v671_v30  ;;  %vm685_vm9 = vmor %vm683_vm8, %vm684_vm6 }
 0x3ab   :  { %v661_v1 = vsel %vm658_vm3, %v660_v24, %v656_v31  ;;  %4361 = vpow2.f32 %v975_v41  ;;  %v677_v25 = vmul.f32 %v5136_v7, %v676_v53  ;;  %v989_v21 = vsel %vm249_vm2, %v5464_v11, 0.0 }
 0x3ac   :  { %4125 = vmatmul.msk.bf16.gmra.mxu2 %vm249_vm2, %v445_v55  ;;  %v680_v55 = vsub.f32 1.0, %v679_v23  ;;  %v967_v60 = vmul.f32 1.442695, %v959_v8  ;;  %4363 = vrcp.f32 %v5335_v34  ;;  %v696_v54 = vmul.f32 %v5430_v2, %v695_v50 }
 0x3ad   :  { %v662_v4 = vmul.f32 %v5121_v16, %v661_v1  ;;  %4365 = vrcp.f32 %v5381_v45  ;;  %v689_v30 = vand.u32 2147483648, %v5341_v52  ;;  %v2023_v12 = vmul.f32 1.442695, %v2015_v33 }
 0x3ae   :  { %v681_v61 = vmul.f32 %v5441_v38, %v680_v55  ;;  %4367 = vpow2.f32 %v967_v60  ;;  %v697_v16 = vadd.f32 %v5430_v2, %v696_v54  ;;  %v687_v48 = vand.u32 2147483647, %v5341_v52 }
 0x3af   :  { %v768_v7 = vpack.c.bf16 %v677_v25, %v662_v4  ;;  %v705_v53 = vor.u32 1.1754944e-38, %v704_v42  ;;  %vm703_vm10 = vcmp.eq.f32.partialorder %v702_v14, 8.507059e+37  ;;  %4369 = vpow2.f32 %v2023_v12 }
 0x3b0   :  { %v5470_v56 = vpop.xlane.xlu1 %1681  ;;  %v682_v27 = vadd.f32 %v5441_v38, %v681_v61  ;;  %v701_v31 = vsel %vm5502_vm7, %v5430_v2, %v697_v16  ;;  %v690_v52 = vor.u32 1.1754944e-38, %v689_v30  ;;  %vm688_vm11 = vcmp.eq.f32.partialorder %v687_v48, 8.507059e+37 }
 0x3b1   :  { %2708 = vmax.xlane.f32.xlu0 %v2707_v15  ;;  %v5484_v51 = vpop.eup %4361  ;;  %v706_v55 = vsel %vm703_vm10, %v705_v53, %v701_v31  ;;  %v734_v14 = vand.u32 2147483648, %v5381_v45  ;;  %vm728_vm3 = vweird.f32 %v5381_v45  ;;  %4371 = vrcp.f32 %v5369_v6 }
 0x3b2   :  { %v5482_v58 = vpop.xlane.xlu0 %1678  ;;  %v5489_v15 = vpop.eup %4363  ;;  %v995_v41 = vsel %vm249_vm2, %v5484_v51, 0.0  ;;  %v686_v1 = vsel %vm685_vm9, %v5441_v38, %v682_v27  ;;  %v707_v54 = vmul.f32 %v5172_v10, %v706_v55  ;;  %v719_v10 = vand.u32 2147483648, %v5335_v34 }
 0x3b3   :  { %1863 = vrot.lane.b32.xlu1 %v4838_v19, %s4602_s24  ;;  %v5497_v36 = vpop.eup %4365  ;;  %vm714_vm12 = vweird.f32 %v5489_v15  ;;  %v717_v27 = vand.u32 2147483647, %v5335_v34  ;;  %v732_v12 = vand.u32 2147483647, %v5381_v45  ;;  %v1690_v23 = vsub.f32 %v5209_v18, %v5305_v29 }
 0x3b4   :  { %v5513_v8 = vpop.eup %4367  ;;  %v724_v50 = vmul.f32 %v5497_v36, %v5381_v45  ;;  %vm729_vm14 = vweird.f32 %v5497_v36  ;;  %vm715_vm15 = vmor %vm713_vm13, %vm714_vm12  ;;  %v735_v31 = vor.u32 1.1754944e-38, %v734_v14  ;;  %vm743_vm8 = vweird.f32 %v5369_v6 }
 0x3b5   :  { %v983_v25 = vsel %vm249_vm2, %v5513_v8, 0.0  ;;  %v5531_v61 = vpop.eup %4369  ;;  %vm730_vm4 = vmor %vm728_vm3, %vm729_vm14  ;;  %vm718_vm5 = vcmp.eq.f32.partialorder %v717_v27, 8.507059e+37  ;;  %vm733_vm6 = vcmp.eq.f32.partialorder %v732_v12, 8.507059e+37  ;;  %v749_v27 = vand.u32 2147483648, %v5369_v6  ;;  %v7446_v12 = vld [vmem:[#allocation3_spill] sm:$0xff] }
 0x3b8   :  { %v5515_v24 = vpop.xlane.xlu1 %2010 }
 0x3b9   :  { %990 = vadd.xlane.f32.xlu0 %v989_v21  ;;  %v725_v21 = vsub.f32 1.0, %v724_v50  ;;  %v4372_v50 = vpop.eup %4371 }
 0x3ba   :  { %v5525_v60 = vpop.xlane.xlu0 %2007  ;;  %v739_v55 = vmul.f32 %v4372_v50, %v5369_v6  ;;  %vm744_vm7 = vweird.f32 %v4372_v50 }
 0x3bb   :  { %1861 = vrot.lane.b32.xlu1 %v4818_v9, %s4602_s24  ;;  %v726_v33 = vmul.f32 %v5497_v36, %v725_v21  ;;  %vm5592_vm9 = vmor %vm743_vm8, %vm744_vm7 }
 0x3bc   :  { %4130 = vmatmul.msk.bf16.vlgmr.msrb.gmra.mxu2 %vm249_vm2, %v768_v7 }
 0x3bd   :  { %1518 = vmatpush.bf16.msrb.mxu2 %v5357_v3  ;;  %v709_v3 = vmul.f32 %v5489_v15, %v5335_v34  ;;  %v720_v34 = vor.u32 1.1754944e-38, %v719_v10 }
 0x3bf   :  { %v710_v2 = vsub.f32 1.0, %v709_v3 }
 0x3c1   :  { %996 = vadd.xlane.f32.xlu0 %v995_v41  ;;  %1519 = vmatpush.bf16.msrb.mxu2 %v5371_v49  ;;  %v691_v49 = vsel %vm688_vm11, %v690_v52, %v686_v1  ;;  %v711_v38 = vmul.f32 %v5489_v15, %v710_v2  ;;  %v5552_v41 = vpop.f32.mrf.mxu1  ;;  %v1699_v1 = vmul.f32 1.442695, %v1690_v23 }
 0x3c2   :  { %v692_v4 = vmul.f32 %v5151_v32, %v691_v49  ;;  %v2039_v32 = vsel %vm249_vm2, %v5531_v61, 0.0  ;;  %v2352_v53 = vsel %vm249_vm2, %v5552_v41, -inf }
 0x3c3   :  { %v712_v42 = vadd.f32 %v5489_v15, %v711_v38 }
 0x3c4   :  { %v769_v16 = vpack.c.bf16 %v707_v54, %v692_v4  ;;  %v740_v54 = vsub.f32 1.0, %v739_v55 }
 0x3c5   :  { %1520 = vmatpush.bf16.msrb.mxu2 %v5422_v0  ;;  %984 = vadd.xlane.f32.xlu2 %v983_v25  ;;  %v964_v0 = vsub.f32 %v5112_v22, %v5219_v5  ;;  %v727_v22 = vadd.f32 %v5497_v36, %v726_v33  ;;  %v716_v30 = vsel %vm715_vm15, %v5489_v15, %v712_v42  ;;  %v7441_v25 = vld [vmem:[#allocation9_spill] sm:$0xff]  ;;  %v5578_v33 = vpop.f32.mrf.mxu0 }
 0x3c6   :  { %v721_v48 = vsel %vm718_vm5, %v720_v34, %v716_v30  ;;  %v966_v49 = vsub.f32 %v7441_v25, %v5333_v62  ;;  %v2017_v62 = vsub.f32 %v5243_v63, %v5435_v44 }
 0x3c7   :  { %v977_v5 = vmul.f32 1.442695, %v964_v0  ;;  %v731_v3 = vsel %vm730_vm4, %v5497_v36, %v727_v22  ;;  %v722_v18 = vmul.f32 %v5195_v37, %v721_v48 }
 0x3c8   :  { %v736_v15 = vsel %vm733_vm6, %v735_v31, %v731_v3  ;;  %v2027_v63 = vmul.f32 1.442695, %v2017_v62 }
 0x3c9   :  { %1521 = vmatpush.bf16.msrb.mxu2 %v5412_v13  ;;  %v1866_v13 = vpop.permute.xlu0 %1865  ;;  %4373 = vpow2.f32 %v977_v5  ;;  %v737_v36 = vmul.f32 %v5187_v40, %v736_v15  ;;  %v981_v40 = vmul.f32 1.442695, %v966_v49  ;;  %v747_v5 = vand.u32 2147483647, %v5369_v6  ;;  %v7444_v15 = vld [vmem:[#allocation10_spill] sm:$0xff] }
 0x3ca   :  { %v1868_v7 = vpop.permute.xlu1 %1867  ;;  %4375 = vpow2.f32 %v1699_v1  ;;  %v750_v6 = vor.u32 1.1754944e-38, %v749_v27  ;;  %v1689_v1 = vsub.f32 %v7444_v15, %v5365_v35 }
 0x3cb   :  { %1889 = vmatpush.bf16.msra.mxu3 %v1868_v7  ;;  %v770_v2 = vpack.c.bf16 %v737_v36, %v722_v18  ;;  %vm748_vm11 = vcmp.eq.f32.partialorder %v747_v5, 8.507059e+37 }
 0x3cc   :  { %4131 = vmatmul.msk.bf16.gmra.mxu2 %vm249_vm2, %v769_v16  ;;  %v741_v16 = vmul.f32 %v4372_v50, %v740_v54  ;;  %v1697_v54 = vmul.f32 1.442695, %v1689_v1 }
 0x3cd   :  { %2040 = vadd.xlane.f32.xlu2 %v2039_v32  ;;  %v2710_v32 = vsel %vm249_vm2, %v5578_v33, -inf }
 0x3cf   :  { %1890 = vmatpush.bf16.msra.mxu3 %v1866_v13  ;;  %v5567_v52 = vpop.eup %4373  ;;  %v742_v13 = vadd.f32 %v4372_v50, %v741_v16 }
 0x3d0   :  { %v998_v21 = vsel %vm249_vm2, %v5567_v52, 0.0  ;;  %v5576_v7 = vpop.eup %4375 }
 0x3d1   :  { %v1716_v0 = vsel %vm249_vm2, %v5576_v7, 0.0  ;;  %v746_v48 = vsel %vm5592_vm9, %v4372_v50, %v742_v13 }
 0x3d2   :  { %v751_v55 = vsel %vm748_vm11, %v750_v6, %v746_v48  ;;  %v7447_v48 = vld [vmem:[#allocation7_spill] sm:$0xff] }
 0x3d5   :  { %2189 = vrot.lane.b32.xlu0 %v4838_v19, %s4609_s30  ;;  %2353 = vmax.xlane.f32.xlu2 %v2352_v53 }
 0x3d6   :  { %v5561_v45 = vpop.xlane.xlu0 %1687 }
 0x3d7   :  { %v5564_v29 = vpop.xlane.xlu2 %1675 }
 0x3dc   :  { %4132 = vmatmul.msk.bf16.gmra.mxu2 %vm249_vm2, %v770_v2 }
 0x3dd   :  { %999 = vadd.xlane.f32.xlu2 %v998_v21  ;;  %v752_v21 = vmul.f32 %v5268_v46, %v751_v55 }
 0x3de   :  { %v647_v37 = vpop.xlane.xlu0 %646  ;;  %v489_v38 = vpop.f32.mrf.mxu2 }
 0x3df   :  { %4377 = vrcp.f32 %v647_v37  ;;  %503 = vst.msk [vmem:[#allocation2 + $0x20] sm:$0xff] %vm195_vm1, %v489_v38  ;;  %v2002_v4 = vpop.xlane.xlu2 %2001  ;;  %v764_v30 = vand.u32 2147483648, %v647_v37  ;;  %v762_v3 = vand.u32 2147483647, %v647_v37  ;;  %vm758_vm12 = vweird.f32 %v647_v37 }
 0x3e0   :  { %4379 = vpow2.f32 %v981_v40  ;;  %v2018_v53 = vsub.f32 %v5255_v47, %v2002_v4  ;;  %v1692_v38 = vsub.f32 %v5259_v59, %v5564_v29  ;;  %v1691_v40 = vsub.f32 %v5246_v26, %v5457_v39 }
 0x3e1   :  { %4381 = vpow2.f32 %v2027_v63  ;;  %v765_v18 = vor.u32 1.1754944e-38, %v764_v30  ;;  %vm763_vm14 = vcmp.eq.f32.partialorder %v762_v3, 8.507059e+37  ;;  %v5642_v63 = vpop.f32.mrf.mxu1 }
 0x3e2   :  { %v2029_v25 = vmul.f32 1.442695, %v2018_v53  ;;  %v1703_v46 = vmul.f32 1.442695, %v1692_v38 }
 0x3e4   :  { %4383 = vpow2.f32 %v2029_v25 }
 0x3e5   :  { %v4378_v42 = vpop.eup %4377  ;;  %1717 = vadd.xlane.f32.xlu1 %v1716_v0  ;;  %2711 = vmax.xlane.f32.xlu2 %v2710_v32  ;;  %4385 = vpow2.f32 %v1697_v54 }
 0x3e6   :  { %v754_v10 = vmul.f32 %v4378_v42, %v647_v37  ;;  %v491_v22 = vpop.f32.mrf.mxu2  ;;  %v5596_v34 = vpop.eup %4379  ;;  %vm759_vm10 = vweird.f32 %v4378_v42  ;;  %4387 = vpow2.f32 %v1703_v46 }
 0x3e7   :  { %504 = vst.msk [vmem:[#allocation2 + $0x28] sm:$0xff] %vm195_vm1, %v491_v22  ;;  %v5590_v14 = vpop.xlane.xlu2 %2004  ;;  %vm760_vm13 = vmor %vm758_vm12, %vm759_vm10  ;;  %v1004_v36 = vsel %vm249_vm2, %v5596_v34, 0.0  ;;  %v5609_v37 = vpop.eup %4381 }
 0x3e8   :  { %v755_v44 = vsub.f32 1.0, %v754_v10  ;;  %v2045_v4 = vsel %vm249_vm2, %v5609_v37, 0.0  ;;  %v7445_v10 = vld [vmem:[#allocation6_spill] sm:$0xff] }
 0x3ea   :  { %v756_v23 = vmul.f32 %v4378_v42, %v755_v44  ;;  %v5618_v16 = vpop.eup %4383  ;;  %v2355_v44 = vsel %vm249_vm2, %v5642_v63, -inf }
 0x3eb   :  { %v5622_v0 = vpop.eup %4385  ;;  %v2048_v59 = vsel %vm249_vm2, %v5618_v16, 0.0 }
 0x3ec   :  { %v757_v31 = vadd.f32 %v4378_v42, %v756_v23  ;;  %v1713_v26 = vsel %vm249_vm2, %v5622_v0, 0.0  ;;  %v5630_v29 = vpop.eup %4387 }
 0x3ed   :  { %1005 = vadd.xlane.f32.xlu2 %v1004_v36  ;;  %v1722_v13 = vsel %vm249_vm2, %v5630_v29, 0.0  ;;  %v7448_v36 = vld [vmem:[#allocation8_spill] sm:$0xff] }
 0x3ee   :  { %v761_v2 = vsel %vm760_vm13, %v4378_v42, %v757_v31 }
 0x3ef   :  { %v766_v50 = vsel %vm763_vm14, %v765_v18, %v761_v2  ;;  %v5605_v49 = vpop.xlane.xlu2 %1684 }
 0x3f0   :  { %v767_v47 = vmul.f32 %v5321_v20, %v766_v50  ;;  %v1701_v20 = vmul.f32 1.442695, %v1691_v40 }
 0x3f1   :  { %v2192_v22 = vpop.permute.xlu0 %2191 }
 0x3f2   :  { %v771_v35 = vpack.c.bf16 %v767_v47, %v752_v21  ;;  %4389 = vpow2.f32 %v1701_v20 }
 0x3f4   :  { %4133 = vmatmul.msk.bf16.gmra.mxu2 %vm249_vm2, %v771_v35 }
 0x3f5   :  { %2046 = vadd.xlane.f32.xlu2 %v2045_v4  ;;  %v5628_v39 = vpop.xlane.xlu1 %987 }
 0x3f6   :  { %4391 = vrcp.f32 %v5628_v39  ;;  %vm1027_vm3 = vweird.f32 %v5628_v39 }
 0x3f7   :  { %v5620_v62 = vpop.xlane.xlu2 %2013 }
 0x3f8   :  { %v5632_v42 = vpop.eup %4389 }
 0x3f9   :  { %v1719_v27 = vsel %vm249_vm2, %v5632_v42, 0.0 }
 0x3fc   :  { %v4392_v1 = vpop.eup %4391 }
 0x3fd   :  { %2049 = vadd.xlane.f32.xlu2 %v2048_v59  ;;  %v5640_v5 = vpop.xlane.xlu1 %2350  ;;  %v1023_v18 = vmul.f32 %v4392_v1, %v5628_v39  ;;  %vm1028_vm15 = vweird.f32 %v4392_v1 }
 0x3fe   :  { %vm5687_vm4 = vmor %vm1027_vm3, %vm1028_vm15 }
 0x3ff   :  { %1714 = vadd.xlane.f32.xlu0 %v1713_v26  ;;  %v2194_v32 = vpop.permute.xlu2 %2193  ;;  %v1024_v2 = vsub.f32 1.0, %v1023_v18  ;;  %v1033_v26 = vand.u32 2147483648, %v5628_v39 }
 0x401   :  { %v1025_v47 = vmul.f32 %v4392_v1, %v1024_v2 }
 0x403   :  { %v1026_v4 = vadd.f32 %v4392_v1, %v1025_v47 }
 0x404   :  { %4142 = vmatmul.msk.bf16.vlgmr.msra.gmra.mxu2 %vm195_vm1, %v7445_v10 }
 0x405   :  { %2215 = vmatpush.bf16.msra.mxu2 %v2194_v32  ;;  %1723 = vadd.xlane.f32.xlu2 %v1722_v13  ;;  %v5646_v30 = vpop.xlane.xlu1 %993  ;;  %v1031_v13 = vand.u32 2147483647, %v5628_v39  ;;  %v1034_v39 = vor.u32 1.1754944e-38, %v1033_v26 }
 0x407   :  { %1720 = vadd.xlane.f32.xlu0 %v1719_v27  ;;  %vm1032_vm6 = vcmp.eq.f32.partialorder %v1031_v13, 8.507059e+37 }
 0x409   :  { %2216 = vmatpush.bf16.msra.mxu2 %v2192_v22 }
 0x40d   :  { %v5650_v23 = vpop.xlane.xlu1 %1002 }
 0x40f   :  { %2356 = vmax.xlane.f32.xlu0 %v2355_v44 }
 0x414   :  { %4143 = vmatmul.msk.bf16.gmra.mxu2 %vm195_vm1, %v7446_v12  ;;  %v1030_v12 = vsel %vm5687_vm4, %v4392_v1, %v1026_v4 }
 0x415   :  { %v1035_v47 = vsel %vm1032_vm6, %v1034_v39, %v1030_v12  ;;  %v1061_v12 = vand.u32 2147483647, %v5646_v30 }
 0x416   :  { %v1036_v39 = vmul.f32 %v5339_v57, %v1035_v47 }
 0x41c   :  { %v5652_v3 = vpop.xlane.xlu0 %2043 }
 0x41d   :  { %4393 = vrcp.f32 %v5652_v3  ;;  %vm2083_vm11 = vweird.f32 %v5652_v3 }
 0x423   :  { %v5666_v25 = vpop.eup %4393 }
 0x424   :  { %4144 = vmatmul.msk.bf16.gmra.mxu2 %vm195_vm1, %v7447_v48  ;;  %v5657_v31 = vpop.xlane.xlu0 %2708  ;;  %v2079_v54 = vmul.f32 %v5666_v25, %v5652_v3  ;;  %vm2084_vm8 = vweird.f32 %v5666_v25 }
 0x425   :  { %v1864_v6 = vpop.permute.xlu1 %1863  ;;  %vm5708_vm12 = vmor %vm2083_vm11, %vm2084_vm8  ;;  %vm1057_vm8 = vweird.f32 %v5646_v30 }
 0x426   :  { %1891 = vmatpush.bf16.msra.mxu3 %v1864_v6  ;;  %v2080_v46 = vsub.f32 1.0, %v2079_v54 }
 0x428   :  { %v2081_v6 = vmul.f32 %v5666_v25, %v2080_v46 }
 0x42a   :  { %v2082_v1 = vadd.f32 %v5666_v25, %v2081_v6 }
 0x42c   :  { %v5664_v55 = vpop.xlane.xlu0 %990 }
 0x42d   :  { %v1862_v53 = vpop.permute.xlu1 %1861  ;;  %4395 = vrcp.f32 %v5664_v55  ;;  %vm1042_vm6 = vweird.f32 %v5664_v55 }
 0x42e   :  { %1892 = vmatpush.bf16.msra.mxu3 %v1862_v53 }
 0x42f   :  { %v494_v15 = vpop.f32.mrf.mxu2 }
 0x430   :  { %505 = vst.msk [vmem:[#allocation2 + $0x30] sm:$0xff] %vm195_vm1, %v494_v15 }
 0x433   :  { %v5673_v35 = vpop.eup %4395 }
 0x434   :  { %4145 = vmatmul.msk.bf16.gmra.mxu2 %vm195_vm1, %v7448_v36  ;;  %v5675_v38 = vpop.xlane.xlu0 %996  ;;  %v1038_v22 = vmul.f32 %v5673_v35, %v5664_v55  ;;  %vm1043_vm3 = vweird.f32 %v5673_v35 }
 0x436   :  { %v1039_v36 = vsub.f32 1.0, %v1038_v22  ;;  %v2089_v22 = vand.u32 2147483648, %v5652_v3 }
 0x437   :  { %v496_v50 = vpop.f32.mrf.mxu2 }
 0x438   :  { %506 = vst.msk [vmem:[#allocation2 + $0x38] sm:$0xff] %vm195_vm1, %v496_v50  ;;  %v985_v21 = vpop.xlane.xlu2 %984 }
 0x439   :  { %4397 = vrcp.f32 %v985_v21  ;;  %v1018_v53 = vand.u32 2147483648, %v985_v21  ;;  %v1016_v18 = vand.u32 2147483647, %v985_v21  ;;  %vm1012_vm7 = vweird.f32 %v985_v21 }
 0x43a   :  { %4399 = vrcp.f32 %v5646_v30 }
 0x43b   :  { %v1019_v4 = vor.u32 1.1754944e-38, %v1018_v53  ;;  %vm1017_vm10 = vcmp.eq.f32.partialorder %v1016_v18, 8.507059e+37 }
 0x43f   :  { %v4398_v40 = vpop.eup %4397  ;;  %v5677_v20 = vpop.f32.mrf.mxu2 }
 0x440   :  { %v5679_v59 = vpop.eup %4399  ;;  %v1008_v32 = vmul.f32 %v4398_v40, %v985_v21  ;;  %v5682_v10 = vpop.xlane.xlu2 %2040  ;;  %vm1013_vm5 = vweird.f32 %v4398_v40  ;;  %v2087_v21 = vand.u32 2147483647, %v5652_v3 }
 0x441   :  { %4401 = vrcp.f32 %v5682_v10  ;;  %v1053_v48 = vmul.f32 %v5679_v59, %v5646_v30  ;;  %vm1014_vm9 = vmor %vm1012_vm7, %vm1013_vm5  ;;  %v2074_v3 = vand.u32 2147483648, %v5682_v10  ;;  %vm1058_vm14 = vweird.f32 %v5679_v59 }
 0x442   :  { %v1009_v44 = vsub.f32 1.0, %v1008_v32  ;;  %4403 = vrcp.f32 %v5675_v38  ;;  %vm2088_vm15 = vcmp.eq.f32.partialorder %v2087_v21, 8.507059e+37  ;;  %vm2068_vm4 = vweird.f32 %v5682_v10 }
 0x443   :  { %v1054_v32 = vsub.f32 1.0, %v1053_v48  ;;  %v1040_v48 = vmul.f32 %v5673_v35, %v1039_v36 }
 0x444   :  { %v1010_v15 = vmul.f32 %v4398_v40, %v1009_v44 }
 0x445   :  { %v1041_v57 = vadd.f32 %v5673_v35, %v1040_v48 }
 0x446   :  { %v1011_v2 = vadd.f32 %v4398_v40, %v1010_v15  ;;  %v2086_v15 = vsel %vm5708_vm12, %v5666_v25, %v2082_v1  ;;  %v2075_v1 = vor.u32 1.1754944e-38, %v2074_v3  ;;  %vm1062_vm12 = vcmp.eq.f32.partialorder %v1061_v12, 8.507059e+37 }
 0x447   :  { %v2190_v50 = vpop.permute.xlu0 %2189  ;;  %v4402_v54 = vpop.eup %4401 }
 0x448   :  { %v5700_v46 = vpop.f32.mrf.mxu2  ;;  %2217 = vmatpush.bf16.msra.mxu2 %v2190_v50  ;;  %v2064_v26 = vmul.f32 %v4402_v54, %v5682_v10  ;;  %v5703_v13 = vpop.xlane.xlu2 %2353  ;;  %v1015_v27 = vsel %vm1014_vm9, %v4398_v40, %v1011_v2  ;;  %v1055_v40 = vmul.f32 %v5679_v59, %v1054_v32  ;;  %vm2069_vm13 = vweird.f32 %v4402_v54  ;;  %vm1044_vm9 = vmor %vm1042_vm6, %vm1043_vm3 }
 0x449   :  { %7451 = vst [vmem:[#allocation9_spill] sm:$0xff] %v5700_v46  ;;  %v1020_v44 = vsel %vm1017_vm10, %v1019_v4, %v1015_v27  ;;  %v2072_v2 = vand.u32 2147483647, %v5682_v10  ;;  %v1048_v32 = vand.u32 2147483648, %v5664_v55  ;;  %vm2070_vm5 = vmor %vm2068_vm4, %vm2069_vm13  ;;  %v1046_v4 = vand.u32 2147483647, %v5664_v55 }
 0x44a   :  { %v2065_v6 = vsub.f32 1.0, %v2064_v26  ;;  %v1021_v53 = vmul.f32 %v5513_v8, %v1020_v44  ;;  %v2090_v8 = vor.u32 1.1754944e-38, %v2089_v22  ;;  %v1056_v25 = vadd.f32 %v5679_v59, %v1055_v40  ;;  %v4404_v22 = vpop.eup %4403  ;;  %vm1059_vm10 = vmor %vm1057_vm8, %vm1058_vm14 }
 0x44b   :  { %vm2073_vm7 = vcmp.eq.f32.partialorder %v2072_v2, 8.507059e+37  ;;  %v1063_v10 = vand.u32 2147483648, %v5646_v30  ;;  %vm1047_vm11 = vcmp.eq.f32.partialorder %v1046_v4, 8.507059e+37  ;;  %vm1073_vm14 = vweird.f32 %v4404_v22 }
 0x44c   :  { %v2066_v18 = vmul.f32 %v4402_v54, %v2065_v6  ;;  %v1127_v36 = vpack.c.bf16 %v1036_v39, %v1021_v53  ;;  %v2091_v47 = vsel %vm2088_vm15, %v2090_v8, %v2086_v15  ;;  %v1049_v6 = vor.u32 1.1754944e-38, %v1048_v32 }
 0x44d   :  { %v5739_v48 = vmul.f32 %v5408_v28, %v2091_v47  ;;  %v1068_v53 = vmul.f32 %v4404_v22, %v5675_v38  ;;  %v1060_v30 = vsel %vm1059_vm10, %v5679_v59, %v1056_v25  ;;  %v1064_v40 = vor.u32 1.1754944e-38, %v1063_v10 }
 0x44e   :  { %v2067_v50 = vadd.f32 %v4402_v54, %v2066_v18  ;;  %4138 = vmatmul.msk.bf16.vlgmr.msrb.gmra.mxu3 %vm249_vm2, %v1127_v36  ;;  %v1078_v10 = vand.u32 2147483648, %v5675_v38  ;;  %vm1072_vm4 = vweird.f32 %v5675_v38 }
 0x44f   :  { %7455 = vst [vmem:[#allocation6_spill] sm:$0xff] %v5739_v48  ;;  %v1069_v3 = vsub.f32 1.0, %v1068_v53 }
 0x450   :  { %v2071_v26 = vsel %vm2070_vm5, %v4402_v54, %v2067_v50  ;;  %v5731_v27 = vpop.f32.mrf.mxu2  ;;  %v1000_v21 = vpop.xlane.xlu2 %999  ;;  %v1045_v54 = vsel %vm1044_vm9, %v5673_v35, %v1041_v57  ;;  %vm1074_vm5 = vmor %vm1072_vm4, %vm1073_vm14 }
 0x451   :  { %7454 = vst [vmem:[#allocation10_spill] sm:$0xff] %v5731_v27  ;;  %v2076_v44 = vsel %vm2073_vm7, %v2075_v1, %v2071_v26  ;;  %4405 = vrcp.f32 %v1000_v21  ;;  %v1050_v28 = vsel %vm1047_vm11, %v1049_v6, %v1045_v54  ;;  %v1070_v50 = vmul.f32 %v4404_v22, %v1069_v3 }
 0x452   :  { %v5742_v55 = vmul.f32 %v5531_v61, %v2076_v44  ;;  %v1065_v61 = vsel %vm1062_vm12, %v1064_v40, %v1060_v30  ;;  %v1051_v2 = vmul.f32 %v5464_v11, %v1050_v28  ;;  %4407 = vrcp.f32 %v5650_v23 }
 0x453   :  { %v1066_v57 = vmul.f32 %v5367_v43, %v1065_v61  ;;  %v1093_v32 = vand.u32 2147483648, %v1000_v21  ;;  %v1071_v4 = vadd.f32 %v4404_v22, %v1070_v50  ;;  %vm1087_vm15 = vweird.f32 %v1000_v21 }
 0x454   :  { %7456 = vst [vmem:[#allocation3_spill] sm:$0xff] %v5742_v55  ;;  %v1091_v11 = vand.u32 2147483647, %v1000_v21  ;;  %v1076_v43 = vand.u32 2147483647, %v5675_v38  ;;  %vm1102_vm11 = vweird.f32 %v5650_v23 }
 0x455   :  { %v1128_v25 = vpack.c.bf16 %v1066_v57, %v1051_v2  ;;  %v1094_v54 = vor.u32 1.1754944e-38, %v1093_v32  ;;  %v1075_v53 = vsel %vm1074_vm5, %v4404_v22, %v1071_v4 }
 0x456   :  { %vm1092_vm6 = vcmp.eq.f32.partialorder %v1091_v11, 8.507059e+37  ;;  %vm1077_vm7 = vcmp.eq.f32.partialorder %v1076_v43, 8.507059e+37 }
 0x457   :  { %v4406_v15 = vpop.eup %4405 }
 0x458   :  { %v1083_v18 = vmul.f32 %v4406_v15, %v1000_v21  ;;  %v5751_v35 = vpop.xlane.xlu2 %2711  ;;  %v5755_v8 = vpop.f32.mrf.mxu2  ;;  %vm1088_vm13 = vweird.f32 %v4406_v15  ;;  %v1079_v21 = vor.u32 1.1754944e-38, %v1078_v10 }
 0x459   :  { %7457 = vst [vmem:[#allocation7_spill] sm:$0xff] %v5755_v8  ;;  %v5759_v1 = vpop.eup %4407  ;;  %vm1089_vm3 = vmor %vm1087_vm15, %vm1088_vm13  ;;  %v5768_v30 = vpop.xlane.xlu1 %1717 }
 0x45a   :  { %v1084_v36 = vsub.f32 1.0, %v1083_v18  ;;  %v1098_v12 = vmul.f32 %v5759_v1, %v5650_v23  ;;  %v1080_v3 = vsel %vm1077_vm7, %v1079_v21, %v1075_v53  ;;  %vm1103_vm9 = vweird.f32 %v5759_v1 }
 0x45b   :  { %v1081_v22 = vmul.f32 %v5484_v51, %v1080_v3  ;;  %v1108_v51 = vand.u32 2147483648, %v5650_v23  ;;  %vm1104_vm13 = vmor %vm1102_vm11, %vm1103_vm9 }
 0x45c   :  { %v1085_v59 = vmul.f32 %v4406_v15, %v1084_v36  ;;  %v1099_v61 = vsub.f32 1.0, %v1098_v12 }
 0x45e   :  { %v1086_v47 = vadd.f32 %v4406_v15, %v1085_v59  ;;  %4139 = vmatmul.msk.bf16.gmra.mxu3 %vm249_vm2, %v1128_v25  ;;  %v1100_v36 = vmul.f32 %v5759_v1, %v1099_v61  ;;  %v1109_v61 = vor.u32 1.1754944e-38, %v1108_v51 }
 0x460   :  { %v1006_v26 = vpop.xlane.xlu2 %1005  ;;  %v1090_v44 = vsel %vm1089_vm3, %v4406_v15, %v1086_v47  ;;  %v5766_v6 = vpop.f32.mrf.mxu2 }
 0x461   :  { %4409 = vrcp.f32 %v1006_v26  ;;  %7458 = vst [vmem:[#allocation8_spill] sm:$0xff] %v5766_v6  ;;  %v1095_v40 = vsel %vm1092_vm6, %v1094_v54, %v1090_v44  ;;  %v1123_v4 = vand.u32 2147483648, %v1006_v26  ;;  %vm1117_vm10 = vweird.f32 %v1006_v26 }
 0x462   :  { %4411 = vrcp.f32 %v5768_v30  ;;  %v1096_v18 = vmul.f32 %v5567_v52, %v1095_v40  ;;  %v1101_v52 = vadd.f32 %v5759_v1, %v1100_v36  ;;  %v1121_v11 = vand.u32 2147483647, %v1006_v26 }
 0x463   :  { %v1106_v44 = vand.u32 2147483647, %v5650_v23  ;;  %v1124_v21 = vor.u32 1.1754944e-38, %v1123_v4 }
 0x464   :  { %v1129_v50 = vpack.c.bf16 %v1096_v18, %v1081_v22  ;;  %v1105_v40 = vsel %vm1104_vm13, %v5759_v1, %v1101_v52  ;;  %vm1122_vm14 = vcmp.eq.f32.partialorder %v1121_v11, 8.507059e+37  ;;  %v7461_v11 = vld [vmem:[#allocation20_spill] sm:$0xff] }
 0x465   :  { %vm1107_vm15 = vcmp.eq.f32.partialorder %v1106_v44, 8.507059e+37 }
 0x467   :  { %v4410_v28 = vpop.eup %4409 }
 0x468   :  { %v1113_v38 = vmul.f32 %v4410_v28, %v1006_v26  ;;  %v5771_v15 = vpop.xlane.xlu2 %2046  ;;  %v5777_v59 = vpop.eup %4411  ;;  %vm1118_vm8 = vweird.f32 %v4410_v28 }
 0x469   :  { %4413 = vrcp.f32 %v5771_v15  ;;  %v5779_v47 = vpop.f32.mrf.mxu2  ;;  %v1753_v12 = vmul.f32 %v5777_v59, %v5768_v30  ;;  %vm1119_vm12 = vmor %vm1117_vm10, %vm1118_vm8  ;;  %v2104_v52 = vand.u32 2147483648, %v5771_v15  ;;  %vm2098_vm4 = vweird.f32 %v5771_v15 }
 0x46a   :  { %v1114_v2 = vsub.f32 1.0, %v1113_v38  ;;  %7459 = vst [vmem:[#allocation21_spill] sm:$0xff] %v5779_v47  ;;  %v2102_v44 = vand.u32 2147483647, %v5771_v15  ;;  %vm1758_vm7 = vweird.f32 %v5777_v59 }
 0x46b   :  { %v1754_v3 = vsub.f32 1.0, %v1753_v12 }
 0x46c   :  { %v1115_v57 = vmul.f32 %v4410_v28, %v1114_v2  ;;  %v1110_v2 = vsel %vm1107_vm15, %v1109_v61, %v1105_v40  ;;  %vm2103_vm8 = vcmp.eq.f32.partialorder %v2102_v44, 8.507059e+37  ;;  %v1761_v44 = vand.u32 2147483647, %v5768_v30 }
 0x46e   :  { %v1116_v25 = vadd.f32 %v4410_v28, %v1115_v57  ;;  %4140 = vmatmul.msk.bf16.gmra.mxu3 %vm249_vm2, %v1129_v50 }
 0x46f   :  { %v5782_v32 = vpop.eup %4413 }
 0x470   :  { %v2094_v10 = vmul.f32 %v5782_v32, %v5771_v15  ;;  %v5789_v43 = vpop.xlane.xlu2 %2049  ;;  %v1120_v53 = vsel %vm1119_vm12, %v4410_v28, %v1116_v25  ;;  %vm2099_vm3 = vweird.f32 %v5782_v32  ;;  %v1755_v25 = vmul.f32 %v5777_v59, %v1754_v3 }
 0x471   :  { %4415 = vrcp.f32 %v5789_v43  ;;  %v1125_v38 = vsel %vm1122_vm14, %v1124_v21, %v1120_v53  ;;  %vm5822_vm5 = vmor %vm2098_vm4, %vm2099_vm3  ;;  %v2119_v53 = vand.u32 2147483648, %v5789_v43  ;;  %v2105_v3 = vor.u32 1.1754944e-38, %v2104_v52 }
 0x472   :  { %v5797_v54 = vpop.xlane.xlu0 %1714  ;;  %v2095_v26 = vsub.f32 1.0, %v2094_v10  ;;  %v1126_v50 = vmul.f32 %v5596_v34, %v1125_v38  ;;  %v1111_v10 = vmul.f32 %v7461_v11, %v1110_v2  ;;  %vm2113_vm9 = vweird.f32 %v5789_v43 }
 0x473   :  { %4417 = vrcp.f32 %v5797_v54  ;;  %vm1742_vm13 = vweird.f32 %v5797_v54  ;;  %v1746_v11 = vand.u32 2147483647, %v5797_v54  ;;  %vm1757_vm14 = vweird.f32 %v5768_v30 }
 0x474   :  { %v2096_v23 = vmul.f32 %v5782_v32, %v2095_v26  ;;  %v2117_v26 = vand.u32 2147483647, %v5789_v43  ;;  %v1130_v15 = vpack.c.bf16 %v1126_v50, %v1111_v10  ;;  %vm1759_vm3 = vmor %vm1757_vm14, %vm1758_vm7 }
 0x475   :  { %vm1747_vm4 = vcmp.eq.f32.partialorder %v1746_v11, 8.507059e+37  ;;  %v5887_v11 = vpop.f32.mrf.mxu0 }
 0x476   :  { %v2097_v57 = vadd.f32 %v5782_v32, %v2096_v23  ;;  %v1756_v23 = vadd.f32 %v5777_v59, %v1755_v25  ;;  %v1748_v25 = vand.u32 2147483648, %v5797_v54  ;;  %vm2118_vm12 = vcmp.eq.f32.partialorder %v2117_v26, 8.507059e+37 }
 0x477   :  { %v5802_v18 = vpop.f32.mrf.mxu2  ;;  %v4416_v22 = vpop.eup %4415 }
 0x478   :  { %7460 = vst [vmem:[#allocation22_spill] sm:$0xff] %v5802_v18  ;;  %v2109_v28 = vmul.f32 %v4416_v22, %v5789_v43  ;;  %v5809_v1 = vpop.xlane.xlu2 %1723  ;;  %v2101_v40 = vsel %vm5822_vm5, %v5782_v32, %v2097_v57  ;;  %vm2114_vm6 = vweird.f32 %v4416_v22  ;;  %v2120_v57 = vor.u32 1.1754944e-38, %v2119_v53 }
 0x479   :  { %v5804_v36 = vpop.eup %4417  ;;  %vm5840_vm11 = vmor %vm2113_vm9, %vm2114_vm6  ;;  %v2106_v52 = vsel %vm2103_vm8, %v2105_v3, %v2101_v40  ;;  %vm1762_vm5 = vcmp.eq.f32.partialorder %v1761_v44, 8.507059e+37  ;;  %v7470_v44 = vld [vmem:[#allocation11_spill] sm:$0xff] }
 0x47a   :  { %v1738_v4 = vmul.f32 %v5804_v36, %v5797_v54  ;;  %v5816_v51 = vpop.xlane.xlu0 %1720  ;;  %v2110_v12 = vsub.f32 1.0, %v2109_v28  ;;  %vm1743_vm10 = vweird.f32 %v5804_v36  ;;  %v5863_v26 = vmul.f32 %v5609_v37, %v2106_v52  ;;  %v7469_v37 = vld [vmem:[#allocation12_spill] sm:$0xff]  ;;  %v5884_v52 = vpop.f32.mrf.mxu1 }
 0x47b   :  { %4419 = vrcp.f32 %v5816_v51  ;;  %vm1744_vm15 = vmor %vm1742_vm13, %vm1743_vm10  ;;  %v1693_v3 = vsub.f32 %v7469_v37, %v5482_v58  ;;  %vm1772_vm8 = vweird.f32 %v5816_v51  ;;  %vm1787_vm10 = vweird.f32 %v5809_v1 }
 0x47c   :  { %v1739_v21 = vsub.f32 1.0, %v1738_v4  ;;  %4421 = vrcp.f32 %v5809_v1  ;;  %v2111_v61 = vmul.f32 %v4416_v22, %v2110_v12  ;;  %v1763_v12 = vand.u32 2147483648, %v5768_v30  ;;  %7467 = vst [vmem:[#allocation23_spill] sm:$0xff] %v5863_v26 }
 0x47d   :  { %v1760_v30 = vsel %vm1759_vm3, %v5777_v59, %v1756_v23 }
 0x47e   :  { %v1740_v38 = vmul.f32 %v5804_v36, %v1739_v21  ;;  %v2112_v2 = vadd.f32 %v4416_v22, %v2111_v61  ;;  %4141 = vmatmul.msk.bf16.gmra.mxu3 %vm249_vm2, %v1130_v15  ;;  %v1749_v21 = vor.u32 1.1754944e-38, %v1748_v25  ;;  %v1764_v61 = vor.u32 1.1754944e-38, %v1763_v12 }
 0x47f   :  { %v5838_v28 = vpop.f32.mrf.mxu2  ;;  %v2019_v12 = vsub.f32 %v7470_v44, %v5590_v14  ;;  %v1776_v14 = vand.u32 2147483647, %v5816_v51 }
 0x480   :  { %7464 = vst [vmem:[#allocation20_spill] sm:$0xff] %v5838_v28  ;;  %v1741_v50 = vadd.f32 %v5804_v36, %v1740_v38  ;;  %v2116_v43 = vsel %vm5840_vm11, %v4416_v22, %v2112_v2  ;;  %v1765_v2 = vsel %vm1762_vm5, %v1764_v61, %v1760_v30  ;;  %v1793_v30 = vand.u32 2147483648, %v5809_v1 }
 0x481   :  { %v5846_v4 = vpop.eup %4419  ;;  %v2121_v34 = vsel %vm2118_vm12, %v2120_v57, %v2116_v43  ;;  %v1705_v57 = vmul.f32 1.442695, %v1693_v3  ;;  %v1791_v61 = vand.u32 2147483647, %v5809_v1  ;;  %vm1777_vm12 = vcmp.eq.f32.partialorder %v1776_v14, 8.507059e+37  ;;  %v7473_v14 = vld [vmem:[#allocation15_spill] sm:$0xff] }
 0x482   :  { %v5852_v10 = vpop.eup %4421  ;;  %v1745_v53 = vsel %vm1744_vm15, %v5804_v36, %v1741_v50  ;;  %v1768_v22 = vmul.f32 %v5846_v4, %v5816_v51  ;;  %v5866_v54 = vmul.f32 %v5618_v16, %v2121_v34  ;;  %v1766_v50 = vmul.f32 %v5576_v7, %v1765_v2 }
 0x483   :  { %v1783_v40 = vmul.f32 %v5852_v10, %v5809_v1  ;;  %v1750_v15 = vsel %vm1747_vm4, %v1749_v21, %v1745_v53  ;;  %4423 = vpow2.f32 %v1705_v57  ;;  %vm1773_vm6 = vweird.f32 %v5846_v4 }
 0x484   :  { %7468 = vst [vmem:[#allocation24_spill] sm:$0xff] %v5866_v54  ;;  %v1769_v16 = vsub.f32 1.0, %v1768_v22  ;;  %v1751_v23 = vmul.f32 %v5622_v0, %v1750_v15  ;;  %v1778_v34 = vand.u32 2147483648, %v5816_v51  ;;  %v2358_v53 = vsel %vm249_vm2, %v5884_v52, -inf  ;;  %vm1774_vm9 = vmor %vm1772_vm8, %vm1773_vm6 }
 0x485   :  { %v1784_v32 = vsub.f32 1.0, %v1783_v40  ;;  %vm1788_vm7 = vweird.f32 %v5852_v10  ;;  %v2031_v40 = vmul.f32 1.442695, %v2019_v12  ;;  %v1794_v51 = vor.u32 1.1754944e-38, %v1793_v30 }
 0x486   :  { %v1770_v25 = vmul.f32 %v5846_v4, %v1769_v16  ;;  %v1857_v43 = vpack.c.bf16 %v1766_v50, %v1751_v23  ;;  %vm1789_vm11 = vmor %vm1787_vm10, %vm1788_vm7  ;;  %v1779_v37 = vor.u32 1.1754944e-38, %v1778_v34  ;;  %vm1792_vm13 = vcmp.eq.f32.partialorder %v1791_v61, 8.507059e+37  ;;  %v7471_v23 = vld [vmem:[#allocation14_spill] sm:$0xff]  ;;  %v5920_v50 = vpop.f32.mrf.mxu0 }
 0x487   :  { %v5877_v38 = vpop.f32.mrf.mxu2  ;;  %v1785_v58 = vmul.f32 %v5852_v10, %v1784_v32  ;;  %4425 = vpow2.f32 %v2031_v40  ;;  %v1694_v32 = vsub.f32 %v7471_v23, %v5470_v56  ;;  %v5926_v56 = vpop.f32.mrf.mxu1  ;;  %v2021_v30 = vsub.f32 %v7473_v14, %v5515_v24 }
 0x488   :  { %v1294_v59 = vsel %vm249_vm2, %v5877_v38, -inf  ;;  %v1771_v0 = vadd.f32 %v5846_v4, %v1770_v25 }
 0x489   :  { %1295 = vmax.xlane.f32.xlu1 %v1294_v59  ;;  %v1786_v21 = vadd.f32 %v5852_v10, %v1785_v58  ;;  %v5909_v3 = vpop.eup %4423  ;;  %v1707_v58 = vmul.f32 1.442695, %v1694_v32 }
 0x48a   :  { %v1775_v15 = vsel %vm1774_vm9, %v5846_v4, %v1771_v0  ;;  %v1725_v1 = vsel %vm249_vm2, %v5909_v3, 0.0  ;;  %v7472_v0 = vld [vmem:[#allocation13_spill] sm:$0xff] }
 0x48b   :  { %v1790_v16 = vsel %vm1789_vm11, %v5852_v10, %v1786_v21  ;;  %v1780_v2 = vsel %vm1777_vm12, %v1779_v37, %v1775_v15  ;;  %v2020_v34 = vsub.f32 %v7472_v0, %v5525_v60  ;;  %4427 = vpow2.f32 %v1707_v58 }
 0x48c   :  { %v1795_v57 = vsel %vm1792_vm13, %v1794_v51, %v1790_v16  ;;  %v1781_v10 = vmul.f32 %v5632_v42, %v1780_v2  ;;  %v2361_v60 = vsel %vm249_vm2, %v5926_v56, -inf  ;;  %v2035_v37 = vmul.f32 1.442695, %v2021_v30 }
 0x48d   :  { %v1796_v25 = vmul.f32 %v5630_v29, %v1795_v57  ;;  %v2716_v29 = vsel %vm249_vm2, %v5920_v50, -inf  ;;  %v2713_v30 = vsel %vm249_vm2, %v5887_v11, -inf }
 0x48e   :  { %4154 = vmatmul.msk.bf16.vlgmr.msra.gmra.mxu3 %vm249_vm2, %v1857_v43  ;;  %v5924_v43 = vpop.eup %4425  ;;  %v5937_v42 = vpop.f32.mrf.mxu0 }
 0x48f   :  { %v5894_v7 = vpop.f32.mrf.mxu2  ;;  %v1858_v44 = vpack.c.bf16 %v1796_v25, %v1781_v10  ;;  %v5947_v61 = vpop.f32.mrf.mxu1 }
 0x490   :  { %v1297_v22 = vsel %vm249_vm2, %v5894_v7, -inf }
 0x491   :  { %2359 = vmax.xlane.f32.xlu1 %v2358_v53  ;;  %1298 = vmax.xlane.f32.xlu2 %v1297_v22  ;;  %v2051_v53 = vsel %vm249_vm2, %v5924_v43, 0.0  ;;  %v2033_v22 = vmul.f32 1.442695, %v2020_v34  ;;  %v5939_v21 = vpop.eup %4427 }
 0x492   :  { %v1728_v15 = vsel %vm249_vm2, %v5939_v21, 0.0 }
 0x493   :  { %4429 = vpow2.f32 %v2033_v22 }
 0x494   :  { %4431 = vpow2.f32 %v2035_v37 }
 0x496   :  { %v5953_v16 = vpop.f32.mrf.mxu0 }
 0x497   :  { %v5912_v59 = vpop.f32.mrf.mxu2  ;;  %v2722_v2 = vsel %vm249_vm2, %v5953_v16, -inf  ;;  %v5963_v32 = vpop.f32.mrf.mxu1 }
 0x498   :  { %v1300_v4 = vsel %vm249_vm2, %v5912_v59, -inf }
 0x499   :  { %1726 = vadd.xlane.f32.xlu1 %v1725_v1  ;;  %1301 = vmax.xlane.f32.xlu0 %v1300_v4  ;;  %v5955_v24 = vpop.eup %4429 }
 0x49a   :  { %v2054_v23 = vsel %vm249_vm2, %v5955_v24, 0.0  ;;  %v5965_v1 = vpop.eup %4431 }
 0x49b   :  { %v2057_v57 = vsel %vm249_vm2, %v5965_v1, 0.0 }
 0x49e   :  { %4155 = vmatmul.msk.bf16.gmra.mxu3 %vm249_vm2, %v1858_v44 }
 0x49f   :  { %v5929_v12 = vpop.f32.mrf.mxu2  ;;  %v5971_v10 = vpop.f32.mrf.mxu1 }
 0x4a0   :  { %v2370_v44 = vsel %vm249_vm2, %v5971_v10, -inf  ;;  %v1303_v0 = vsel %vm249_vm2, %v5929_v12, -inf }
 0x4a1   :  { %2052 = vadd.xlane.f32.xlu1 %v2051_v53  ;;  %2717 = vmax.xlane.f32.xlu0 %v2716_v29 }
 0x4a7   :  { %v5943_v40 = vpop.f32.mrf.mxu2 }
 0x4a8   :  { %v1306_v53 = vsel %vm249_vm2, %v5943_v40, -inf }
 0x4a9   :  { %2362 = vmax.xlane.f32.xlu1 %v2361_v60  ;;  %2187 = vrot.lane.b32.xlu2 %v4818_v9, %s4609_s30 }
 0x4aa   :  { %1729 = vadd.xlane.f32.xlu0 %v1728_v15 }
 0x4af   :  { %v5957_v51 = vpop.f32.mrf.mxu2 }
 0x4b0   :  { %v1309_v22 = vsel %vm249_vm2, %v5957_v51, -inf }
 0x4b1   :  { %2723 = vmax.xlane.f32.xlu1 %v2722_v2 }
 0x4b2   :  { %2055 = vadd.xlane.f32.xlu0 %v2054_v23 }
 0x4b7   :  { %v5967_v4 = vpop.f32.mrf.mxu2 }
 0x4b8   :  { %v1312_v15 = vsel %vm249_vm2, %v5967_v4, -inf }
 0x4b9   :  { %2058 = vadd.xlane.f32.xlu1 %v2057_v57 }
 0x4bf   :  { %v5973_v25 = vpop.f32.mrf.mxu2 }
 0x4c0   :  { %v1315_v58 = vsel %vm249_vm2, %v5973_v25, -inf }
 0x4c1   :  { %1316 = vmax.xlane.f32.xlu0 %v1315_v58  ;;  %2371 = vmax.xlane.f32.xlu1 %v2370_v44 }
 0x4d1   :  { %v5981_v34 = vpop.f32.mrf.mxu3 }
 0x4d2   :  { %1304 = vmax.xlane.f32.xlu2 %v1303_v0  ;;  %v6004_v0 = vpop.xlane.xlu0 %2356 }
 0x4d9   :  { %v5985_v29 = vpop.f32.mrf.mxu3 }
 0x4da   :  { %1307 = vmax.xlane.f32.xlu2 %v1306_v53 }
 0x4e1   :  { %v5989_v14 = vpop.f32.mrf.mxu3 }
 0x4e2   :  { %7474 = vst [vmem:[#allocation12_spill] sm:$0xff] %v5989_v14  ;;  %1310 = vmax.xlane.f32.xlu2 %v1309_v22 }
 0x4e9   :  { %v5993_v60 = vpop.f32.mrf.mxu3 }
 0x4ea   :  { %7475 = vst [vmem:[#allocation11_spill] sm:$0xff] %v5993_v60  ;;  %2714 = vmax.xlane.f32.xlu2 %v2713_v30 }
 0x4f1   :  { %v5997_v37 = vpop.f32.mrf.mxu3 }
 0x4f2   :  { %7476 = vst [vmem:[#allocation14_spill] sm:$0xff] %v5997_v37  ;;  %1313 = vmax.xlane.f32.xlu2 %v1312_v15  ;;  %v7479_v15 = vld [vmem:[#allocation17_spill] sm:$0xff] }
 0x4f3   :  { %v1696_v28 = vsub.f32 %v7479_v15, %v5561_v45 }
 0x4f9   :  { %v5999_v2 = vpop.f32.mrf.mxu3 }
 0x4fa   :  { %7477 = vst [vmem:[#allocation13_spill] sm:$0xff] %v5999_v2 }
 0x4fc   :  { %v1296_v23 = vpop.xlane.xlu1 %1295 }
 0x4fd   :  { %v1318_v57 = vsub.f32 %v5877_v38, %v1296_v23 }
 0x4ff   :  { %v1326_v58 = vmul.f32 1.442695, %v1318_v57  ;;  %v1711_v57 = vmul.f32 1.442695, %v1696_v28  ;;  %v2719_v28 = vsel %vm249_vm2, %v5937_v42, -inf }
 0x501   :  { %4433 = vpow2.f32 %v1326_v58  ;;  %v6002_v44 = vpop.f32.mrf.mxu3 }
 0x502   :  { %7478 = vst [vmem:[#allocation15_spill] sm:$0xff] %v6002_v44 }
 0x504   :  { %v1299_v53 = vpop.xlane.xlu2 %1298  ;;  %v6006_v22 = vpop.xlane.xlu1 %2359 }
 0x505   :  { %v1319_v30 = vsub.f32 %v5894_v7, %v1299_v53  ;;  %v7481_v53 = vld [vmem:[#allocation16_spill] sm:$0xff] }
 0x506   :  { %v1695_v45 = vsub.f32 %v7481_v53, %v5605_v49 }
 0x507   :  { %v6009_v36 = vpop.eup %4433  ;;  %v1328_v39 = vmul.f32 1.442695, %v1319_v30 }
 0x508   :  { %v1342_v38 = vsel %vm249_vm2, %v6009_v36, 0.0 }
 0x509   :  { %4435 = vpow2.f32 %v1328_v39  ;;  %1343 = vadd.xlane.f32.xlu0 %v1342_v38  ;;  %v6015_v23 = vpop.f32.mrf.mxu3 }
 0x50a   :  { %7480 = vst [vmem:[#allocation17_spill] sm:$0xff] %v6015_v23 }
 0x50c   :  { %v1302_v58 = vpop.xlane.xlu0 %1301  ;;  %v2188_v44 = vpop.permute.xlu2 %2187 }
 0x50d   :  { %v1320_v37 = vsub.f32 %v5912_v59, %v1302_v58  ;;  %v6018_v47 = vpop.xlane.xlu1 %1726  ;;  %2218 = vmatpush.bf16.msra.mxu2 %v2188_v44  ;;  %v1709_v44 = vmul.f32 1.442695, %v1695_v45  ;;  %v7482_v58 = vld [vmem:[#allocation18_spill] sm:$0xff]  ;;  %v2364_v45 = vsel %vm249_vm2, %v5947_v61, -inf }
 0x50e   :  { %4437 = vrcp.f32 %v6018_v47  ;;  %v2022_v53 = vsub.f32 %v7482_v58, %v5620_v62  ;;  %vm1802_vm15 = vweird.f32 %v6018_v47 }
 0x50f   :  { %v6020_v7 = vpop.eup %4435  ;;  %v1330_v30 = vmul.f32 1.442695, %v1320_v37  ;;  %4439 = vpow2.f32 %v1711_v57 }
 0x510   :  { %v1345_v39 = vsel %vm249_vm2, %v6020_v7, 0.0 }
 0x511   :  { %4441 = vpow2.f32 %v1330_v30  ;;  %1346 = vadd.xlane.f32.xlu2 %v1345_v39  ;;  %2720 = vmax.xlane.f32.xlu0 %v2719_v28  ;;  %v1894_v59 = vpop.f32.mrf.mxu3 }
 0x512   :  { %1914 = vst.msk [vmem:[#allocation2 + $0x40] sm:$0xff] %vm195_vm1, %v1894_v59  ;;  %4443 = vpow2.f32 %v1709_v44  ;;  %v2037_v44 = vmul.f32 1.442695, %v2022_v53  ;;  %v2367_v53 = vsel %vm249_vm2, %v5963_v32, -inf }
 0x514   :  { %v6030_v15 = vpop.xlane.xlu0 %2717  ;;  %v6032_v49 = vpop.eup %4437 }
 0x515   :  { %v6034_v37 = vpop.xlane.xlu1 %2052  ;;  %v6036_v38 = vpop.eup %4439  ;;  %v1798_v30 = vmul.f32 %v6032_v49, %v6018_v47  ;;  %vm1803_vm14 = vweird.f32 %v6032_v49 }
 0x516   :  { %4445 = vrcp.f32 %v6034_v37  ;;  %v1734_v28 = vsel %vm249_vm2, %v6036_v38, 0.0  ;;  %vm6070_vm3 = vmor %vm1802_vm15, %vm1803_vm14  ;;  %vm2128_vm10 = vweird.f32 %v6034_v37 }
 0x517   :  { %v6038_v57 = vpop.eup %4441  ;;  %v1799_v62 = vsub.f32 1.0, %v1798_v30 }
 0x518   :  { %v1348_v39 = vsel %vm249_vm2, %v6038_v57, 0.0  ;;  %v6052_v58 = vpop.eup %4443 }
 0x519   :  { %2365 = vmax.xlane.f32.xlu2 %v2364_v45  ;;  %1349 = vadd.xlane.f32.xlu1 %v1348_v39  ;;  %v1896_v59 = vpop.f32.mrf.mxu3  ;;  %v1800_v2 = vmul.f32 %v6032_v49, %v1799_v62  ;;  %v1731_v45 = vsel %vm249_vm2, %v6052_v58, 0.0 }
 0x51a   :  { %1735 = vadd.xlane.f32.xlu0 %v1734_v28  ;;  %1915 = vst.msk [vmem:[#allocation2 + $0x48] sm:$0xff] %vm195_vm1, %v1896_v59 }
 0x51b   :  { %v1801_v59 = vadd.f32 %v6032_v49, %v1800_v2 }
 0x51c   :  { %v6054_v18 = vpop.eup %4445 }
 0x51d   :  { %v1730_v23 = vpop.xlane.xlu0 %1729  ;;  %v2124_v39 = vmul.f32 %v6054_v18, %v6034_v37  ;;  %vm2129_vm7 = vweird.f32 %v6054_v18 }
 0x51e   :  { %4447 = vrcp.f32 %v1730_v23  ;;  %v1823_v55 = vand.u32 2147483648, %v1730_v23  ;;  %v1821_v46 = vand.u32 2147483647, %v1730_v23  ;;  %vm1817_vm6 = vweird.f32 %v1730_v23  ;;  %vm6087_vm11 = vmor %vm2128_vm10, %vm2129_vm7 }
 0x51f   :  { %4449 = vpow2.f32 %v2037_v44  ;;  %v2125_v62 = vsub.f32 1.0, %v2124_v39  ;;  %v1805_v39 = vsel %vm6070_vm3, %v6032_v49, %v1801_v59 }
 0x520   :  { %v1824_v49 = vor.u32 1.1754944e-38, %v1823_v55  ;;  %vm1822_vm9 = vcmp.eq.f32.partialorder %v1821_v46, 8.507059e+37 }
 0x521   :  { %1732 = vadd.xlane.f32.xlu2 %v1731_v45  ;;  %v1899_v30 = vpop.f32.mrf.mxu3  ;;  %v1808_v45 = vand.u32 2147483648, %v6018_v47  ;;  %v2126_v60 = vmul.f32 %v6054_v18, %v2125_v62 }
 0x522   :  { %2368 = vmax.xlane.f32.xlu0 %v2367_v53  ;;  %1916 = vst.msk [vmem:[#allocation2 + $0x50] sm:$0xff] %vm195_vm1, %v1899_v30  ;;  %v1806_v53 = vand.u32 2147483647, %v6018_v47 }
 0x523   :  { %v1809_v48 = vor.u32 1.1754944e-38, %v1808_v45  ;;  %v2127_v54 = vadd.f32 %v6054_v18, %v2126_v60 }
 0x524   :  { %v4448_v28 = vpop.eup %4447  ;;  %vm1807_vm5 = vcmp.eq.f32.partialorder %v1806_v53, 8.507059e+37 }
 0x525   :  { %v6066_v44 = vpop.eup %4449  ;;  %v1813_v6 = vmul.f32 %v4448_v28, %v1730_v23  ;;  %v2056_v26 = vpop.xlane.xlu0 %2055  ;;  %vm1818_vm4 = vweird.f32 %v4448_v28  ;;  %v1810_v47 = vsel %vm1807_vm5, %v1809_v48, %v1805_v39 }
 0x526   :  { %4451 = vrcp.f32 %v2056_v26  ;;  %v2060_v2 = vsel %vm249_vm2, %v6066_v44, 0.0  ;;  %vm1819_vm8 = vmor %vm1817_vm6, %vm1818_vm4  ;;  %v2149_v53 = vand.u32 2147483648, %v2056_v26  ;;  %v1811_v48 = vmul.f32 %v5909_v3, %v1810_v47 }
 0x527   :  { %v1814_v30 = vsub.f32 1.0, %v1813_v6  ;;  %v2147_v60 = vand.u32 2147483647, %v2056_v26  ;;  %vm2143_vm14 = vweird.f32 %v2056_v26 }
 0x528   :  { %v2150_v39 = vor.u32 1.1754944e-38, %v2149_v53 }
 0x529   :  { %v1815_v27 = vmul.f32 %v4448_v28, %v1814_v30  ;;  %2061 = vadd.xlane.f32.xlu2 %v2060_v2  ;;  %v1901_v8 = vpop.f32.mrf.mxu3  ;;  %v2134_v30 = vand.u32 2147483648, %v6034_v37  ;;  %vm2148_vm3 = vcmp.eq.f32.partialorder %v2147_v60, 8.507059e+37  ;;  %v2731_v60 = vsub.f32 %v5425_v17, %v5657_v31 }
 0x52a   :  { %1917 = vst.msk [vmem:[#allocation2 + $0x58] sm:$0xff] %vm195_vm1, %v1901_v8  ;;  %v2374_v17 = vsub.f32 %v5552_v41, %v5703_v13 }
 0x52b   :  { %v1816_v14 = vadd.f32 %v4448_v28, %v1815_v27  ;;  %v2132_v27 = vand.u32 2147483647, %v6034_v37 }
 0x52c   :  { %v4452_v6 = vpop.eup %4451 }
 0x52d   :  { %v2139_v59 = vmul.f32 %v4452_v6, %v2056_v26  ;;  %v1820_v62 = vsel %vm1819_vm8, %v4448_v28, %v1816_v14  ;;  %v2131_v14 = vsel %vm6087_vm11, %v6054_v18, %v2127_v54  ;;  %vm2144_vm12 = vweird.f32 %v4452_v6 }
 0x52e   :  { %v1825_v45 = vsel %vm1822_vm9, %v1824_v49, %v1820_v62  ;;  %v2135_v28 = vor.u32 1.1754944e-38, %v2134_v30  ;;  %vm2133_vm13 = vcmp.eq.f32.partialorder %v2132_v27, 8.507059e+37  ;;  %vm2145_vm15 = vmor %vm2143_vm14, %vm2144_vm12  ;;  %v7489_v62 = vld [vmem:[#allocation19_spill] sm:$0xff] }
 0x52f   :  { %v2140_v23 = vsub.f32 1.0, %v2139_v59  ;;  %v1826_v55 = vmul.f32 %v5939_v21, %v1825_v45  ;;  %v2373_v30 = vsub.f32 %v7489_v62, %v5640_v5 }
 0x530   :  { %v2136_v49 = vsel %vm2133_vm13, %v2135_v28, %v2131_v14 }
 0x531   :  { %v2141_v46 = vmul.f32 %v4452_v6, %v2140_v23  ;;  %v1859_v37 = vpack.c.bf16 %v1826_v55, %v1811_v48  ;;  %v6098_v47 = vmul.f32 %v5924_v43, %v2136_v49 }
 0x533   :  { %v2142_v2 = vadd.f32 %v4452_v6, %v2141_v46  ;;  %4156 = vmatmul.msk.bf16.gmra.mxu3 %vm249_vm2, %v1859_v37  ;;  %7487 = vst [vmem:[#allocation16_spill] sm:$0xff] %v6098_v47 }
 0x534   :  { %v1317_v48 = vpop.xlane.xlu0 %1316 }
 0x535   :  { %v2146_v3 = vsel %vm2145_vm15, %v4452_v6, %v2142_v2  ;;  %v2381_v6 = vmul.f32 1.442695, %v2373_v30 }
 0x536   :  { %v2151_v21 = vsel %vm2148_vm3, %v2150_v39, %v2146_v3 }
 0x537   :  { %v6101_v18 = vmul.f32 %v5955_v24, %v2151_v21  ;;  %v2732_v24 = vsub.f32 %v5578_v33, %v5751_v35  ;;  %v1325_v33 = vsub.f32 %v5973_v25, %v1317_v48 }
 0x539   :  { %7488 = vst [vmem:[#allocation18_spill] sm:$0xff] %v6101_v18  ;;  %v2741_v5 = vmul.f32 1.442695, %v2732_v24  ;;  %v1340_v2 = vmul.f32 1.442695, %v1325_v33 }
 0x545   :  { %v1305_v59 = vpop.xlane.xlu2 %1304 }
 0x546   :  { %v1321_v26 = vsub.f32 %v5929_v12, %v1305_v59  ;;  %v6115_v12 = vpop.f32.mrf.mxu0  ;;  %v2383_v59 = vmul.f32 1.442695, %v2374_v17 }
 0x547   :  { %v2725_v41 = vsel %vm249_vm2, %v6115_v12, -inf }
 0x548   :  { %v1332_v27 = vmul.f32 1.442695, %v1321_v26 }
 0x54a   :  { %4453 = vpow2.f32 %v1332_v27 }
 0x54b   :  { %4455 = vpow2.f32 %v2381_v6 }
 0x54d   :  { %v1308_v23 = vpop.xlane.xlu2 %1307 }
 0x54e   :  { %v1322_v45 = vsub.f32 %v5943_v40, %v1308_v23  ;;  %v6131_v49 = vpop.f32.mrf.mxu0 }
 0x54f   :  { %v2728_v21 = vsel %vm249_vm2, %v6131_v49, -inf }
 0x550   :  { %v6109_v43 = vpop.eup %4453  ;;  %v1334_v8 = vmul.f32 1.442695, %v1322_v45  ;;  %v6159_v45 = vpop.xlane.xlu1 %2362 }
 0x551   :  { %v1351_v53 = vsel %vm249_vm2, %v6109_v43, 0.0  ;;  %v6117_v14 = vpop.eup %4455 }
 0x552   :  { %4457 = vpow2.f32 %v1334_v8  ;;  %1352 = vadd.xlane.f32.xlu1 %v1351_v53  ;;  %v2397_v28 = vsel %vm249_vm2, %v6117_v14, 0.0  ;;  %v7490_v53 = vld [vmem:[#allocation5_spill] sm:$0xff] }
 0x553   :  { %4459 = vpow2.f32 %v2741_v5 }
 0x555   :  { %v1311_v55 = vpop.xlane.xlu2 %1310 }
 0x556   :  { %v1323_v40 = vsub.f32 %v5957_v51, %v1311_v55  ;;  %v2739_v51 = vmul.f32 1.442695, %v2731_v60  ;;  %v7491_v55 = vld [vmem:[#allocation4_spill] sm:$0xff] }
 0x558   :  { %v6120_v46 = vpop.eup %4457  ;;  %v1336_v35 = vmul.f32 1.442695, %v1323_v40  ;;  %v6163_v5 = vpop.xlane.xlu1 %2723 }
 0x559   :  { %v1354_v37 = vsel %vm249_vm2, %v6120_v46, 0.0  ;;  %v6129_v39 = vpop.eup %4459 }
 0x55a   :  { %4461 = vpow2.f32 %v1336_v35  ;;  %2398 = vadd.xlane.f32.xlu1 %v2397_v28  ;;  %1355 = vadd.xlane.f32.xlu0 %v1354_v37  ;;  %v2758_v3 = vsel %vm249_vm2, %v6129_v39, 0.0 }
 0x55b   :  { %4463 = vpow2.f32 %v1340_v2 }
 0x55c   :  { %4465 = vpow2.f32 %v2739_v51 }
 0x55d   :  { %4467 = vpow2.f32 %v2383_v59  ;;  %v6157_v23 = vpop.xlane.xlu2 %2714 }
 0x560   :  { %v6133_v25 = vpop.eup %4461  ;;  %v6169_v37 = vpop.xlane.xlu1 %2058 }
 0x561   :  { %v1357_v31 = vsel %vm249_vm2, %v6133_v25, 0.0  ;;  %v6143_v26 = vpop.eup %4463 }
 0x562   :  { %1358 = vadd.xlane.f32.xlu2 %v1357_v31  ;;  %2759 = vadd.xlane.f32.xlu1 %v2758_v3  ;;  %v6145_v62 = vpop.eup %4465  ;;  %v1363_v13 = vsel %vm249_vm2, %v6143_v26, 0.0 }
 0x563   :  { %2729 = vmax.xlane.f32.xlu0 %v2728_v21  ;;  %v2755_v30 = vsel %vm249_vm2, %v6145_v62, 0.0  ;;  %v6153_v27 = vpop.eup %4467 }
 0x564   :  { %v2400_v6 = vsel %vm249_vm2, %v6153_v27, 0.0 }
 0x565   :  { %v1314_v24 = vpop.xlane.xlu2 %1313 }
 0x56a   :  { %2726 = vmax.xlane.f32.xlu2 %v2725_v41  ;;  %1364 = vadd.xlane.f32.xlu1 %v1363_v13 }
 0x56b   :  { %2756 = vadd.xlane.f32.xlu0 %v2755_v30 }
 0x572   :  { %2401 = vadd.xlane.f32.xlu2 %v2400_v6 }
 0x57c   :  { %v1344_v8 = vpop.xlane.xlu0 %1343 }
 0x57d   :  { %4469 = vrcp.f32 %v1344_v8  ;;  %v1377_v3 = vand.u32 2147483648, %v1344_v8  ;;  %vm1371_vm5 = vweird.f32 %v1344_v8  ;;  %v1375_v59 = vand.u32 2147483647, %v1344_v8 }
 0x57f   :  { %2909 = vrot.lane.b32.xlu0 %v7490_v53, %s4612_s12  ;;  %vm1376_vm8 = vcmp.eq.f32.partialorder %v1375_v59, 8.507059e+37 }
 0x583   :  { %v4470_v48 = vpop.eup %4469  ;;  %2549 = vrot.lane.b32.xlu1 %v7491_v55, %s4611_s11 }
 0x584   :  { %v1367_v40 = vmul.f32 %v4470_v48, %v1344_v8  ;;  %v1347_v33 = vpop.xlane.xlu2 %1346  ;;  %v6167_v35 = vpop.xlane.xlu0 %2720  ;;  %vm1372_vm4 = vweird.f32 %v4470_v48 }
 0x585   :  { %4471 = vrcp.f32 %v1347_v33  ;;  %vm1373_vm6 = vmor %vm1371_vm5, %vm1372_vm4  ;;  %v1392_v13 = vand.u32 2147483648, %v1347_v33  ;;  %vm1386_vm9 = vweird.f32 %v1347_v33 }
 0x586   :  { %v1368_v60 = vsub.f32 1.0, %v1367_v40  ;;  %4473 = vrcp.f32 %v6169_v37  ;;  %v1378_v40 = vor.u32 1.1754944e-38, %v1377_v3  ;;  %v1324_v3 = vsub.f32 %v5967_v4, %v1314_v24 }
 0x587   :  { %v1393_v8 = vor.u32 1.1754944e-38, %v1392_v13  ;;  %v2375_v13 = vsub.f32 %v5642_v63, %v6004_v0 }
 0x588   :  { %v1369_v28 = vmul.f32 %v4470_v48, %v1368_v60 }
 0x589   :  { %v2385_v24 = vmul.f32 1.442695, %v2375_v13 }
 0x58a   :  { %2551 = vrot.lane.b32.xlu2 %v7490_v53, %s4611_s11  ;;  %v1370_v51 = vadd.f32 %v4470_v48, %v1369_v28  ;;  %v1390_v53 = vand.u32 2147483647, %v1347_v33 }
 0x58b   :  { %v4472_v2 = vpop.eup %4471 }
 0x58c   :  { %v1382_v17 = vmul.f32 %v4472_v2, %v1347_v33  ;;  %v6173_v31 = vpop.xlane.xlu2 %2365  ;;  %v1374_v30 = vsel %vm1373_vm6, %v4470_v48, %v1370_v51  ;;  %vm1387_vm7 = vweird.f32 %v4472_v2  ;;  %v6178_v28 = vpop.eup %4473  ;;  %vm1391_vm11 = vcmp.eq.f32.partialorder %v1390_v53, 8.507059e+37 }
 0x58d   :  { %v1736_v21 = vpop.xlane.xlu0 %1735  ;;  %v1379_v54 = vsel %vm1376_vm8, %v1378_v40, %v1374_v30  ;;  %vm1388_vm10 = vmor %vm1386_vm9, %vm1387_vm7  ;;  %v1338_v53 = vmul.f32 1.442695, %v1324_v3  ;;  %vm2159_vm5 = vweird.f32 %v6178_v28  ;;  %vm2158_vm8 = vweird.f32 %v6169_v37 }
 0x58e   :  { %v1383_v41 = vsub.f32 1.0, %v1382_v17  ;;  %4475 = vrcp.f32 %v1736_v21  ;;  %v1380_v59 = vmul.f32 %v6009_v36, %v1379_v54  ;;  %v1853_v40 = vand.u32 2147483648, %v1736_v21  ;;  %vm6205_vm9 = vmor %vm2158_vm8, %vm2159_vm5 }
 0x58f   :  { %vm1847_vm13 = vweird.f32 %v1736_v21 }
 0x590   :  { %v1384_v6 = vmul.f32 %v4472_v2, %v1383_v41  ;;  %v2154_v41 = vmul.f32 %v6178_v28, %v6169_v37 }
 0x592   :  { %v1385_v60 = vadd.f32 %v4472_v2, %v1384_v6  ;;  %2547 = vrot.lane.b32.xlu2 %v4838_v19, %s4611_s11 }
 0x594   :  { %v4476_v17 = vpop.eup %4475  ;;  %v1389_v47 = vsel %vm1388_vm10, %v4472_v2, %v1385_v60  ;;  %v1733_v18 = vpop.xlane.xlu2 %1732  ;;  %v1851_v60 = vand.u32 2147483647, %v1736_v21 }
 0x595   :  { %v1394_v48 = vsel %vm1391_vm11, %v1393_v8, %v1389_v47  ;;  %v1843_v51 = vmul.f32 %v4476_v17, %v1736_v21  ;;  %4477 = vrcp.f32 %v1733_v18  ;;  %v2155_v47 = vsub.f32 1.0, %v2154_v41 }
 0x596   :  { %v1395_v33 = vmul.f32 %v6020_v7, %v1394_v48  ;;  %vm1848_vm12 = vweird.f32 %v4476_v17  ;;  %vm1852_vm3 = vcmp.eq.f32.partialorder %v1851_v60, 8.507059e+37  ;;  %vm1832_vm4 = vweird.f32 %v1733_v18 }
 0x597   :  { %v1844_v6 = vsub.f32 1.0, %v1843_v51  ;;  %v2156_v0 = vmul.f32 %v6178_v28, %v2155_v47  ;;  %vm6191_vm14 = vmor %vm1847_vm13, %vm1848_vm12  ;;  %v1836_v51 = vand.u32 2147483647, %v1733_v18  ;;  %v2162_v47 = vand.u32 2147483647, %v6169_v37 }
 0x598   :  { %v1486_v30 = vpack.c.bf16 %v1395_v33, %v1380_v59  ;;  %v1854_v59 = vor.u32 1.1754944e-38, %v1853_v40  ;;  %v2734_v33 = vsub.f32 %v5920_v50, %v6030_v15  ;;  %v2164_v50 = vand.u32 2147483648, %v6169_v37 }
 0x599   :  { %v1845_v2 = vmul.f32 %v4476_v17, %v1844_v6  ;;  %v2157_v6 = vadd.f32 %v6178_v28, %v2156_v0  ;;  %vm1837_vm7 = vcmp.eq.f32.partialorder %v1836_v51, 8.507059e+37  ;;  %vm2163_vm11 = vcmp.eq.f32.partialorder %v2162_v47, 8.507059e+37 }
 0x59a   :  { %2905 = vrot.lane.b32.xlu2 %v4838_v19, %s4612_s12  ;;  %4146 = vmatmul.msk.bf16.vlgmr.msrb.gmra.mxu2 %vm249_vm2, %v1486_v30  ;;  %v1838_v19 = vand.u32 2147483648, %v1733_v18  ;;  %v2745_v60 = vmul.f32 1.442695, %v2734_v33 }
 0x59b   :  { %v4478_v4 = vpop.eup %4477  ;;  %v1846_v36 = vadd.f32 %v4476_v17, %v1845_v2 }
 0x59c   :  { %v1828_v7 = vmul.f32 %v4478_v4, %v1733_v18  ;;  %v2062_v54 = vpop.xlane.xlu2 %2061  ;;  %vm1833_vm15 = vweird.f32 %v4478_v4  ;;  %v1839_v30 = vor.u32 1.1754944e-38, %v1838_v19 }
 0x59d   :  { %4479 = vrcp.f32 %v2062_v54  ;;  %v1850_v3 = vsel %vm6191_vm14, %v4476_v17, %v1846_v36  ;;  %vm1834_vm6 = vmor %vm1832_vm4, %vm1833_vm15  ;;  %v2177_v19 = vand.u32 2147483647, %v2062_v54  ;;  %vm2173_vm12 = vweird.f32 %v2062_v54 }
 0x59e   :  { %4481 = vpow2.f32 %v1338_v53  ;;  %v1829_v63 = vsub.f32 1.0, %v1828_v7  ;;  %v1855_v13 = vsel %vm1852_vm3, %v1854_v59, %v1850_v3 }
 0x59f   :  { %4483 = vpow2.f32 %v2385_v24  ;;  %v1856_v24 = vmul.f32 %v6036_v38, %v1855_v13  ;;  %vm2178_vm14 = vcmp.eq.f32.partialorder %v2177_v19, 8.507059e+37 }
 0x5a0   :  { %v1830_v48 = vmul.f32 %v4478_v4, %v1829_v63  ;;  %v2179_v63 = vand.u32 2147483648, %v2062_v54  ;;  %4485 = vpow2.f32 %v2745_v60 }
 0x5a2   :  { %v1831_v21 = vadd.f32 %v4478_v4, %v1830_v48  ;;  %v2165_v48 = vor.u32 1.1754944e-38, %v2164_v50  ;;  %v2180_v38 = vor.u32 1.1754944e-38, %v2179_v63 }
 0x5a3   :  { %v4480_v41 = vpop.eup %4479 }
 0x5a4   :  { %v6201_v2 = vpop.eup %4481  ;;  %v2169_v17 = vmul.f32 %v4480_v41, %v2062_v54  ;;  %v1835_v53 = vsel %vm1834_vm6, %v4478_v4, %v1831_v21  ;;  %v2161_v4 = vsel %vm6205_vm9, %v6178_v28, %v2157_v6  ;;  %vm2174_vm10 = vweird.f32 %v4480_v41 }
 0x5a5   :  { %v1840_v15 = vsel %vm1837_vm7, %v1839_v30, %v1835_v53  ;;  %v6212_v40 = vpop.eup %4483  ;;  %v1360_v0 = vsel %vm249_vm2, %v6201_v2, 0.0  ;;  %vm2175_vm13 = vmor %vm2173_vm12, %vm2174_vm10  ;;  %v2166_v51 = vsel %vm2163_vm11, %v2165_v48, %v2161_v4  ;;  %v2372_v30 = vpop.xlane.xlu1 %2371 }
 0x5a6   :  { %v2170_v36 = vsub.f32 1.0, %v2169_v17  ;;  %v1841_v7 = vmul.f32 %v6052_v58, %v1840_v15  ;;  %v2403_v3 = vsel %vm249_vm2, %v6212_v40, 0.0  ;;  %v6223_v33 = vmul.f32 %v5965_v1, %v2166_v51  ;;  %v6230_v6 = vpop.eup %4485 }
 0x5a7   :  { %v2764_v13 = vsel %vm249_vm2, %v6230_v6, 0.0  ;;  %v2377_v1 = vsub.f32 %v5926_v56, %v6159_v45  ;;  %v2378_v15 = vsub.f32 %v5947_v61, %v6173_v31  ;;  %v2380_v4 = vsub.f32 %v5971_v10, %v2372_v30 }
 0x5a8   :  { %v2171_v8 = vmul.f32 %v4480_v41, %v2170_v36  ;;  %v1860_v37 = vpack.c.bf16 %v1856_v24, %v1841_v7  ;;  %v6252_v36 = vpop.xlane.xlu0 %2368  ;;  %v2736_v24 = vsub.f32 %v5953_v16, %v6163_v5 }
 0x5a9   :  { %1361 = vadd.xlane.f32.xlu0 %v1360_v0  ;;  %v2389_v50 = vmul.f32 1.442695, %v2377_v1  ;;  %v2391_v45 = vmul.f32 1.442695, %v2378_v15  ;;  %v2395_v48 = vmul.f32 1.442695, %v2380_v4 }
 0x5aa   :  { %v2172_v58 = vadd.f32 %v4480_v41, %v2171_v8  ;;  %4157 = vmatmul.msk.bf16.gmra.mxu3 %vm249_vm2, %v1860_v37  ;;  %v2749_v63 = vmul.f32 1.442695, %v2736_v24 }
 0x5ac   :  { %v2176_v28 = vsel %vm2175_vm13, %v4480_v41, %v2172_v58  ;;  %v2733_v41 = vsub.f32 %v5887_v11, %v6157_v23 }
 0x5ad   :  { %2404 = vadd.xlane.f32.xlu1 %v2403_v3  ;;  %v2181_v59 = vsel %vm2178_vm14, %v2180_v38, %v2176_v28  ;;  %v2376_v38 = vsub.f32 %v5884_v52, %v6006_v22 }
 0x5ae   :  { %v6226_v21 = vmul.f32 %v6066_v44, %v2181_v59  ;;  %v2743_v17 = vmul.f32 1.442695, %v2733_v41  ;;  %v6239_v44 = vpop.xlane.xlu1 %1349 }
 0x5af   :  { %v1407_v51 = vand.u32 2147483648, %v6239_v44  ;;  %vm1401_vm3 = vweird.f32 %v6239_v44  ;;  %v1405_v3 = vand.u32 2147483647, %v6239_v44 }
 0x5b0   :  { %v2186_v54 = vpack.c.bf16 %v6226_v21, %v6223_v33  ;;  %4487 = vpow2.f32 %v2743_v17 }
 0x5b1   :  { %4489 = vrcp.f32 %v6239_v44  ;;  %vm1406_vm8 = vcmp.eq.f32.partialorder %v1405_v3, 8.507059e+37 }
 0x5b2   :  { %4491 = vpow2.f32 %v2389_v50 }
 0x5b5   :  { %2765 = vadd.xlane.f32.xlu1 %v2764_v13 }
 0x5b6   :  { %v1904_v53 = vpop.f32.mrf.mxu3  ;;  %v6244_v11 = vpop.eup %4487 }
 0x5b7   :  { %1918 = vst.msk [vmem:[#allocation2 + $0x60] sm:$0xff] %vm195_vm1, %v1904_v53  ;;  %v4490_v18 = vpop.eup %4489  ;;  %v2761_v56 = vsel %vm249_vm2, %v6244_v11, 0.0 }
 0x5b8   :  { %v1397_v47 = vmul.f32 %v4490_v18, %v6239_v44  ;;  %v6254_v7 = vpop.eup %4491  ;;  %vm1402_vm15 = vweird.f32 %v4490_v18  ;;  %v1408_v44 = vor.u32 1.1754944e-38, %v1407_v51 }
 0x5b9   :  { %v2409_v61 = vsel %vm249_vm2, %v6254_v7, 0.0  ;;  %vm6279_vm5 = vmor %vm1401_vm3, %vm1402_vm15 }
 0x5ba   :  { %v1398_v60 = vsub.f32 1.0, %v1397_v47 }
 0x5bc   :  { %v1399_v0 = vmul.f32 %v4490_v18, %v1398_v60 }
 0x5bd   :  { %2907 = vrot.lane.b32.xlu0 %v7491_v55, %s4612_s12 }
 0x5be   :  { %v1906_v23 = vpop.f32.mrf.mxu3  ;;  %v1400_v58 = vadd.f32 %v4490_v18, %v1399_v0 }
 0x5bf   :  { %1919 = vst.msk [vmem:[#allocation2 + $0x68] sm:$0xff] %vm195_vm1, %v1906_v23 }
 0x5c0   :  { %v1404_v22 = vsel %vm6279_vm5, %v4490_v18, %v1400_v58  ;;  %v2387_v18 = vmul.f32 1.442695, %v2376_v38  ;;  %v2379_v38 = vsub.f32 %v5963_v32, %v6252_v36 }
 0x5c3   :  { %2762 = vadd.xlane.f32.xlu2 %v2761_v56 }
 0x5c5   :  { %v1353_v55 = vpop.xlane.xlu1 %1352 }
 0x5c6   :  { %4493 = vrcp.f32 %v1353_v55  ;;  %v1422_v52 = vand.u32 2147483648, %v1353_v55  ;;  %vm1416_vm6 = vweird.f32 %v1353_v55  ;;  %v1420_v13 = vand.u32 2147483647, %v1353_v55 }
 0x5c7   :  { %4495 = vpow2.f32 %v2391_v45 }
 0x5c8   :  { %v1423_v45 = vor.u32 1.1754944e-38, %v1422_v52  ;;  %vm1421_vm9 = vcmp.eq.f32.partialorder %v1420_v13, 8.507059e+37 }
 0x5cb   :  { %2410 = vadd.xlane.f32.xlu2 %v2409_v61 }
 0x5cc   :  { %v4494_v31 = vpop.eup %4493 }
 0x5cd   :  { %v1412_v8 = vmul.f32 %v4494_v31, %v1353_v55  ;;  %v6261_v19 = vpop.xlane.xlu0 %1355  ;;  %v6263_v37 = vpop.xlane.xlu1 %2398  ;;  %vm1417_vm4 = vweird.f32 %v4494_v31  ;;  %v1409_v55 = vsel %vm1406_vm8, %v1408_v44, %v1404_v22 }
 0x5ce   :  { %4497 = vrcp.f32 %v6261_v19  ;;  %2903 = vrot.lane.b32.xlu1 %v4818_v9, %s4612_s12  ;;  %v6268_v16 = vpop.eup %4495  ;;  %vm6291_vm7 = vmor %vm1416_vm6, %vm1417_vm4  ;;  %v1410_v4 = vmul.f32 %v6038_v57, %v1409_v55  ;;  %vm1431_vm10 = vweird.f32 %v6261_v19  ;;  %v2393_v55 = vmul.f32 1.442695, %v2379_v38 }
 0x5cf   :  { %v1413_v5 = vsub.f32 1.0, %v1412_v8  ;;  %4499 = vpow2.f32 %v2749_v63  ;;  %v2412_v28 = vsel %vm249_vm2, %v6268_v16, 0.0 }
 0x5d0   :  { %4501 = vpow2.f32 %v2395_v48 }
 0x5d1   :  { %v1414_v10 = vmul.f32 %v4494_v31, %v1413_v5 }
 0x5d3   :  { %v1415_v59 = vadd.f32 %v4494_v31, %v1414_v10  ;;  %2413 = vadd.xlane.f32.xlu2 %v2412_v28  ;;  %v1437_v28 = vand.u32 2147483648, %v6261_v19 }
 0x5d4   :  { %v6277_v30 = vpop.eup %4497 }
 0x5d5   :  { %v1427_v17 = vmul.f32 %v6277_v30, %v6261_v19  ;;  %v6287_v53 = vpop.xlane.xlu2 %1358  ;;  %v6289_v1 = vpop.xlane.xlu1 %2759  ;;  %v1419_v56 = vsel %vm6291_vm7, %v4494_v31, %v1415_v59  ;;  %vm1432_vm11 = vweird.f32 %v6277_v30 }
 0x5d6   :  { %4503 = vrcp.f32 %v6287_v53  ;;  %v2730_v23 = vpop.xlane.xlu0 %2729  ;;  %v6296_v15 = vpop.eup %4499  ;;  %v1424_v61 = vsel %vm1421_vm9, %v1423_v45, %v1419_v56  ;;  %v1450_v44 = vand.u32 2147483647, %v6287_v53  ;;  %v1452_v50 = vand.u32 2147483648, %v6287_v53  ;;  %vm6341_vm13 = vmor %vm1431_vm10, %vm1432_vm11 }
 0x5d7   :  { %4505 = vrcp.f32 %v6263_v37  ;;  %v1428_v47 = vsub.f32 1.0, %v1427_v17  ;;  %v6302_v24 = vpop.eup %4501  ;;  %v2770_v60 = vsel %vm249_vm2, %v6296_v15, 0.0  ;;  %v1425_v31 = vmul.f32 %v6109_v43, %v1424_v61 }
 0x5d8   :  { %4507 = vrcp.f32 %v6289_v1  ;;  %v2418_v43 = vsel %vm249_vm2, %v6302_v24, 0.0  ;;  %v2738_v22 = vsub.f32 %v6131_v49, %v2730_v23  ;;  %v1435_v17 = vand.u32 2147483647, %v6261_v19 }
 0x5d9   :  { %4509 = vpow2.f32 %v2387_v18  ;;  %v1429_v0 = vmul.f32 %v6277_v30, %v1428_v47  ;;  %v1487_v48 = vpack.c.bf16 %v1425_v31, %v1410_v4  ;;  %vm1446_vm14 = vweird.f32 %v6287_v53 }
 0x5da   :  { %v2753_v61 = vmul.f32 1.442695, %v2738_v22  ;;  %vm1436_vm3 = vcmp.eq.f32.partialorder %v1435_v17, 8.507059e+37  ;;  %vm1451_vm4 = vcmp.eq.f32.partialorder %v1450_v44, 8.507059e+37  ;;  %vm2799_vm6 = vweird.f32 %v6289_v1 }
 0x5db   :  { %2771 = vadd.xlane.f32.xlu2 %v2770_v60  ;;  %4147 = vmatmul.msk.bf16.gmra.mxu2 %vm249_vm2, %v1487_v48  ;;  %v1430_v32 = vadd.f32 %v6277_v30, %v1429_v0  ;;  %v1438_v60 = vor.u32 1.1754944e-38, %v1437_v28  ;;  %v2805_v38 = vand.u32 2147483648, %v6289_v1  ;;  %v2430_v47 = vand.u32 2147483647, %v6263_v37 }
 0x5dc   :  { %v4504_v63 = vpop.eup %4503 }
 0x5dd   :  { %v6309_v8 = vpop.eup %4505  ;;  %v1442_v5 = vmul.f32 %v4504_v63, %v6287_v53  ;;  %v2727_v58 = vpop.xlane.xlu2 %2726  ;;  %vm1447_vm12 = vweird.f32 %v4504_v63  ;;  %v1434_v23 = vsel %vm6341_vm13, %v6277_v30, %v1430_v32  ;;  %v1453_v30 = vor.u32 1.1754944e-38, %v1452_v50 }
 0x5de   :  { %v6312_v10 = vpop.eup %4507  ;;  %v2737_v57 = vsub.f32 %v6115_v12, %v2727_v58  ;;  %v6318_v51 = vpop.xlane.xlu0 %2756  ;;  %v2422_v12 = vmul.f32 %v6309_v8, %v6263_v37  ;;  %vm6350_vm15 = vmor %vm1446_vm14, %vm1447_vm12  ;;  %v1439_v48 = vsel %vm1436_vm3, %v1438_v60, %v1434_v23  ;;  %vm2427_vm9 = vweird.f32 %v6309_v8 }
 0x5df   :  { %v1443_v3 = vsub.f32 1.0, %v1442_v5  ;;  %v2795_v59 = vmul.f32 %v6312_v10, %v6289_v1  ;;  %4511 = vrcp.f32 %v6318_v51  ;;  %v6331_v41 = vpop.eup %4509  ;;  %vm2800_vm5 = vweird.f32 %v6312_v10 }
 0x5e0   :  { %v2751_v36 = vmul.f32 1.442695, %v2737_v57  ;;  %v2423_v45 = vsub.f32 1.0, %v2422_v12  ;;  %v2406_v19 = vsel %vm249_vm2, %v6331_v41, 0.0  ;;  %vm6372_vm7 = vmor %vm2799_vm6, %vm2800_vm5  ;;  %v2790_v32 = vand.u32 2147483648, %v6318_v51 }
 0x5e1   :  { %v1444_v52 = vmul.f32 %v4504_v63, %v1443_v3  ;;  %v2796_v13 = vsub.f32 1.0, %v2795_v59  ;;  %v1440_v12 = vmul.f32 %v6120_v46, %v1439_v48  ;;  %v2788_v22 = vand.u32 2147483647, %v6318_v51 }
 0x5e2   :  { %4513 = vpow2.f32 %v2751_v36  ;;  %v2806_v44 = vor.u32 1.1754944e-38, %v2805_v38  ;;  %vm2784_vm11 = vweird.f32 %v6318_v51  ;;  %vm2426_vm12 = vweird.f32 %v6263_v37 }
 0x5e3   :  { %v1445_v56 = vadd.f32 %v4504_v63, %v1444_v52  ;;  %v2797_v49 = vmul.f32 %v6312_v10, %v2796_v13  ;;  %2419 = vadd.xlane.f32.xlu2 %v2418_v43  ;;  %v2803_v43 = vand.u32 2147483647, %v6289_v1  ;;  %v2791_v23 = vor.u32 1.1754944e-38, %v2790_v32  ;;  %vm6396_vm14 = vmor %vm2426_vm12, %vm2427_vm9 }
 0x5e5   :  { %v1449_v53 = vsel %vm6350_vm15, %v4504_v63, %v1445_v56  ;;  %v6358_v4 = vpop.xlane.xlu2 %2401  ;;  %v4512_v31 = vpop.eup %4511  ;;  %v2798_v0 = vadd.f32 %v6312_v10, %v2797_v49  ;;  %v2424_v63 = vmul.f32 %v6309_v8, %v2423_v45  ;;  %vm2804_vm10 = vcmp.eq.f32.partialorder %v2803_v43, 8.507059e+37 }
 0x5e6   :  { %4515 = vrcp.f32 %v6358_v4  ;;  %v2780_v5 = vmul.f32 %v4512_v31, %v6318_v51  ;;  %v1454_v57 = vsel %vm1451_vm4, %v1453_v30, %v1449_v53  ;;  %vm2785_vm8 = vweird.f32 %v4512_v31 }
 0x5e7   :  { %2407 = vadd.xlane.f32.xlu0 %v2406_v19  ;;  %4517 = vpow2.f32 %v2753_v61  ;;  %v1455_v36 = vmul.f32 %v6133_v25, %v1454_v57  ;;  %v2802_v52 = vsel %vm6372_vm7, %v6312_v10, %v2798_v0  ;;  %v2425_v17 = vadd.f32 %v6309_v8, %v2424_v63  ;;  %v6386_v25 = vpop.xlane.xlu1 %1364  ;;  %vm2786_vm13 = vmor %vm2784_vm11, %vm2785_vm8 }
 0x5e8   :  { %v6364_v58 = vpop.eup %4513  ;;  %v2781_v28 = vsub.f32 1.0, %v2780_v5  ;;  %4519 = vpow2.f32 %v2393_v55  ;;  %v2432_v56 = vand.u32 2147483648, %v6263_v37  ;;  %v2807_v49 = vsel %vm2804_vm10, %v2806_v44, %v2802_v52 }
 0x5e9   :  { %v2773_v3 = vsel %vm249_vm2, %v6364_v58, 0.0  ;;  %v1488_v50 = vpack.c.bf16 %v1455_v36, %v1440_v12  ;;  %vm2789_vm15 = vcmp.eq.f32.partialorder %v2788_v22, 8.507059e+37  ;;  %v2429_v53 = vsel %vm6396_vm14, %v6309_v8, %v2425_v17 }
 0x5ea   :  { %v2782_v1 = vmul.f32 %v4512_v31, %v2781_v28  ;;  %v2445_v30 = vand.u32 2147483647, %v6358_v4  ;;  %v2447_v0 = vand.u32 2147483648, %v6358_v4  ;;  %v6410_v5 = vmul.f32 %v6129_v39, %v2807_v49 }
 0x5eb   :  { %2774 = vadd.xlane.f32.xlu2 %v2773_v3  ;;  %4148 = vmatmul.msk.bf16.gmra.mxu2 %vm249_vm2, %v1488_v50  ;;  %v2433_v63 = vor.u32 1.1754944e-38, %v2432_v56  ;;  %vm2431_vm4 = vcmp.eq.f32.partialorder %v2430_v47, 8.507059e+37  ;;  %vm2441_vm5 = vweird.f32 %v6358_v4  ;;  %4521 = vrcp.f32 %v6386_v25 }
 0x5ec   :  { %v4516_v13 = vpop.eup %4515  ;;  %v2783_v46 = vadd.f32 %v4512_v31, %v2782_v1  ;;  %vm2446_vm7 = vcmp.eq.f32.partialorder %v2445_v30, 8.507059e+37  ;;  %v7508_v1 = vld [vmem:[#allocation12_spill] sm:$0xff]  ;;  %vm1476_vm9 = vweird.f32 %v6386_v25 }
 0x5ed   :  { %v2437_v10 = vmul.f32 %v4516_v13, %v6358_v4  ;;  %v2552_v18 = vpop.permute.xlu2 %2551  ;;  %v6392_v45 = vpop.eup %4517  ;;  %vm2442_vm3 = vweird.f32 %v4516_v13  ;;  %v2434_v39 = vsel %vm2431_vm4, %v2433_v63, %v2429_v53  ;;  %v7509_v63 = vld [vmem:[#allocation7_spill] sm:$0xff] }
 0x5ee   :  { %2573 = vmatpush.bf16.msrb.mxu3 %v2552_v18  ;;  %v2787_v19 = vsel %vm2786_vm13, %v4512_v31, %v2783_v46  ;;  %v6402_v60 = vpop.eup %4519  ;;  %v2776_v38 = vsel %vm249_vm2, %v6392_v45, 0.0  ;;  %vm2443_vm6 = vmor %vm2441_vm5, %vm2442_vm3  ;;  %v6421_v59 = vmul.f32 %v6117_v14, %v2434_v39  ;;  %v2735_v14 = vsub.f32 %v5937_v42, %v6167_v35 }
 0x5ef   :  { %v2438_v55 = vsub.f32 1.0, %v2437_v10  ;;  %v2792_v61 = vsel %vm2789_vm15, %v2791_v23, %v2787_v19  ;;  %v2415_v12 = vsel %vm249_vm2, %v6402_v60, 0.0  ;;  %v1482_v46 = vand.u32 2147483648, %v6386_v25 }
 0x5f0   :  { %v6413_v37 = vmul.f32 %v6145_v62, %v2792_v61  ;;  %v2448_v62 = vor.u32 1.1754944e-38, %v2447_v0  ;;  %v2747_v52 = vmul.f32 1.442695, %v2735_v14  ;;  %v1480_v18 = vand.u32 2147483647, %v6386_v25  ;;  %v7510_v14 = vld [vmem:[#allocation9_spill] sm:$0xff] }
 0x5f1   :  { %v2439_v31 = vmul.f32 %v4516_v13, %v2438_v55  ;;  %v2910_v48 = vpop.permute.xlu0 %2909  ;;  %v1483_v55 = vor.u32 1.1754944e-38, %v1482_v46  ;;  %v7514_v46 = vld [vmem:[#allocation3_spill] sm:$0xff] }
 0x5f2   :  { %2931 = vmatpush.bf16.msrb.mxu2 %v2910_v48  ;;  %v2899_v8 = vpack.c.bf16 %v6410_v5, %v6413_v37  ;;  %4523 = vpow2.f32 %v2747_v52  ;;  %vm1481_vm12 = vcmp.eq.f32.partialorder %v1480_v18, 8.507059e+37 }
 0x5f3   :  { %v2440_v57 = vadd.f32 %v4516_v13, %v2439_v31  ;;  %2777 = vadd.xlane.f32.xlu2 %v2776_v38 }
 0x5f5   :  { %v2444_v43 = vsel %vm2443_vm6, %v4516_v13, %v2440_v57  ;;  %v2550_v28 = vpop.permute.xlu1 %2549  ;;  %v2548_v36 = vpop.permute.xlu2 %2547 }
 0x5f6   :  { %v2449_v3 = vsel %vm2446_vm7, %v2448_v62, %v2444_v43  ;;  %2574 = vmatpush.bf16.msrb.mxu3 %v2550_v28 }
 0x5f7   :  { %v6424_v32 = vmul.f32 %v6153_v27, %v2449_v3  ;;  %v4522_v27 = vpop.eup %4521 }
 0x5f8   :  { %2416 = vadd.xlane.f32.xlu1 %v2415_v12  ;;  %v6448_v42 = vpop.eup %4523  ;;  %vm1477_vm8 = vweird.f32 %v4522_v27 }
 0x5f9   :  { %v2541_v4 = vpack.c.bf16 %v6424_v32, %v6421_v59  ;;  %v2767_v50 = vsel %vm249_vm2, %v6448_v42, 0.0  ;;  %vm1478_vm10 = vmor %vm1476_vm9, %vm1477_vm8 }
 0x5fa   :  { %2575 = vmatpush.bf16.msrb.mxu3 %v2548_v36 }
 0x5fb   :  { %2545 = vrot.lane.b32.xlu0 %v4818_v9, %s4611_s11  ;;  %v1472_v9 = vmul.f32 %v4522_v27, %v6386_v25 }
 0x5fd   :  { %v2906_v48 = vpop.permute.xlu2 %2905 }
 0x60b   :  { %833 = vrot.lane.b32.xlu2 %v5677_v20, %s4613_s13  ;;  %v1473_v20 = vsub.f32 1.0, %v1472_v9 }
 0x611   :  { %1192 = vrot.lane.b32.xlu1 %v5981_v34, %s4614_s14  ;;  %v1474_v34 = vmul.f32 %v4522_v27, %v1473_v20 }
 0x613   :  { %1194 = vrot.lane.b32.xlu2 %v5985_v29, %s4614_s14  ;;  %v1475_v29 = vadd.f32 %v4522_v27, %v1474_v34 }
 0x615   :  { %v1479_v23 = vsel %vm1478_vm10, %v4522_v27, %v1475_v29 }
 0x616   :  { %v1484_v30 = vsel %vm1481_vm12, %v1483_v55, %v1479_v23 }
 0x617   :  { %v1485_v57 = vmul.f32 %v6143_v26, %v1484_v30 }
 0x619   :  { %1196 = vrot.lane.b32.xlu1 %v7508_v1, %s4614_s14 }
 0x61c   :  { %v1362_v22 = vpop.xlane.xlu0 %1361 }
 0x61d   :  { %4525 = vrcp.f32 %v1362_v22  ;;  %v6444_v13 = vpop.f32.mrf.mxu2  ;;  %v1467_v49 = vand.u32 2147483648, %v1362_v22  ;;  %v1465_v47 = vand.u32 2147483647, %v1362_v22  ;;  %vm1461_vm13 = vweird.f32 %v1362_v22 }
 0x61f   :  { %v1468_v61 = vor.u32 1.1754944e-38, %v1467_v49  ;;  %vm1466_vm15 = vcmp.eq.f32.partialorder %v1465_v47, 8.507059e+37 }
 0x620   :  { %v6446_v17 = vpop.xlane.xlu1 %2404 }
 0x623   :  { %v4526_v35 = vpop.eup %4525 }
 0x624   :  { %v1457_v44 = vmul.f32 %v4526_v35, %v1362_v22  ;;  %vm1462_vm11 = vweird.f32 %v4526_v35 }
 0x625   :  { %2768 = vadd.xlane.f32.xlu0 %v2767_v50  ;;  %v1525_v10 = vpop.f32.mrf.mxu2  ;;  %vm1463_vm14 = vmor %vm1461_vm13, %vm1462_vm11  ;;  %v7513_v50 = vld [vmem:[#allocation6_spill] sm:$0xff] }
 0x626   :  { %v1458_v56 = vsub.f32 1.0, %v1457_v44  ;;  %1553 = vrot.lane.b32.xlu2 %v1525_v10, %s4615_s15  ;;  %v7515_v10 = vpack.c.bf16 %v7513_v50, %v7514_v46 }
 0x628   :  { %v1459_v51 = vmul.f32 %v4526_v35, %v1458_v56  ;;  %v2766_v19 = vpop.xlane.xlu1 %2765 }
 0x629   :  { %4527 = vrcp.f32 %v2766_v19  ;;  %v2835_v1 = vand.u32 2147483648, %v2766_v19  ;;  %vm2829_vm4 = vweird.f32 %v2766_v19  ;;  %v2833_v34 = vand.u32 2147483647, %v2766_v19 }
 0x62a   :  { %v1460_v53 = vadd.f32 %v4526_v35, %v1459_v51 }
 0x62b   :  { %v2836_v49 = vor.u32 1.1754944e-38, %v2835_v1  ;;  %vm2834_vm7 = vcmp.eq.f32.partialorder %v2833_v34, 8.507059e+37 }
 0x62c   :  { %v1464_v25 = vsel %vm1463_vm14, %v4526_v35, %v1460_v53 }
 0x62d   :  { %v1909_v0 = vpop.f32.mrf.mxu3  ;;  %v1469_v31 = vsel %vm1466_vm15, %v1468_v61, %v1464_v25  ;;  %v7516_v25 = vld [vmem:[#allocation10_spill] sm:$0xff] }
 0x62e   :  { %1920 = vst.msk [vmem:[#allocation2 + $0x70] sm:$0xff] %vm195_vm1, %v1909_v0  ;;  %839 = vrot.lane.b32.xlu2 %v7509_v63, %s4613_s13  ;;  %v1470_v38 = vmul.f32 %v6201_v2, %v1469_v31 }
 0x62f   :  { %v2908_v39 = vpop.permute.xlu0 %2907  ;;  %v4528_v62 = vpop.eup %4527 }
 0x630   :  { %2932 = vmatpush.bf16.msrb.mxu2 %v2908_v39  ;;  %v1489_v43 = vpack.c.bf16 %v1485_v57, %v1470_v38  ;;  %v2825_v28 = vmul.f32 %v4528_v62, %v2766_v19  ;;  %vm2830_vm3 = vweird.f32 %v4528_v62 }
 0x632   :  { %4149 = vmatmul.msk.bf16.gmra.mxu2 %vm249_vm2, %v1489_v43  ;;  %v2826_v36 = vsub.f32 1.0, %v2825_v28 }
 0x634   :  { %2933 = vmatpush.bf16.msrb.mxu2 %v2906_v48  ;;  %v2827_v2 = vmul.f32 %v4528_v62, %v2826_v36  ;;  %v7518_v36 = vld [vmem:[#allocation24_spill] sm:$0xff] }
 0x635   :  { %v1911_v3 = vpop.f32.mrf.mxu3 }
 0x636   :  { %1921 = vst.msk [vmem:[#allocation2 + $0x78] sm:$0xff] %vm195_vm1, %v1911_v3  ;;  %v2763_v12 = vpop.xlane.xlu2 %2762  ;;  %v2828_v9 = vadd.f32 %v4528_v62, %v2827_v2  ;;  %vm6467_vm1 = vmor %vm2829_vm4, %vm2830_vm3  ;;  %v7517_v3 = vld [vmem:[#allocation11_spill] sm:$0xff] }
 0x637   :  { %4529 = vrcp.f32 %v2763_v12  ;;  %v2820_v44 = vand.u32 2147483648, %v2763_v12  ;;  %v2818_v56 = vand.u32 2147483647, %v2763_v12  ;;  %vm2814_vm6 = vweird.f32 %v2763_v12 }
 0x638   :  { %v2832_v18 = vsel %vm6467_vm1, %v4528_v62, %v2828_v9  ;;  %vm857_vm1 = vcmask 130112  }
 0x639   :  { %835 = vrot.lane.b32.xlu0 %v7510_v14, %s4613_s13  ;;  %v2821_v47 = vor.u32 1.1754944e-38, %v2820_v44  ;;  %v2837_v53 = vsel %vm2834_vm7, %v2836_v49, %v2832_v18  ;;  %vm2819_vm9 = vcmp.eq.f32.partialorder %v2818_v56, 8.507059e+37  ;;  %v7519_v14 = vld [vmem:[#allocation23_spill] sm:$0xff]  ;;  %v7522_v56 = vld [vmem:[#allocation13_spill] sm:$0xff] }
 0x63a   :  { %v6483_v31 = vmul.f32 %v6230_v6, %v2837_v53  ;;  %v7520_v2 = vpack.c.bf16 %v7518_v36, %v7519_v14 }
 0x63d   :  { %v4530_v27 = vpop.eup %4529 }
 0x63e   :  { %v2810_v26 = vmul.f32 %v4530_v27, %v2763_v12  ;;  %v2411_v52 = vpop.xlane.xlu2 %2410  ;;  %vm2815_vm5 = vweird.f32 %v4530_v27 }
 0x63f   :  { %4531 = vrcp.f32 %v2411_v52  ;;  %vm2816_vm8 = vmor %vm2814_vm6, %vm2815_vm5  ;;  %vm2486_vm11 = vweird.f32 %v2411_v52  ;;  %v2492_v28 = vand.u32 2147483648, %v2411_v52  ;;  %vm2456_vm6 = vweird.f32 %v6446_v17 }
 0x640   :  { %v2811_v20 = vsub.f32 1.0, %v2810_v26  ;;  %v2904_v22 = vpop.permute.xlu1 %2903 }
 0x641   :  { %1551 = vrot.lane.b32.xlu0 %v6444_v13, %s4615_s15  ;;  %2934 = vmatpush.bf16.msrb.mxu2 %v2904_v22  ;;  %v2493_v1 = vor.u32 1.1754944e-38, %v2492_v28 }
 0x642   :  { %v2812_v29 = vmul.f32 %v4530_v27, %v2811_v20  ;;  %4162 = vmatmul.msk.bf16.vlgmr.msra.gmra.mxu2 %vm249_vm2, %v7515_v10 }
 0x644   :  { %v2813_v23 = vadd.f32 %v4530_v27, %v2812_v29  ;;  %v7521_v29 = vld [vmem:[#allocation8_spill] sm:$0xff] }
 0x645   :  { %v4532_v13 = vpop.eup %4531 }
 0x646   :  { %v2817_v51 = vsel %vm2816_vm8, %v4530_v27, %v2813_v23  ;;  %v2482_v19 = vmul.f32 %v4532_v13, %v2411_v52  ;;  %v2414_v55 = vpop.xlane.xlu2 %2413  ;;  %vm2487_vm10 = vweird.f32 %v4532_v13  ;;  %v7523_v23 = vld [vmem:[#allocation18_spill] sm:$0xff] }
 0x647   :  { %4533 = vrcp.f32 %v2414_v55  ;;  %v2822_v30 = vsel %vm2819_vm9, %v2821_v47, %v2817_v51  ;;  %v2507_v6 = vand.u32 2147483648, %v2414_v55  ;;  %vm2488_vm13 = vmor %vm2486_vm11, %vm2487_vm10  ;;  %v2505_v27 = vand.u32 2147483647, %v2414_v55 }
 0x648   :  { %v2483_v61 = vsub.f32 1.0, %v2482_v19  ;;  %v6480_v0 = vmul.f32 %v6244_v11, %v2822_v30  ;;  %v2490_v11 = vand.u32 2147483647, %v2411_v52  ;;  %vm2501_vm14 = vweird.f32 %v2414_v55 }
 0x649   :  { %837 = vrot.lane.b32.xlu0 %v7516_v25, %s4613_s13  ;;  %v2508_v22 = vor.u32 1.1754944e-38, %v2507_v6  ;;  %vm2506_vm4 = vcmp.eq.f32.partialorder %v2505_v27, 8.507059e+37 }
 0x64a   :  { %v2900_v48 = vpack.c.bf16 %v6483_v31, %v6480_v0  ;;  %v2484_v63 = vmul.f32 %v4532_v13, %v2483_v61  ;;  %vm2491_vm3 = vcmp.eq.f32.partialorder %v2490_v11, 8.507059e+37  ;;  %v4265_v0 = vld [vmem:[%s7388_s3 + $0x8] sm:$0xff] }
 0x64b   :  { %3070 = vmatpush.bf16.msra.mxu1 %v4265_v0 }
 0x64c   :  { %v2485_v62 = vadd.f32 %v4532_v13, %v2484_v63  ;;  %v7526_v63 = vld [vmem:[#allocation22_spill] sm:$0xff] }
 0x64d   :  { %v4534_v38 = vpop.eup %4533 }
 0x64e   :  { %v2497_v57 = vmul.f32 %v4534_v38, %v2414_v55  ;;  %v6487_v39 = vpop.xlane.xlu2 %2771  ;;  %vm2502_vm12 = vweird.f32 %v4534_v38  ;;  %v2489_v26 = vsel %vm2488_vm13, %v4532_v13, %v2485_v62  ;;  %v7524_v13 = vld [vmem:[#allocation16_spill] sm:$0xff] }
 0x64f   :  { %vm2503_vm15 = vmor %vm2501_vm14, %vm2502_vm12  ;;  %v2494_v52 = vsel %vm2491_vm3, %v2493_v1, %v2489_v26  ;;  %v7525_v51 = vpack.c.bf16 %v7523_v23, %v7524_v13  ;;  %v2462_v23 = vand.u32 2147483648, %v6446_v17 }
 0x650   :  { %v2498_v43 = vsub.f32 1.0, %v2497_v57  ;;  %v6505_v46 = vmul.f32 %v6254_v7, %v2494_v52  ;;  %v7530_v52 = vld [vmem:[#allocation17_spill] sm:$0xff] }
 0x651   :  { %1198 = vrot.lane.b32.xlu0 %v7517_v3, %s4614_s14 }
 0x652   :  { %v2499_v12 = vmul.f32 %v4534_v38, %v2498_v43  ;;  %4163 = vmatmul.msk.bf16.gmra.mxu2 %vm249_vm2, %v7520_v2  ;;  %v7527_v43 = vld [vmem:[#allocation21_spill] sm:$0xff] }
 0x654   :  { %v2500_v9 = vadd.f32 %v4534_v38, %v2499_v12 }
 0x656   :  { %v2504_v20 = vsel %vm2503_vm15, %v4534_v38, %v2500_v9  ;;  %v6495_v34 = vpop.xlane.xlu2 %2419 }
 0x657   :  { %v2509_v35 = vsel %vm2506_vm4, %v2508_v22, %v2504_v20 }
 0x658   :  { %v6500_v44 = vmul.f32 %v6268_v16, %v2509_v35 }
 0x659   :  { %841 = vrot.lane.b32.xlu0 %v7521_v29, %s4613_s13 }
 0x65a   :  { %v6502_v50 = vpop.xlane.xlu0 %2407  ;;  %v2543_v10 = vpack.c.bf16 %v6500_v44, %v6505_v46  ;;  %v2535_v44 = vand.u32 2147483647, %v6495_v34 }
 0x65b   :  { %4535 = vrcp.f32 %v6502_v50  ;;  %v2477_v1 = vand.u32 2147483648, %v6502_v50  ;;  %vm2471_vm12 = vweird.f32 %v6502_v50  ;;  %v2475_v59 = vand.u32 2147483647, %v6502_v50 }
 0x65c   :  { %4537 = vrcp.f32 %v6446_v17 }
 0x65e   :  { %v2775_v18 = vpop.xlane.xlu2 %2774  ;;  %v1528_v16 = vpop.f32.mrf.mxu2 }
 0x65f   :  { %4539 = vrcp.f32 %v2775_v18  ;;  %1555 = vrot.lane.b32.xlu2 %v1528_v16, %s4615_s15  ;;  %v2880_v2 = vand.u32 2147483648, %v2775_v18  ;;  %vm2874_vm8 = vweird.f32 %v2775_v18  ;;  %v2878_v27 = vand.u32 2147483647, %v2775_v18 }
 0x661   :  { %1202 = vrot.lane.b32.xlu0 %v7522_v56, %s4614_s14  ;;  %v6513_v49 = vpop.eup %4535  ;;  %v2881_v32 = vor.u32 1.1754944e-38, %v2880_v2  ;;  %vm2879_vm14 = vcmp.eq.f32.partialorder %v2878_v27, 8.507059e+37 }
 0x662   :  { %4164 = vmatmul.msk.bf16.gmra.mxu2 %vm249_vm2, %v7525_v51  ;;  %v6520_v7 = vpop.eup %4537  ;;  %v2467_v19 = vmul.f32 %v6513_v49, %v6502_v50  ;;  %vm2472_vm9 = vweird.f32 %v6513_v49 }
 0x663   :  { %v2452_v61 = vmul.f32 %v6520_v7, %v6446_v17  ;;  %vm2457_vm7 = vweird.f32 %v6520_v7  ;;  %vm6565_vm13 = vmor %vm2471_vm12, %vm2472_vm9 }
 0x664   :  { %v2468_v25 = vsub.f32 1.0, %v2467_v19  ;;  %vm6578_vm4 = vmor %vm2456_vm6, %vm2457_vm7  ;;  %v2478_v19 = vor.u32 1.1754944e-38, %v2477_v1  ;;  %vm1216_vm7 = vcmask 195712  }
 0x665   :  { %v4540_v47 = vpop.eup %4539  ;;  %v2453_v62 = vsub.f32 1.0, %v2452_v61  ;;  %v2463_v61 = vor.u32 1.1754944e-38, %v2462_v23 }
 0x666   :  { %v2870_v55 = vmul.f32 %v4540_v47, %v2775_v18  ;;  %v2778_v53 = vpop.xlane.xlu2 %2777  ;;  %v1530_v57 = vpop.f32.mrf.mxu2  ;;  %v2469_v3 = vmul.f32 %v6513_v49, %v2468_v25  ;;  %vm2875_vm5 = vweird.f32 %v4540_v47 }
 0x667   :  { %4541 = vrcp.f32 %v2778_v53  ;;  %843 = vrot.lane.b32.xlu2 %v7527_v43, %s4613_s13  ;;  %1557 = vrot.lane.b32.xlu1 %v1530_v57, %s4615_s15  ;;  %v2454_v14 = vmul.f32 %v6520_v7, %v2453_v62  ;;  %vm6540_vm10 = vmor %vm2874_vm8, %vm2875_vm5  ;;  %v2895_v22 = vand.u32 2147483648, %v2778_v53  ;;  %v2893_v18 = vand.u32 2147483647, %v2778_v53 }
 0x668   :  { %v2871_v30 = vsub.f32 1.0, %v2870_v55  ;;  %v2470_v9 = vadd.f32 %v6513_v49, %v2469_v3  ;;  %vm2889_vm15 = vweird.f32 %v2778_v53  ;;  %vm2476_vm8 = vcmp.eq.f32.partialorder %v2475_v59, 8.507059e+37 }
 0x669   :  { %845 = vrot.lane.b32.xlu0 %v7526_v63, %s4613_s13  ;;  %v2455_v16 = vadd.f32 %v6520_v7, %v2454_v14  ;;  %v2896_v13 = vor.u32 1.1754944e-38, %v2895_v22  ;;  %vm2894_vm5 = vcmp.eq.f32.partialorder %v2893_v18, 8.507059e+37 }
 0x66a   :  { %v2872_v38 = vmul.f32 %v4540_v47, %v2871_v30  ;;  %v2474_v50 = vsel %vm6565_vm13, %v6513_v49, %v2470_v9  ;;  %vm2531_vm13 = vweird.f32 %v6495_v34 }
 0x66b   :  { %v2479_v25 = vsel %vm2476_vm8, %v2478_v19, %v2474_v50 }
 0x66c   :  { %v2873_v12 = vadd.f32 %v4540_v47, %v2872_v38  ;;  %v2417_v38 = vpop.xlane.xlu1 %2416 }
 0x66d   :  { %v4542_v28 = vpop.eup %4541  ;;  %v2546_v11 = vpop.permute.xlu0 %2545  ;;  %4543 = vrcp.f32 %v2417_v38  ;;  %v2522_v9 = vand.u32 2147483648, %v2417_v38  ;;  %v2520_v20 = vand.u32 2147483647, %v2417_v38 }
 0x66e   :  { %v2885_v6 = vmul.f32 %v4542_v28, %v2778_v53  ;;  %2576 = vmatpush.bf16.msrb.mxu3 %v2546_v11  ;;  %v834_v36 = vpop.permute.xlu2 %833  ;;  %v2877_v35 = vsel %vm6540_vm10, %v4540_v47, %v2873_v12  ;;  %vm2890_vm11 = vweird.f32 %v4542_v28  ;;  %v1533_v56 = vpop.f32.mrf.mxu2  ;;  %v2459_v53 = vsel %vm6578_vm4, %v6520_v7, %v2455_v16  ;;  %v7536_v7 = vld [vmem:[#allocation20_spill] sm:$0xff]  ;;  %v7537_v12 = vld [vmem:[#allocation15_spill] sm:$0xff] }
 0x66f   :  { %858 = vst.msk [vmem:[#allocation2] sm:$0xff] %vm857_vm1, %v834_v36  ;;  %1559 = vrot.lane.b32.xlu2 %v1533_v56, %s4615_s15  ;;  %vm2891_vm3 = vmor %vm2889_vm15, %vm2890_vm11  ;;  %v2882_v51 = vsel %vm2879_vm14, %v2881_v32, %v2877_v35  ;;  %4545 = vrcp.f32 %v6495_v34  ;;  %vm2516_vm11 = vweird.f32 %v2417_v38  ;;  %vm2521_vm15 = vcmp.eq.f32.partialorder %v2520_v20, 8.507059e+37  ;;  %v4264_v32 = vld [vmem:[%s7388_s3] sm:$0xff] }
 0x670   :  { %v2886_v26 = vsub.f32 1.0, %v2885_v6  ;;  %v6588_v63 = vmul.f32 %v6364_v58, %v2882_v51  ;;  %4547 = vrcp.f32 %v6487_v39  ;;  %3071 = vmatpush.bf16.msra.mxu1 %v4264_v32 }
 0x671   :  { %1206 = vrot.lane.b32.xlu0 %v7530_v52, %s4614_s14  ;;  %4170 = vmatmul.msk.bf16.vlgmr.msrb.gmra.mxu3 %vm249_vm2, %v2541_v4  ;;  %v7531_v4 = vld [vmem:[#allocation14_spill] sm:$0xff]  ;;  %v2537_v52 = vand.u32 2147483648, %v6495_v34 }
 0x672   :  { %v2887_v29 = vmul.f32 %v4542_v28, %v2886_v26  ;;  %4165 = vmatmul.msk.bf16.gmra.mxu2 %vm249_vm2, %v2186_v54  ;;  %1200 = vrot.lane.b32.xlu1 %v7531_v4, %s4614_s14  ;;  %v2460_v54 = vand.u32 2147483647, %v6446_v17 }
 0x673   :  { %v4544_v11 = vpop.eup %4543  ;;  %v2538_v35 = vor.u32 1.1754944e-38, %v2537_v52 }
 0x674   :  { %v2888_v21 = vadd.f32 %v4542_v28, %v2887_v29  ;;  %vm2461_vm6 = vcmp.eq.f32.partialorder %v2460_v54, 8.507059e+37  ;;  %vm2517_vm9 = vweird.f32 %v4544_v11  ;;  %v2865_v54 = vand.u32 2147483648, %v6487_v39 }
 0x675   :  { %v2464_v62 = vsel %vm2461_vm6, %v2463_v61, %v2459_v53  ;;  %v4546_v6 = vpop.eup %4545  ;;  %vm2518_vm12 = vmor %vm2516_vm11, %vm2517_vm9 }
 0x676   :  { %v2892_v55 = vsel %vm2891_vm3, %v4542_v28, %v2888_v21  ;;  %v6585_v30 = vpop.permute.xlu2 %1194  ;;  %v1535_v57 = vpop.f32.mrf.mxu2  ;;  %v2480_v28 = vmul.f32 %v6331_v41, %v2479_v25  ;;  %v2465_v58 = vmul.f32 %v6212_v40, %v2464_v62  ;;  %v2512_v40 = vmul.f32 %v4544_v11, %v2417_v38 }
 0x677   :  { %v2897_v49 = vsel %vm2894_vm5, %v2896_v13, %v2892_v55  ;;  %847 = vrot.lane.b32.xlu2 %v7536_v7, %s4613_s13  ;;  %v2527_v36 = vmul.f32 %v4546_v6, %v6495_v34  ;;  %vm2532_vm10 = vweird.f32 %v4546_v6  ;;  %vm2536_vm3 = vcmp.eq.f32.partialorder %v2535_v44, 8.507059e+37 }
 0x678   :  { %v6591_v17 = vmul.f32 %v6392_v45, %v2897_v49  ;;  %v2542_v45 = vpack.c.bf16 %v2480_v28, %v2465_v58  ;;  %v2513_v2 = vsub.f32 1.0, %v2512_v40  ;;  %vm2533_vm14 = vmor %vm2531_vm13, %vm2532_vm10  ;;  %vm2859_vm5 = vweird.f32 %v6487_v39 }
 0x679   :  { %v2528_v27 = vsub.f32 1.0, %v2527_v36  ;;  %v2866_v19 = vor.u32 1.1754944e-38, %v2865_v54  ;;  %vm1575_vm13 = vcmask 261312   ;;  %v4267_v54 = vld [vmem:[%s7390_s5 + $0x8] sm:$0xff] }
 0x67a   :  { %v2902_v43 = vpack.c.bf16 %v6591_v17, %v6588_v63  ;;  %1561 = vrot.lane.b32.xlu1 %v1535_v57, %s4615_s15  ;;  %v2514_v5 = vmul.f32 %v4544_v11, %v2513_v2  ;;  %3187 = vmatpush.bf16.msra.mxu3 %v4267_v54 }
 0x67b   :  { %v2529_v37 = vmul.f32 %v4546_v6, %v2528_v27 }
 0x67c   :  { %v2515_v26 = vadd.f32 %v4544_v11, %v2514_v5 }
 0x67d   :  { %v2530_v1 = vadd.f32 %v4546_v6, %v2529_v37 }
 0x67e   :  { %v2519_v46 = vsel %vm2518_vm12, %v4544_v11, %v2515_v26 }
 0x67f   :  { %v2534_v31 = vsel %vm2533_vm14, %v4546_v6, %v2530_v1 }
 0x680   :  { %v6601_v3 = vpop.permute.xlu2 %1553  ;;  %v2539_v56 = vsel %vm2536_vm3, %v2538_v35, %v2534_v31 }
 0x681   :  { %4171 = vmatmul.msk.bf16.gmra.mxu3 %vm249_vm2, %v2542_v45  ;;  %v2540_v59 = vmul.f32 %v6302_v24, %v2539_v56 }
 0x682   :  { %4178 = vmatmul.msk.bf16.vlgmr.msrb.gmra.mxu2 %vm249_vm2, %v2899_v8  ;;  %1204 = vrot.lane.b32.xlu1 %v7537_v12, %s4614_s14  ;;  %v4548_v8 = vpop.eup %4547 }
 0x683   :  { %v1193_v41 = vpop.permute.xlu1 %1192  ;;  %v2855_v22 = vmul.f32 %v4548_v8, %v6487_v39  ;;  %vm2860_vm4 = vweird.f32 %v4548_v8 }
 0x684   :  { %1217 = vst.msk [vmem:[#allocation2] sm:$0xff] %vm1216_vm7, %v1193_v41  ;;  %vm2861_vm8 = vmor %vm2859_vm5, %vm2860_vm4 }
 0x688   :  { %v840_v14 = vpop.permute.xlu2 %839 }
 0x689   :  { %861 = vst.msk [vmem:[#allocation2 + $0x18] sm:$0xff] %vm857_vm1, %v840_v14 }
 0x68b   :  { %v1197_v45 = vpop.permute.xlu1 %1196 }
 0x691   :  { %4172 = vmatmul.msk.bf16.gmra.mxu3 %vm249_vm2, %v2543_v10  ;;  %v2523_v10 = vor.u32 1.1754944e-38, %v2522_v9 }
 0x692   :  { %4179 = vmatmul.msk.bf16.gmra.mxu2 %vm249_vm2, %v2900_v48  ;;  %v2856_v48 = vsub.f32 1.0, %v2855_v22 }
 0x693   :  { %v2524_v18 = vsel %vm2521_vm15, %v2523_v10, %v2519_v46 }
 0x694   :  { %v2525_v16 = vmul.f32 %v6402_v60, %v2524_v18  ;;  %v2857_v34 = vmul.f32 %v4548_v8, %v2856_v48  ;;  %v2863_v60 = vand.u32 2147483647, %v6487_v39 }
 0x696   :  { %v2544_v23 = vpack.c.bf16 %v2540_v59, %v2525_v16  ;;  %v2858_v33 = vadd.f32 %v4548_v8, %v2857_v34  ;;  %vm2864_vm9 = vcmp.eq.f32.partialorder %v2863_v60, 8.507059e+37 }
 0x698   :  { %v2769_v29 = vpop.xlane.xlu0 %2768  ;;  %v2862_v13 = vsel %vm2861_vm8, %v4548_v8, %v2858_v33 }
 0x699   :  { %4549 = vrcp.f32 %v2769_v29  ;;  %v2850_v24 = vand.u32 2147483648, %v2769_v29  ;;  %v2848_v47 = vand.u32 2147483647, %v2769_v29  ;;  %vm2844_vm10 = vweird.f32 %v2769_v29 }
 0x69a   :  { %v2867_v49 = vsel %vm2864_vm9, %v2866_v19, %v2862_v13 }
 0x69b   :  { %v2851_v53 = vor.u32 1.1754944e-38, %v2850_v24  ;;  %vm2849_vm12 = vcmp.eq.f32.partialorder %v2848_v47, 8.507059e+37  ;;  %v2868_v39 = vmul.f32 %v6296_v15, %v2867_v49 }
 0x69f   :  { %v4550_v4 = vpop.eup %4549 }
 0x6a0   :  { %v2840_v21 = vmul.f32 %v4550_v4, %v2769_v29  ;;  %vm2845_vm6 = vweird.f32 %v4550_v4 }
 0x6a1   :  { %4173 = vmatmul.msk.bf16.gmra.mxu3 %vm249_vm2, %v2544_v23  ;;  %vm2846_vm11 = vmor %vm2844_vm10, %vm2845_vm6 }
 0x6a2   :  { %v2841_v50 = vsub.f32 1.0, %v2840_v21 }
 0x6a4   :  { %v2842_v51 = vmul.f32 %v4550_v4, %v2841_v50  ;;  %v4266_v50 = vld [vmem:[%s7390_s5] sm:$0xff] }
 0x6a5   :  { %3188 = vmatpush.bf16.msra.mxu3 %v4266_v50 }
 0x6a6   :  { %v2843_v55 = vadd.f32 %v4550_v4, %v2842_v51 }
 0x6a8   :  { %v2847_v61 = vsel %vm2846_vm11, %v4550_v4, %v2843_v55 }
 0x6a9   :  { %v2852_v25 = vsel %vm2849_vm12, %v2851_v53, %v2847_v61 }
 0x6aa   :  { %v2853_v38 = vmul.f32 %v6448_v42, %v2852_v25  ;;  %v6706_v25 = vld [vmem:[%s7389_s4] ss:$0 sm:$0xff] }
 0x6ab   :  { %v836_v57 = vpop.permute.xlu0 %835 }
 0x6ac   :  { %859 = vst.msk [vmem:[#allocation2 + $0x8] sm:$0xff] %vm857_vm1, %v836_v57  ;;  %v2901_v62 = vpack.c.bf16 %v2868_v39, %v2853_v38 }
 0x6ad   :  { %1218 = vst.msk [vmem:[#allocation2 + $0x8] sm:$0xff] %vm1216_vm7, %v6585_v30 }
 0x6ae   :  { %1577 = vst.msk [vmem:[#allocation2 + $0x8] sm:$0xff] %vm1575_vm13, %v6601_v3  ;;  %4180 = vmatmul.msk.bf16.gmra.mxu2 %vm249_vm2, %v2901_v62 }
 0x6b3   :  { %v1552_v7 = vpop.permute.xlu0 %1551 }
 0x6b4   :  { %1576 = vst.msk [vmem:[#allocation2] sm:$0xff] %vm1575_vm13, %v1552_v7  ;;  %v4585_v7 = vld [vmem:[%s7386_s0] sm:$0xff] }
 0x6b5   :  { %v1538_v28 = vpop.f32.mrf.mxu2  ;;  %v2997_v58 = vld [vmem:[#allocation2 + $0x8] sm:$0xff] }
 0x6b6   :  { %1563 = vrot.lane.b32.xlu2 %v1538_v28, %s4615_s15 }
 0x6b9   :  { %v1556_v12 = vpop.permute.xlu2 %1555 }
 0x6bb   :  { %v838_v15 = vpop.permute.xlu0 %837  ;;  %v2996_v42 = vld [vmem:[#allocation2] sm:$0xff] }
 0x6bc   :  { %860 = vst.msk [vmem:[#allocation2 + $0x10] sm:$0xff] %vm857_vm1, %v838_v15  ;;  %v3012_v11 = vpack.c.bf16 %v2997_v58, %v2996_v42  ;;  %v4586_v15 = vld [vmem:[%s7386_s0 + $0x8] sm:$0xff] }
 0x6bd   :  { %1219 = vst.msk [vmem:[#allocation2 + $0x10] sm:$0xff] %vm1216_vm7, %v1197_v45  ;;  %v1540_v30 = vpop.f32.mrf.mxu2 }
 0x6be   :  { %1578 = vst.msk [vmem:[#allocation2 + $0x10] sm:$0xff] %vm1575_vm13, %v1556_v12  ;;  %1565 = vrot.lane.b32.xlu1 %v1540_v30, %s4615_s15  ;;  %4181 = vmatmul.msk.bf16.gmra.mxu2 %vm249_vm2, %v2902_v43 }
 0x6bf   :  { %4190 = vmatmul.msk.bf16.vlgmr.msra.gmra.mxu1 %vm77_vm0, %v3012_v11 }
 0x6c1   :  { %v844_v41 = vpop.permute.xlu2 %843 }
 0x6c2   :  { %863 = vst.msk [vmem:[#allocation2 + $0x28] sm:$0xff] %vm857_vm1, %v844_v41 }
 0x6c3   :  { %v1199_v3 = vpop.permute.xlu0 %1198 }
 0x6c4   :  { %1220 = vst.msk [vmem:[#allocation2 + $0x18] sm:$0xff] %vm1216_vm7, %v1199_v3 }
 0x6c5   :  { %v2220_v6 = vpop.f32.mrf.mxu2  ;;  %v2998_v9 = vld [vmem:[#allocation2 + $0x10] sm:$0xff] }
 0x6c6   :  { %2248 = vrot.lane.b32.xlu0 %v2220_v6, %s4613_s13 }
 0x6c9   :  { %v1560_v36 = vpop.permute.xlu2 %1559 }
 0x6cb   :  { %v842_v40 = vpop.permute.xlu0 %841 }
 0x6cc   :  { %862 = vst.msk [vmem:[#allocation2 + $0x20] sm:$0xff] %vm857_vm1, %v842_v40 }
 0x6cd   :  { %v2222_v14 = vpop.f32.mrf.mxu2 }
 0x6ce   :  { %2250 = vrot.lane.b32.xlu2 %v2222_v14, %s4613_s13  ;;  %v4587_v14 = vld [vmem:[%s7386_s0 + $0x10] sm:$0xff] }
 0x6d1   :  { %v848_v17 = vpop.permute.xlu2 %847 }
 0x6d2   :  { %865 = vst.msk [vmem:[#allocation2 + $0x38] sm:$0xff] %vm857_vm1, %v848_v17  ;;  %v4588_v17 = vld [vmem:[%s7386_s0 + $0x18] sm:$0xff] }
 0x6d3   :  { %v1203_v63 = vpop.permute.xlu0 %1202 }
 0x6d4   :  { %1222 = vst.msk [vmem:[#allocation2 + $0x28] sm:$0xff] %vm1216_vm7, %v1203_v63 }
 0x6d5   :  { %v2225_v43 = vpop.f32.mrf.mxu2 }
 0x6d9   :  { %v1558_v27 = vpop.permute.xlu1 %1557 }
 0x6da   :  { %1579 = vst.msk [vmem:[#allocation2 + $0x18] sm:$0xff] %vm1575_vm13, %v1558_v27 }
 0x6db   :  { %v846_v2 = vpop.permute.xlu0 %845 }
 0x6dc   :  { %864 = vst.msk [vmem:[#allocation2 + $0x30] sm:$0xff] %vm857_vm1, %v846_v2 }
 0x6dd   :  { %v2227_v5 = vpop.f32.mrf.mxu2 }
 0x6e1   :  { %v2999_v1 = vld [vmem:[#allocation2 + $0x18] sm:$0xff] }
 0x6e2   :  { %v3013_v20 = vpack.c.bf16 %v2999_v1, %v2998_v9 }
 0x6e3   :  { %v1207_v37 = vpop.permute.xlu0 %1206 }
 0x6e4   :  { %1224 = vst.msk [vmem:[#allocation2 + $0x38] sm:$0xff] %vm1216_vm7, %v1207_v37  ;;  %v1201_v8 = vpop.permute.xlu1 %1200  ;;  %4191 = vmatmul.msk.bf16.gmra.mxu1 %vm77_vm0, %v3013_v20 }
 0x6e5   :  { %v2230_v26 = vpop.f32.mrf.mxu2  ;;  %1221 = vst.msk [vmem:[#allocation2 + $0x20] sm:$0xff] %vm1216_vm7, %v1201_v8 }
 0x6e6   :  { %1580 = vst.msk [vmem:[#allocation2 + $0x20] sm:$0xff] %vm1575_vm13, %v1560_v36 }
 0x6ec   :  { %v1562_v22 = vpop.permute.xlu1 %1561 }
 0x6ed   :  { %v2232_v52 = vpop.f32.mrf.mxu2  ;;  %1581 = vst.msk [vmem:[#allocation2 + $0x28] sm:$0xff] %vm1575_vm13, %v1562_v22  ;;  %v3000_v0 = vld [vmem:[#allocation2 + $0x20] sm:$0xff] }
 0x6ee   :  { %v4589_v22 = vld [vmem:[%s7386_s0 + $0x20] sm:$0xff] }
 0x6f4   :  { %v2578_v44 = vpop.f32.mrf.mxu3  ;;  %v1205_v46 = vpop.permute.xlu1 %1204  ;;  %v3001_v31 = vld [vmem:[#allocation2 + $0x28] sm:$0xff] }
 0x6f5   :  { %v2235_v10 = vpop.f32.mrf.mxu2  ;;  %2606 = vrot.lane.b32.xlu1 %v2578_v44, %s4614_s14  ;;  %1223 = vst.msk [vmem:[#allocation2 + $0x30] sm:$0xff] %vm1216_vm7, %v1205_v46  ;;  %v3014_v48 = vpack.c.bf16 %v3001_v31, %v3000_v0  ;;  %v4590_v44 = vld [vmem:[%s7386_s0 + $0x28] sm:$0xff] }
 0x6f7   :  { %4192 = vmatmul.msk.bf16.gmra.mxu1 %vm77_vm0, %v3014_v48 }
 0x6fc   :  { %v2580_v35 = vpop.f32.mrf.mxu3 }
 0x6fd   :  { %v2237_v29 = vpop.f32.mrf.mxu2  ;;  %2608 = vrot.lane.b32.xlu0 %v2580_v35, %s4614_s14 }
 0x704   :  { %v2583_v18 = vpop.f32.mrf.mxu3 }
 0x705   :  { %2252 = vrot.lane.b32.xlu0 %v2225_v43, %s4613_s13  ;;  %v2936_v56 = vpop.f32.mrf.mxu2 }
 0x706   :  { %2964 = vrot.lane.b32.xlu2 %v2936_v56, %s4615_s15 }
 0x70c   :  { %v2585_v16 = vpop.f32.mrf.mxu3 }
 0x70d   :  { %2612 = vrot.lane.b32.xlu0 %v2585_v16, %s4614_s14  ;;  %v2938_v34 = vpop.f32.mrf.mxu2 }
 0x70e   :  { %2254 = vrot.lane.b32.xlu2 %v2227_v5, %s4613_s13  ;;  %2966 = vrot.lane.b32.xlu1 %v2938_v34, %s4615_s15 }
 0x710   :  { %v1564_v59 = vpop.permute.xlu2 %1563 }
 0x711   :  { %1582 = vst.msk [vmem:[#allocation2 + $0x30] sm:$0xff] %vm1575_vm13, %v1564_v59 }
 0x714   :  { %v2588_v32 = vpop.f32.mrf.mxu3 }
 0x715   :  { %2256 = vrot.lane.b32.xlu0 %v2230_v26, %s4613_s13  ;;  %v2941_v4 = vpop.f32.mrf.mxu2 }
 0x716   :  { %2610 = vrot.lane.b32.xlu1 %v2583_v18, %s4614_s14  ;;  %2968 = vrot.lane.b32.xlu2 %v2941_v4, %s4615_s15 }
 0x718   :  { %v3002_v19 = vld [vmem:[#allocation2 + $0x30] sm:$0xff] }
 0x71c   :  { %v2590_v23 = vpop.f32.mrf.mxu3 }
 0x71d   :  { %2616 = vrot.lane.b32.xlu0 %v2590_v23, %s4614_s14  ;;  %v2943_v33 = vpop.f32.mrf.mxu2 }
 0x71e   :  { %2258 = vrot.lane.b32.xlu2 %v2232_v52, %s4613_s13  ;;  %2970 = vrot.lane.b32.xlu1 %v2943_v33, %s4615_s15 }
 0x724   :  { %v2593_v21 = vpop.f32.mrf.mxu3 }
 0x725   :  { %2260 = vrot.lane.b32.xlu0 %v2235_v10, %s4613_s13 }
 0x726   :  { %2614 = vrot.lane.b32.xlu1 %v2588_v32, %s4614_s14 }
 0x728   :  { %v2251_v60 = vpop.permute.xlu2 %2250 }
 0x729   :  { %2273 = vst.msk [vmem:[#allocation2 + $0x48] sm:$0xff] %vm857_vm1, %v2251_v60 }
 0x72c   :  { %v2595_v24 = vpop.f32.mrf.mxu3 }
 0x72d   :  { %2620 = vrot.lane.b32.xlu0 %v2595_v24, %s4614_s14 }
 0x730   :  { %v1566_v13 = vpop.permute.xlu1 %1565 }
 0x731   :  { %1583 = vst.msk [vmem:[#allocation2 + $0x38] sm:$0xff] %vm1575_vm13, %v1566_v13  ;;  %v2946_v51 = vpop.f32.mrf.mxu2 }
 0x732   :  { %2972 = vrot.lane.b32.xlu2 %v2946_v51, %s4615_s15 }
 0x738   :  { %v2249_v47 = vpop.permute.xlu0 %2248  ;;  %v3003_v55 = vld [vmem:[#allocation2 + $0x38] sm:$0xff] }
 0x739   :  { %2272 = vst.msk [vmem:[#allocation2 + $0x40] sm:$0xff] %vm857_vm1, %v2249_v47  ;;  %v2948_v53 = vpop.f32.mrf.mxu2  ;;  %v3015_v49 = vpack.c.bf16 %v3003_v55, %v3002_v19  ;;  %v4616_v19 = vmov 1.4142135  }
 0x73a   :  { %2262 = vrot.lane.b32.xlu2 %v2237_v29, %s4613_s13  ;;  %2974 = vrot.lane.b32.xlu1 %v2948_v53, %s4615_s15  ;;  %4551 = vrcp.f32 %v4616_v19  ;;  %v4270_v19 = vld [vmem:[%s7392_s7 + $0x10] sm:$0xff] }
 0x73b   :  { %4193 = vmatmul.msk.bf16.gmra.mxu1 %vm77_vm0, %v3015_v49 }
 0x73c   :  { %v3073_v61 = vpop.f32.mrf.mxu1 }
 0x73d   :  { %v3074_v39 = vadd.f32 %v6706_v25, %v3073_v61 }
 0x73f   :  { %v6715_v28 = vadd.f32 %v4585_v7, %v3074_v39  ;;  %v4591_v7 = vld [vmem:[%s7386_s0 + $0x30] sm:$0xff] }
 0x740   :  { %v4552_v53 = vpop.eup %4551 }
 0x741   :  { %v2951_v38 = vpop.f32.mrf.mxu2  ;;  %v3247_v61 = vmul.f32 1.4142135, %v4552_v53  ;;  %vm3251_vm2 = vweird.f32 %v4552_v53 }
 0x742   :  { %2976 = vrot.lane.b32.xlu2 %v2951_v38, %s4615_s15  ;;  %2618 = vrot.lane.b32.xlu1 %v2593_v21, %s4614_s14 }
 0x744   :  { %v3075_v57 = vpop.f32.mrf.mxu1 }
 0x745   :  { %v3076_v62 = vadd.f32 %v6706_v25, %v3075_v57 }
 0x747   :  { %v6720_v42 = vadd.f32 %v4586_v15, %v3076_v62  ;;  %v3248_v62 = vsub.f32 1.0, %v3247_v61 }
 0x749   :  { %v3129_v58 = vpack.c.bf16 %v6720_v42, %v6715_v28  ;;  %v2953_v45 = vpop.f32.mrf.mxu2 }
 0x74a   :  { %2978 = vrot.lane.b32.xlu1 %v2953_v45, %s4615_s15 }
 0x74b   :  { %4206 = vmatmul.msk.bf16.vlgmr.msra.gmra.mxu3 %vm77_vm0, %v3129_v58  ;;  %v4592_v58 = vld [vmem:[%s7386_s0 + $0x38] sm:$0xff] }
 0x760   :  { %v2965_v11 = vpop.permute.xlu2 %2964 }
 0x761   :  { %v3078_v12 = vpop.f32.mrf.mxu1 }
 0x762   :  { %v3079_v41 = vadd.f32 %v6706_v25, %v3078_v12 }
 0x764   :  { %v6734_v63 = vadd.f32 %v4587_v14, %v3079_v41  ;;  %v3249_v41 = vmul.f32 %v4552_v53, %v3248_v62 }
 0x767   :  { %v2607_v30 = vpop.permute.xlu1 %2606 }
 0x768   :  { %2630 = vst.msk [vmem:[#allocation2 + $0x40] sm:$0xff] %vm1216_vm7, %v2607_v30  ;;  %v2255_v3 = vpop.permute.xlu2 %2254 }
 0x769   :  { %2988 = vst.msk [vmem:[#allocation2 + $0x40] sm:$0xff] %vm1575_vm13, %v2965_v11  ;;  %v3080_v6 = vpop.f32.mrf.mxu1 }
 0x76a   :  { %2275 = vst.msk [vmem:[#allocation2 + $0x58] sm:$0xff] %vm857_vm1, %v2255_v3  ;;  %v3081_v40 = vadd.f32 %v6706_v25, %v3080_v6  ;;  %v3250_v6 = vadd.f32 %v4552_v53, %v3249_v41 }
 0x76c   :  { %v6739_v43 = vadd.f32 %v4588_v17, %v3081_v40  ;;  %v6800_v40 = vld [vmem:[%s7391_s6] ss:$0 sm:$0xff]  ;;  %v6802_v14 = vsel %vm3251_vm2, %v4552_v53, %v3250_v6 }
 0x76e   :  { %v3130_v27 = vpack.c.bf16 %v6739_v43, %v6734_v63 }
 0x76f   :  { %v2609_v36 = vpop.permute.xlu0 %2608 }
 0x770   :  { %2631 = vst.msk [vmem:[#allocation2 + $0x48] sm:$0xff] %vm1216_vm7, %v2609_v36  ;;  %v2969_v2 = vpop.permute.xlu2 %2968  ;;  %4207 = vmatmul.msk.bf16.gmra.mxu3 %vm77_vm0, %v3130_v27  ;;  %v3004_v35 = vld [vmem:[#allocation2 + $0x40] sm:$0xff] }
 0x774   :  { %v3083_v5 = vpop.f32.mrf.mxu1 }
 0x775   :  { %v3084_v26 = vadd.f32 %v6706_v25, %v3083_v5 }
 0x777   :  { %v2253_v37 = vpop.permute.xlu0 %2252  ;;  %v6752_v52 = vadd.f32 %v4589_v22, %v3084_v26  ;;  %v4273_v22 = vld [vmem:[%s7392_s7 + $0x28] sm:$0xff] }
 0x778   :  { %2274 = vst.msk [vmem:[#allocation2 + $0x50] sm:$0xff] %vm857_vm1, %v2253_v37  ;;  %v2259_v8 = vpop.permute.xlu2 %2258  ;;  %v4274_v37 = vld [vmem:[%s7392_s7 + $0x30] sm:$0xff] }
 0x779   :  { %2277 = vst.msk [vmem:[#allocation2 + $0x68] sm:$0xff] %vm857_vm1, %v2259_v8 }
 0x77c   :  { %v3085_v9 = vpop.f32.mrf.mxu1 }
 0x77d   :  { %v3086_v1 = vadd.f32 %v6706_v25, %v3085_v9 }
 0x77f   :  { %v2613_v20 = vpop.permute.xlu0 %2612  ;;  %v6757_v46 = vadd.f32 %v4590_v44, %v3086_v1 }
 0x780   :  { %2633 = vst.msk [vmem:[#allocation2 + $0x58] sm:$0xff] %vm1216_vm7, %v2613_v20  ;;  %v2967_v10 = vpop.permute.xlu1 %2966 }
 0x781   :  { %2989 = vst.msk [vmem:[#allocation2 + $0x48] sm:$0xff] %vm1575_vm13, %v2967_v10  ;;  %v3131_v0 = vpack.c.bf16 %v6757_v46, %v6752_v52 }
 0x783   :  { %4208 = vmatmul.msk.bf16.gmra.mxu3 %vm77_vm0, %v3131_v0 }
 0x787   :  { %v2257_v31 = vpop.permute.xlu0 %2256 }
 0x788   :  { %2276 = vst.msk [vmem:[#allocation2 + $0x60] sm:$0xff] %vm857_vm1, %v2257_v31  ;;  %v2611_v48 = vpop.permute.xlu1 %2610  ;;  %v3005_v29 = vld [vmem:[#allocation2 + $0x48] sm:$0xff] }
 0x789   :  { %2632 = vst.msk [vmem:[#allocation2 + $0x50] sm:$0xff] %vm1216_vm7, %v2611_v48  ;;  %v3016_v18 = vpack.c.bf16 %v3005_v29, %v3004_v35  ;;  %v4272_v35 = vld [vmem:[%s7392_s7 + $0x20] sm:$0xff] }
 0x78a   :  { %2990 = vst.msk [vmem:[#allocation2 + $0x50] sm:$0xff] %vm1575_vm13, %v2969_v2  ;;  %v4275_v2 = vld [vmem:[%s7392_s7 + $0x38] sm:$0xff] }
 0x78b   :  { %4194 = vmatmul.msk.bf16.gmra.mxu1 %vm77_vm0, %v3016_v18  ;;  %4017 = vmatpush.bf16.msrb.mxu0 %v4275_v2 }
 0x78c   :  { %v2973_v56 = vpop.permute.xlu2 %2972 }
 0x78f   :  { %v2617_v16 = vpop.permute.xlu0 %2616  ;;  %4018 = vmatpush.bf16.msrb.mxu0 %v4274_v37 }
 0x790   :  { %2635 = vst.msk [vmem:[#allocation2 + $0x68] sm:$0xff] %vm1216_vm7, %v2617_v16  ;;  %v2971_v34 = vpop.permute.xlu1 %2970 }
 0x791   :  { %2991 = vst.msk [vmem:[#allocation2 + $0x58] sm:$0xff] %vm1575_vm13, %v2971_v34  ;;  %v3006_v23 = vld [vmem:[#allocation2 + $0x50] sm:$0xff] }
 0x793   :  { %4019 = vmatpush.bf16.msrb.mxu0 %v4273_v22 }
 0x794   :  { %v2263_v59 = vpop.permute.xlu2 %2262 }
 0x795   :  { %2279 = vst.msk [vmem:[#allocation2 + $0x78] sm:$0xff] %vm857_vm1, %v2263_v59 }
 0x797   :  { %v2261_v32 = vpop.permute.xlu0 %2260  ;;  %4020 = vmatpush.bf16.msrb.mxu0 %v4272_v35 }
 0x798   :  { %2278 = vst.msk [vmem:[#allocation2 + $0x70] sm:$0xff] %vm857_vm1, %v2261_v32  ;;  %v2615_v4 = vpop.permute.xlu1 %2614  ;;  %v3007_v33 = vld [vmem:[#allocation2 + $0x58] sm:$0xff] }
 0x799   :  { %2634 = vst.msk [vmem:[#allocation2 + $0x60] sm:$0xff] %vm1216_vm7, %v2615_v4  ;;  %v3017_v21 = vpack.c.bf16 %v3007_v33, %v3006_v23 }
 0x79a   :  { %2992 = vst.msk [vmem:[#allocation2 + $0x60] sm:$0xff] %vm1575_vm13, %v2973_v56 }
 0x79b   :  { %4195 = vmatmul.msk.bf16.gmra.mxu1 %vm77_vm0, %v3017_v21  ;;  %v4271_v21 = vld [vmem:[%s7392_s7 + $0x18] sm:$0xff] }
 0x79c   :  { %v2977_v51 = vpop.permute.xlu2 %2976  ;;  %4021 = vmatpush.bf16.msrb.mxu0 %v4271_v21 }
 0x79f   :  { %v2621_v54 = vpop.permute.xlu0 %2620 }
 0x7a0   :  { %2637 = vst.msk [vmem:[#allocation2 + $0x78] sm:$0xff] %vm1216_vm7, %v2621_v54  ;;  %4022 = vmatpush.bf16.msrb.mxu0 %v4270_v19 }
 0x7a1   :  { %v3008_v24 = vld [vmem:[#allocation2 + $0x60] sm:$0xff] }
 0x7ac   :  { %v2975_v60 = vpop.permute.xlu1 %2974 }
 0x7ad   :  { %2993 = vst.msk [vmem:[#allocation2 + $0x68] sm:$0xff] %vm1575_vm13, %v2975_v60 }
 0x7b4   :  { %v2619_v50 = vpop.permute.xlu1 %2618  ;;  %v3009_v13 = vld [vmem:[#allocation2 + $0x68] sm:$0xff] }
 0x7b5   :  { %2636 = vst.msk [vmem:[#allocation2 + $0x70] sm:$0xff] %vm1216_vm7, %v2619_v50  ;;  %v3018_v47 = vpack.c.bf16 %v3009_v13, %v3008_v24 }
 0x7b6   :  { %2994 = vst.msk [vmem:[#allocation2 + $0x70] sm:$0xff] %vm1575_vm13, %v2977_v51 }
 0x7b7   :  { %4196 = vmatmul.msk.bf16.gmra.mxu1 %vm77_vm0, %v3018_v47 }
 0x7b8   :  { %v3088_v55 = vpop.f32.mrf.mxu1 }
 0x7b9   :  { %v3089_v38 = vadd.f32 %v6706_v25, %v3088_v55 }
 0x7bb   :  { %v6786_v15 = vadd.f32 %v4591_v7, %v3089_v38 }
 0x7bc   :  { %v2979_v49 = vpop.permute.xlu1 %2978 }
 0x7bd   :  { %2995 = vst.msk [vmem:[#allocation2 + $0x78] sm:$0xff] %vm1575_vm13, %v2979_v49  ;;  %v3010_v11 = vld [vmem:[#allocation2 + $0x70] sm:$0xff] }
 0x7c0   :  { %v3090_v39 = vpop.f32.mrf.mxu1 }
 0x7c1   :  { %v3091_v57 = vadd.f32 %v6706_v25, %v3090_v39 }
 0x7c3   :  { %v6791_v45 = vadd.f32 %v4592_v58, %v3091_v57  ;;  %v4269_v57 = vld [vmem:[%s7392_s7 + $0x8] sm:$0xff] }
 0x7c4   :  { %v3011_v12 = vld [vmem:[#allocation2 + $0x78] sm:$0xff]  ;;  %4023 = vmatpush.bf16.msrb.mxu0 %v4269_v57 }
 0x7c5   :  { %v3132_v30 = vpack.c.bf16 %v6791_v45, %v6786_v15  ;;  %v3019_v3 = vpack.c.bf16 %v3011_v12, %v3010_v11  ;;  %v4268_v12 = vld [vmem:[%s7392_s7] sm:$0xff] }
 0x7c7   :  { %4197 = vmatmul.msk.bf16.gmra.mxu1 %vm77_vm0, %v3019_v3  ;;  %4209 = vmatmul.msk.bf16.gmra.mxu3 %vm77_vm0, %v3132_v30 }
 0x7c8   :  { %4024 = vmatpush.bf16.msrb.mxu0 %v4268_v12 }
 0x7ce   :  { %v3190_v36 = vpop.f32.mrf.mxu3 }
 0x7cf   :  { %v6805_v17 = vadd.f32 %v6800_v40, %v3190_v36 }
 0x7d1   :  { %v6812_v27 = vmul.f32 %v6802_v14, %v6805_v17 }
 0x7d3   :  { %v3269_v5 = vmul.f32 %v6812_v27, %v6812_v27 }
 0x7d5   :  { %v3270_v8 = vmin.f32 %v3269_v5, 16.0 }
 0x7d6   :  { %v3192_v26 = vpop.f32.mrf.mxu3 }
 0x7d7   :  { %v3271_v9 = vmul.f32 2.1237322e-06, %v3270_v8  ;;  %v3282_v1 = vmul.f32 3.8918573e-05, %v3270_v8  ;;  %v6820_v20 = vadd.f32 %v6800_v40, %v3192_v26 }
 0x7d9   :  { %v3272_v44 = vadd.f32 0.00028619796, %v3271_v9  ;;  %v3283_v10 = vadd.f32 0.001143296, %v3282_v1  ;;  %v6827_v0 = vmul.f32 %v6802_v14, %v6820_v20 }
 0x7db   :  { %v3284_v31 = vmul.f32 %v3283_v10, %v3270_v8  ;;  %v3309_v48 = vmul.f32 %v6827_v0, %v6827_v0  ;;  %v3273_v29 = vmul.f32 %v3272_v44, %v3270_v8 }
 0x7dd   :  { %v3285_v18 = vadd.f32 0.014752088, %v3284_v31  ;;  %v3310_v56 = vmin.f32 %v3309_v48, 16.0  ;;  %v3274_v32 = vadd.f32 0.0036580483, %v3273_v29 }
 0x7df   :  { %v3286_v16 = vmul.f32 %v3285_v18, %v3270_v8  ;;  %v3311_v34 = vmul.f32 2.1237322e-06, %v3310_v56  ;;  %v3322_v59 = vmul.f32 3.8918573e-05, %v3310_v56  ;;  %v3275_v24 = vmul.f32 %v3274_v32, %v3270_v8 }
 0x7e1   :  { %v3287_v4 = vadd.f32 0.112945676, %v3286_v16  ;;  %v3312_v23 = vadd.f32 0.00028619796, %v3311_v34  ;;  %v3323_v33 = vadd.f32 0.001143296, %v3322_v59 }
 0x7e2   :  { %v3276_v49 = vadd.f32 0.05243302, %v3275_v24 }
 0x7e3   :  { %v3288_v54 = vmul.f32 %v3287_v4, %v3270_v8  ;;  %v3313_v60 = vmul.f32 %v3312_v23, %v3310_v56  ;;  %v3324_v50 = vmul.f32 %v3323_v33, %v3310_v56 }
 0x7e4   :  { %v3277_v7 = vmul.f32 %v3276_v49, %v3270_v8 }
 0x7e5   :  { %v3289_v13 = vadd.f32 0.4994258, %v3288_v54  ;;  %v3314_v51 = vadd.f32 0.0036580483, %v3313_v60  ;;  %v3325_v47 = vadd.f32 0.014752088, %v3324_v50 }
 0x7e6   :  { %v3278_v41 = vadd.f32 0.18741608, %v3277_v7 }
 0x7e7   :  { %v3290_v55 = vmul.f32 %v3289_v13, %v3270_v8  ;;  %v3326_v53 = vmul.f32 %v3325_v47, %v3310_v56  ;;  %v3315_v38 = vmul.f32 %v3314_v51, %v3310_v56 }
 0x7e8   :  { %v3279_v37 = vmul.f32 %v3278_v41, %v3270_v8 }
 0x7e9   :  { %v3291_v61 = vadd.f32 1.0, %v3290_v55  ;;  %v3327_v39 = vadd.f32 0.112945676, %v3326_v53  ;;  %v3316_v58 = vadd.f32 0.05243302, %v3315_v38 }
 0x7ea   :  { %v3280_v48 = vadd.f32 1.1283791, %v3279_v37 }
 0x7eb   :  { %4553 = vrcp.f32 %v3291_v61  ;;  %v3328_v62 = vmul.f32 %v3327_v39, %v3310_v56  ;;  %v3317_v36 = vmul.f32 %v3316_v58, %v3310_v56  ;;  %v3303_v9 = vand.u32 2147483648, %v3291_v61 }
 0x7ec   :  { %v3301_v22 = vand.u32 2147483647, %v3291_v61  ;;  %vm3297_vm7 = vweird.f32 %v3291_v61  ;;  %v3281_v4 = vmul.f32 %v3280_v48, %v6812_v27 }
 0x7ed   :  { %v3329_v11 = vadd.f32 0.4994258, %v3328_v62  ;;  %v3318_v1 = vadd.f32 0.18741608, %v3317_v36  ;;  %v3304_v18 = vor.u32 1.1754944e-38, %v3303_v9 }
 0x7ee   :  { %vm3302_vm15 = vcmp.eq.f32.partialorder %v3301_v22, 8.507059e+37 }
 0x7ef   :  { %v3330_v30 = vmul.f32 %v3329_v11, %v3310_v56  ;;  %v3319_v16 = vmul.f32 %v3318_v1, %v3310_v56 }
 0x7f1   :  { %v4554_v3 = vpop.eup %4553  ;;  %v3331_v2 = vadd.f32 1.0, %v3330_v30  ;;  %v3320_v33 = vadd.f32 1.1283791, %v3319_v16 }
 0x7f2   :  { %v3293_v6 = vmul.f32 %v4554_v3, %v3291_v61  ;;  %vm3298_vm1 = vweird.f32 %v4554_v3 }
 0x7f3   :  { %4555 = vrcp.f32 %v3331_v2  ;;  %v3195_v44 = vpop.f32.mrf.mxu3  ;;  %vm3299_vm14 = vmor %vm3297_vm7, %vm3298_vm1  ;;  %v3343_v21 = vand.u32 2147483648, %v3331_v2  ;;  %v3341_v56 = vand.u32 2147483647, %v3331_v2  ;;  %vm3337_vm4 = vweird.f32 %v3331_v2 }
 0x7f4   :  { %v3294_v5 = vsub.f32 1.0, %v3293_v6  ;;  %v6847_v31 = vadd.f32 %v6800_v40, %v3195_v44  ;;  %v3321_v27 = vmul.f32 %v3320_v33, %v6827_v0  ;;  %v3230_v6 = vmul.f32 0.5, %v6805_v17 }
 0x7f5   :  { %v3344_v55 = vor.u32 1.1754944e-38, %v3343_v21  ;;  %vm3342_vm8 = vcmp.eq.f32.partialorder %v3341_v56, 8.507059e+37 }
 0x7f6   :  { %v3295_v26 = vmul.f32 %v4554_v3, %v3294_v5  ;;  %v6851_v8 = vmul.f32 %v6802_v14, %v6847_v31 }
 0x7f8   :  { %v3296_v10 = vadd.f32 %v4554_v3, %v3295_v26  ;;  %v3349_v32 = vmul.f32 %v6851_v8, %v6851_v8  ;;  %v3231_v26 = vmul.f32 0.5, %v6820_v20 }
 0x7f9   :  { %v4556_v35 = vpop.eup %4555 }
 0x7fa   :  { %v3300_v29 = vsel %vm3299_vm14, %v4554_v3, %v3296_v10  ;;  %v3333_v34 = vmul.f32 %v4556_v35, %v3331_v2  ;;  %v6856_v54 = vmin.f32 %v3349_v32, 16.0  ;;  %vm3338_vm3 = vweird.f32 %v4556_v35 }
 0x7fb   :  { %v3305_v59 = vsel %vm3302_vm15, %v3304_v18, %v3300_v29  ;;  %v3197_v24 = vpop.f32.mrf.mxu3  ;;  %vm3339_vm5 = vmor %vm3337_vm4, %vm3338_vm3 }
 0x7fc   :  { %v3334_v23 = vsub.f32 1.0, %v3333_v34  ;;  %v3306_v60 = vmul.f32 %v3305_v59, %v3281_v4  ;;  %v3351_v13 = vmul.f32 2.1237322e-06, %v6856_v54  ;;  %v3362_v51 = vmul.f32 3.8918573e-05, %v6856_v54 }
 0x7fd   :  { %v6861_v47 = vadd.f32 %v6800_v40, %v3197_v24 }
 0x7fe   :  { %v3335_v50 = vmul.f32 %v4556_v35, %v3334_v23  ;;  %v3352_v53 = vadd.f32 0.00028619796, %v3351_v13  ;;  %v3363_v49 = vadd.f32 0.001143296, %v3362_v51  ;;  %v4214_v61 = vclamps-f32 %v3306_v60, 1.0 }
 0x7ff   :  { %v6866_v39 = vmul.f32 %v6802_v14, %v6861_v47 }
 0x800   :  { %v3336_v19 = vadd.f32 %v4556_v35, %v3335_v50  ;;  %v3353_v62 = vmul.f32 %v3352_v53, %v6856_v54  ;;  %v3364_v7 = vmul.f32 %v3363_v49, %v6856_v54  ;;  %v3909_v12 = vadd.f32 1.0, %v4214_v61 }
 0x801   :  { %v3389_v0 = vmul.f32 %v6866_v39, %v6866_v39 }
 0x802   :  { %v3340_v38 = vsel %vm3339_vm5, %v4556_v35, %v3336_v19  ;;  %v3365_v11 = vadd.f32 0.014752088, %v3364_v7  ;;  %v3354_v36 = vadd.f32 0.0036580483, %v3353_v62  ;;  %v3925_v17 = vmul.f32 %v3909_v12, %v3230_v6  ;;  %v4593_v6 = vld [vmem:[%s7386_s0 + $0x40] sm:$0xff] }
 0x803   :  { %v3345_v57 = vsel %vm3342_vm8, %v3344_v55, %v3340_v38  ;;  %v6872_v3 = vmin.f32 %v3389_v0, 16.0 }
 0x804   :  { %v3346_v58 = vmul.f32 %v3345_v57, %v3321_v27  ;;  %v3366_v2 = vmul.f32 %v3365_v11, %v6856_v54  ;;  %v3355_v34 = vmul.f32 %v3354_v36, %v6856_v54 }
 0x805   :  { %v3391_v1 = vmul.f32 2.1237322e-06, %v6872_v3  ;;  %v3402_v22 = vmul.f32 3.8918573e-05, %v6872_v3 }
 0x806   :  { %v4215_v30 = vclamps-f32 %v3346_v58, 1.0  ;;  %v3200_v41 = vpop.f32.mrf.mxu3  ;;  %v3367_v44 = vadd.f32 0.112945676, %v3366_v2  ;;  %v3356_v13 = vadd.f32 0.05243302, %v3355_v34  ;;  %v4594_v2 = vld [vmem:[%s7386_s0 + $0x48] sm:$0xff] }
 0x807   :  { %v6877_v5 = vadd.f32 %v6800_v40, %v3200_v41  ;;  %v3392_v35 = vadd.f32 0.00028619796, %v3391_v1  ;;  %v3403_v29 = vadd.f32 0.001143296, %v3402_v22 }
 0x808   :  { %v3093_v37 = vpop.f32.mrf.mxu1  ;;  %v3910_v9 = vadd.f32 1.0, %v4215_v30  ;;  %v3368_v18 = vmul.f32 %v3367_v44, %v6856_v54  ;;  %v3357_v7 = vmul.f32 %v3356_v13, %v6856_v54 }
 0x809   :  { %v6884_v10 = vmul.f32 %v6802_v14, %v6877_v5  ;;  %v3393_v59 = vmul.f32 %v3392_v35, %v6872_v3  ;;  %v3404_v32 = vmul.f32 %v3403_v29, %v6872_v3  ;;  %v3094_v49 = vadd.f32 %v6706_v25, %v3093_v37 }
 0x80a   :  { %v3926_v48 = vmul.f32 %v3910_v9, %v3231_v26  ;;  %v3369_v4 = vadd.f32 0.4994258, %v3368_v18  ;;  %v3358_v22 = vadd.f32 0.18741608, %v3357_v7 }
 0x80b   :  { %v3429_v16 = vmul.f32 %v6884_v10, %v6884_v10  ;;  %v3394_v33 = vadd.f32 0.0036580483, %v3393_v59  ;;  %v3405_v21 = vadd.f32 0.014752088, %v3404_v32  ;;  %v6919_v36 = vadd.f32 %v4593_v6, %v3094_v49 }
 0x80c   :  { %v3941_v20 = vpack.c.bf16 %v3926_v48, %v3925_v17  ;;  %v3370_v50 = vmul.f32 %v3369_v4, %v6856_v54 }
 0x80d   :  { %v6892_v23 = vmin.f32 %v3429_v16, 16.0  ;;  %v3406_v51 = vmul.f32 %v3405_v21, %v6872_v3  ;;  %v3395_v55 = vmul.f32 %v3394_v33, %v6872_v3  ;;  %v3359_v21 = vmul.f32 %v3358_v22, %v6856_v54 }
 0x80e   :  { %v3202_v60 = vpop.f32.mrf.mxu3  ;;  %4025 = vmatmul.bf16.vlgmr.msrb.gmra.mxu0 %v3941_v20  ;;  %v6900_v27 = vadd.f32 1.0, %v3370_v50 }
 0x80f   :  { %v3442_v56 = vmul.f32 3.8918573e-05, %v6892_v23  ;;  %v6898_v19 = vadd.f32 %v6800_v40, %v3202_v60  ;;  %v3431_v53 = vmul.f32 2.1237322e-06, %v6892_v23  ;;  %v3407_v61 = vadd.f32 0.112945676, %v3406_v51 }
 0x810   :  { %v3095_v24 = vpop.f32.mrf.mxu1  ;;  %4557 = vrcp.f32 %v6900_v27  ;;  %v3396_v0 = vadd.f32 0.05243302, %v3395_v55  ;;  %v3383_v13 = vand.u32 2147483648, %v6900_v27  ;;  %vm3377_vm9 = vweird.f32 %v6900_v27 }
 0x811   :  { %v3443_v38 = vadd.f32 0.001143296, %v3442_v56  ;;  %v6907_v57 = vmul.f32 %v6802_v14, %v6898_v19  ;;  %v3096_v62 = vadd.f32 %v6706_v25, %v3095_v24  ;;  %v3408_v58 = vmul.f32 %v3407_v61, %v6872_v3 }
 0x812   :  { %v3432_v11 = vadd.f32 0.00028619796, %v3431_v53  ;;  %v3397_v35 = vmul.f32 %v3396_v0, %v6872_v3  ;;  %v3381_v55 = vand.u32 2147483647, %v6900_v27 }
 0x813   :  { %v3444_v12 = vmul.f32 %v3443_v38, %v6892_v23  ;;  %v3469_v30 = vmul.f32 %v6907_v57, %v6907_v57  ;;  %v3409_v41 = vadd.f32 0.4994258, %v3408_v58  ;;  %v6924_v37 = vadd.f32 %v4594_v2, %v3096_v62  ;;  %v4595_v2 = vld [vmem:[%s7386_s0 + $0x58] sm:$0xff] }
 0x814   :  { %v3433_v29 = vmul.f32 %v3432_v11, %v6892_v23  ;;  %v3398_v60 = vadd.f32 0.18741608, %v3397_v35  ;;  %v3360_v58 = vadd.f32 1.1283791, %v3359_v21  ;;  %vm3382_vm11 = vcmp.eq.f32.partialorder %v3381_v55, 8.507059e+37 }
 0x815   :  { %v3445_v26 = vadd.f32 0.014752088, %v3444_v12  ;;  %v6926_v9 = vmin.f32 %v3469_v30, 16.0  ;;  %v3410_v44 = vmul.f32 %v3409_v41, %v6872_v3  ;;  %v3133_v17 = vpack.c.bf16 %v6924_v37, %v6919_v36 }
 0x816   :  { %v4558_v48 = vpop.eup %4557  ;;  %v3434_v50 = vadd.f32 0.0036580483, %v3433_v29  ;;  %v3399_v0 = vmul.f32 %v3398_v60, %v6872_v3  ;;  %v3384_v41 = vor.u32 1.1754944e-38, %v3383_v13  ;;  %v4596_v3 = vld [vmem:[%s7386_s0 + $0x50] sm:$0xff]  ;;  %v3361_v29 = vmul.f32 %v3360_v58, %v6851_v8 }
 0x817   :  { %v3446_v18 = vmul.f32 %v3445_v26, %v6892_v23  ;;  %v3471_v16 = vmul.f32 2.1237322e-06, %v6926_v9  ;;  %v3373_v20 = vmul.f32 %v4558_v48, %v6900_v27  ;;  %v6936_v34 = vadd.f32 1.0, %v3410_v44  ;;  %4210 = vmatmul.msk.bf16.gmra.mxu3 %vm77_vm0, %v3133_v17 }
 0x818   :  { %v3098_v1 = vpop.f32.mrf.mxu1  ;;  %v3482_v59 = vmul.f32 3.8918573e-05, %v6926_v9  ;;  %vm3378_vm6 = vweird.f32 %v4558_v48  ;;  %v3435_v11 = vmul.f32 %v3434_v50, %v6892_v23 }
 0x819   :  { %v3447_v32 = vadd.f32 0.112945676, %v3446_v18  ;;  %v3374_v4 = vsub.f32 1.0, %v3373_v20  ;;  %4559 = vrcp.f32 %v6936_v34  ;;  %v3472_v33 = vadd.f32 0.00028619796, %v3471_v16  ;;  %vm3379_vm10 = vmor %vm3377_vm9, %vm3378_vm6 }
 0x81a   :  { %v3483_v51 = vadd.f32 0.001143296, %v3482_v59  ;;  %v3099_v49 = vadd.f32 %v6706_v25, %v3098_v1  ;;  %v3400_v18 = vadd.f32 1.1283791, %v3399_v0  ;;  %v3436_v20 = vadd.f32 0.05243302, %v3435_v11 }
 0x81b   :  { %v3448_v56 = vmul.f32 %v3447_v32, %v6892_v23  ;;  %v3375_v24 = vmul.f32 %v4558_v48, %v3374_v4  ;;  %v3473_v54 = vmul.f32 %v3472_v33, %v6926_v9  ;;  %v3421_v59 = vand.u32 2147483647, %v6936_v34 }
 0x81c   :  { %v3484_v62 = vmul.f32 %v3483_v51, %v6926_v9  ;;  %v6962_v22 = vadd.f32 %v4596_v3, %v3099_v49  ;;  %v3423_v32 = vand.u32 2147483648, %v6936_v34  ;;  %vm3417_vm13 = vweird.f32 %v6936_v34 }
 0x81d   :  { %v3449_v53 = vadd.f32 0.4994258, %v3448_v56  ;;  %v3376_v38 = vadd.f32 %v4558_v48, %v3375_v24  ;;  %v3401_v24 = vmul.f32 %v3400_v18, %v6866_v39  ;;  %v3437_v51 = vmul.f32 %v3436_v20, %v6892_v23 }
 0x81e   :  { %v3485_v6 = vadd.f32 0.014752088, %v3484_v62  ;;  %v3424_v13 = vor.u32 1.1754944e-38, %v3423_v32  ;;  %vm3422_vm1 = vcmp.eq.f32.partialorder %v3421_v59, 8.507059e+37 }
 0x81f   :  { %v3450_v12 = vmul.f32 %v3449_v53, %v6892_v23  ;;  %v4560_v27 = vpop.eup %4559  ;;  %v3380_v30 = vsel %vm3379_vm10, %v4558_v48, %v3376_v38  ;;  %v3474_v48 = vadd.f32 0.0036580483, %v3473_v54 }
 0x820   :  { %v3100_v61 = vpop.f32.mrf.mxu1  ;;  %v3413_v1 = vmul.f32 %v4560_v27, %v6936_v34  ;;  %v3385_v44 = vsel %vm3382_vm11, %v3384_v41, %v3380_v30  ;;  %v3486_v35 = vmul.f32 %v3485_v6, %v6926_v9  ;;  %vm3418_vm12 = vweird.f32 %v4560_v27 }
 0x821   :  { %v3101_v7 = vadd.f32 %v6706_v25, %v3100_v61  ;;  %v6964_v17 = vadd.f32 1.0, %v3450_v12  ;;  %v3386_v33 = vmul.f32 %v3385_v44, %v3361_v29  ;;  %v3475_v50 = vmul.f32 %v3474_v48, %v6926_v9  ;;  %vm3419_vm2 = vmor %vm3417_vm13, %vm3418_vm12 }
 0x822   :  { %v3414_v16 = vsub.f32 1.0, %v3413_v1  ;;  %v3487_v60 = vadd.f32 0.112945676, %v3486_v35  ;;  %v3232_v41 = vmul.f32 0.5, %v6847_v31 }
 0x823   :  { %v6956_v26 = vadd.f32 %v4595_v2, %v3101_v7  ;;  %4561 = vrcp.f32 %v6964_v17  ;;  %v4216_v55 = vclamps-f32 %v3386_v33, 1.0  ;;  %v3476_v54 = vadd.f32 0.05243302, %v3475_v50 }
 0x824   :  { %v3415_v21 = vmul.f32 %v4560_v27, %v3414_v16  ;;  %v3488_v8 = vmul.f32 %v3487_v60, %v6926_v9  ;;  %v3438_v7 = vadd.f32 0.18741608, %v3437_v51  ;;  %v3463_v29 = vand.u32 2147483648, %v6964_v17 }
 0x825   :  { %v3134_v4 = vpack.c.bf16 %v6956_v26, %v6962_v22  ;;  %v3911_v39 = vadd.f32 1.0, %v4216_v55  ;;  %v3477_v12 = vmul.f32 %v3476_v54, %v6926_v9  ;;  %vm3457_vm14 = vweird.f32 %v6964_v17 }
 0x826   :  { %v3416_v56 = vadd.f32 %v4560_v27, %v3415_v21  ;;  %v3489_v49 = vadd.f32 0.4994258, %v3488_v8  ;;  %v3439_v1 = vmul.f32 %v3438_v7, %v6892_v23  ;;  %v3461_v16 = vand.u32 2147483647, %v6964_v17 }
 0x827   :  { %4211 = vmatmul.msk.bf16.gmra.mxu3 %vm77_vm0, %v3134_v4  ;;  %v3927_v3 = vmul.f32 %v3911_v39, %v3232_v41  ;;  %v3478_v18 = vadd.f32 0.18741608, %v3477_v12  ;;  %v3464_v23 = vor.u32 1.1754944e-38, %v3463_v29  ;;  %v3234_v41 = vmul.f32 0.5, %v6877_v5  ;;  %v4599_v5 = vld [vmem:[%s7386_s0 + $0x70] sm:$0xff] }
 0x828   :  { %v3420_v53 = vsel %vm3419_vm2, %v4560_v27, %v3416_v56  ;;  %v3490_v58 = vmul.f32 %v3489_v49, %v6926_v9  ;;  %v3233_v27 = vmul.f32 0.5, %v6861_v47  ;;  %v3440_v47 = vadd.f32 1.1283791, %v3439_v1 }
 0x829   :  { %v4562_v61 = vpop.eup %4561  ;;  %v3425_v38 = vsel %vm3422_vm1, %v3424_v13, %v3420_v53  ;;  %v3479_v32 = vmul.f32 %v3478_v18, %v6926_v9  ;;  %vm3462_vm3 = vcmp.eq.f32.partialorder %v3461_v16, 8.507059e+37  ;;  %v4597_v9 = vld [vmem:[%s7386_s0 + $0x60] sm:$0xff]  ;;  %v4600_v16 = vld [vmem:[%s7386_s0 + $0x78] sm:$0xff] }
 0x82a   :  { %v3426_v62 = vmul.f32 %v3425_v38, %v3401_v24  ;;  %v3453_v34 = vmul.f32 %v4562_v61, %v6964_v17  ;;  %v3491_v30 = vadd.f32 1.0, %v3490_v58  ;;  %vm3458_vm7 = vweird.f32 %v4562_v61 }
 0x82b   :  { %vm3459_vm15 = vmor %vm3457_vm14, %vm3458_vm7  ;;  %v3441_v60 = vmul.f32 %v3440_v47, %v6884_v10  ;;  %v3480_v8 = vadd.f32 1.1283791, %v3479_v32  ;;  %v4598_v10 = vld [vmem:[%s7386_s0 + $0x68] sm:$0xff] }
 0x82c   :  { %v4217_v0 = vclamps-f32 %v3426_v62, 1.0  ;;  %v3454_v11 = vsub.f32 1.0, %v3453_v34  ;;  %4563 = vrcp.f32 %v3491_v30  ;;  %v3503_v17 = vand.u32 2147483648, %v3491_v30 }
 0x82d   :  { %v3501_v55 = vand.u32 2147483647, %v3491_v30  ;;  %vm3497_vm5 = vweird.f32 %v3491_v30  ;;  %v3481_v34 = vmul.f32 %v3480_v8, %v6907_v57 }
 0x82e   :  { %v3912_v6 = vadd.f32 1.0, %v4217_v0  ;;  %v3455_v2 = vmul.f32 %v4562_v61, %v3454_v11  ;;  %v3504_v38 = vor.u32 1.1754944e-38, %v3503_v17 }
 0x82f   :  { %vm3502_vm6 = vcmp.eq.f32.partialorder %v3501_v55, 8.507059e+37 }
 0x830   :  { %v3928_v44 = vmul.f32 %v3912_v6, %v3233_v27  ;;  %v3456_v48 = vadd.f32 %v4562_v61, %v3455_v2 }
 0x832   :  { %v3942_v31 = vpack.c.bf16 %v3928_v44, %v3927_v3  ;;  %v3460_v20 = vsel %vm3459_vm15, %v4562_v61, %v3456_v48  ;;  %v4564_v59 = vpop.eup %4563 }
 0x833   :  { %v3493_v4 = vmul.f32 %v4564_v59, %v3491_v30  ;;  %v3465_v33 = vsel %vm3462_vm3, %v3464_v23, %v3460_v20  ;;  %vm3498_vm4 = vweird.f32 %v4564_v59  ;;  %v3235_v30 = vmul.f32 0.5, %v6898_v19 }
 0x834   :  { %v3103_v35 = vpop.f32.mrf.mxu1  ;;  %4030 = vmatmul.bf16.gmra.mxu0 %v3942_v31  ;;  %v3466_v13 = vmul.f32 %v3465_v33, %v3441_v60  ;;  %vm3499_vm8 = vmor %vm3497_vm5, %vm3498_vm4 }
 0x835   :  { %v3104_v21 = vadd.f32 %v6706_v25, %v3103_v35  ;;  %v3494_v50 = vsub.f32 1.0, %v3493_v4 }
 0x836   :  { %v4218_v62 = vclamps-f32 %v3466_v13, 1.0 }
 0x837   :  { %v3495_v51 = vmul.f32 %v4564_v59, %v3494_v50  ;;  %v6995_v53 = vadd.f32 %v4597_v9, %v3104_v21 }
 0x838   :  { %v3913_v11 = vadd.f32 1.0, %v4218_v62 }
 0x839   :  { %v3496_v61 = vadd.f32 %v4564_v59, %v3495_v51 }
 0x83a   :  { %v3929_v6 = vmul.f32 %v3913_v11, %v3234_v41 }
 0x83b   :  { %v3500_v7 = vsel %vm3499_vm8, %v4564_v59, %v3496_v61 }
 0x83c   :  { %v3105_v56 = vpop.f32.mrf.mxu1  ;;  %v3505_v58 = vsel %vm3502_vm6, %v3504_v38, %v3500_v7 }
 0x83d   :  { %v3106_v24 = vadd.f32 %v6706_v25, %v3105_v56  ;;  %v3506_v39 = vmul.f32 %v3505_v58, %v3481_v34 }
 0x83f   :  { %v7000_v49 = vadd.f32 %v4598_v10, %v3106_v24  ;;  %v4219_v12 = vclamps-f32 %v3506_v39, 1.0 }
 0x841   :  { %v3135_v54 = vpack.c.bf16 %v7000_v49, %v6995_v53  ;;  %v3914_v27 = vadd.f32 1.0, %v4219_v12 }
 0x843   :  { %4212 = vmatmul.msk.bf16.gmra.mxu3 %vm77_vm0, %v3135_v54  ;;  %v3930_v2 = vmul.f32 %v3914_v27, %v3235_v30 }
 0x844   :  { %v3108_v0 = vpop.f32.mrf.mxu1 }
 0x845   :  { %v3109_v3 = vadd.f32 %v6706_v25, %v3108_v0  ;;  %v3943_v44 = vpack.c.bf16 %v3930_v2, %v3929_v6 }
 0x847   :  { %4035 = vmatmul.bf16.gmra.mxu0 %v3943_v44  ;;  %v7020_v19 = vadd.f32 %v4599_v5, %v3109_v3 }
 0x84a   :  { %v3205_v1 = vpop.f32.mrf.mxu3 }
 0x84b   :  { %v7010_v57 = vadd.f32 %v6800_v40, %v3205_v1 }
 0x84c   :  { %v3110_v48 = vpop.f32.mrf.mxu1 }
 0x84d   :  { %v7014_v35 = vmul.f32 %v6802_v14, %v7010_v57  ;;  %v3111_v29 = vadd.f32 %v6706_v25, %v3110_v48 }
 0x84f   :  { %v3509_v18 = vmul.f32 %v7014_v35, %v7014_v35  ;;  %v7027_v31 = vadd.f32 %v4600_v16, %v3111_v29 }
 0x851   :  { %v3510_v47 = vmin.f32 %v3509_v18, 16.0  ;;  %v3136_v25 = vpack.c.bf16 %v7027_v31, %v7020_v19 }
 0x852   :  { %v3207_v20 = vpop.f32.mrf.mxu3 }
 0x853   :  { %v3511_v59 = vmul.f32 2.1237322e-06, %v3510_v47  ;;  %v3522_v23 = vmul.f32 3.8918573e-05, %v3510_v47  ;;  %v7032_v32 = vadd.f32 %v6800_v40, %v3207_v20  ;;  %4213 = vmatmul.msk.bf16.gmra.mxu3 %vm77_vm0, %v3136_v25 }
 0x855   :  { %v3512_v4 = vadd.f32 0.00028619796, %v3511_v59  ;;  %v3523_v33 = vadd.f32 0.001143296, %v3522_v23  ;;  %v7037_v21 = vmul.f32 %v6802_v14, %v7032_v32 }
 0x857   :  { %v3524_v60 = vmul.f32 %v3523_v33, %v3510_v47  ;;  %v3549_v50 = vmul.f32 %v7037_v21, %v7037_v21  ;;  %v3513_v56 = vmul.f32 %v3512_v4, %v3510_v47 }
 0x859   :  { %v3525_v8 = vadd.f32 0.014752088, %v3524_v60  ;;  %v3550_v17 = vmin.f32 %v3549_v50, 16.0  ;;  %v3514_v55 = vadd.f32 0.0036580483, %v3513_v56 }
 0x85b   :  { %v3526_v24 = vmul.f32 %v3525_v8, %v3510_v47  ;;  %v3551_v13 = vmul.f32 2.1237322e-06, %v3550_v17  ;;  %v3562_v51 = vmul.f32 3.8918573e-05, %v3550_v17  ;;  %v3515_v34 = vmul.f32 %v3514_v55, %v3510_v47 }
 0x85d   :  { %v3527_v9 = vadd.f32 0.112945676, %v3526_v24  ;;  %v3552_v10 = vadd.f32 0.00028619796, %v3551_v13  ;;  %v3563_v61 = vadd.f32 0.001143296, %v3562_v51 }
 0x85e   :  { %v3516_v12 = vadd.f32 0.05243302, %v3515_v34 }
 0x85f   :  { %v3528_v38 = vmul.f32 %v3527_v9, %v3510_v47  ;;  %v3553_v54 = vmul.f32 %v3552_v10, %v3550_v17  ;;  %v3564_v62 = vmul.f32 %v3563_v61, %v3550_v17 }
 0x860   :  { %v3517_v2 = vmul.f32 %v3516_v12, %v3510_v47 }
 0x861   :  { %v3529_v7 = vadd.f32 0.4994258, %v3528_v38  ;;  %v3554_v58 = vadd.f32 0.0036580483, %v3553_v54  ;;  %v3565_v39 = vadd.f32 0.014752088, %v3564_v62 }
 0x862   :  { %v3518_v29 = vadd.f32 0.18741608, %v3517_v2 }
 0x863   :  { %v3530_v0 = vmul.f32 %v3529_v7, %v3510_v47  ;;  %v3566_v11 = vmul.f32 %v3565_v39, %v3550_v17  ;;  %v3555_v30 = vmul.f32 %v3554_v58, %v3550_v17 }
 0x864   :  { %v3519_v20 = vmul.f32 %v3518_v29, %v3510_v47 }
 0x865   :  { %v3531_v41 = vadd.f32 1.0, %v3530_v0  ;;  %v3567_v27 = vadd.f32 0.112945676, %v3566_v11  ;;  %v3556_v1 = vadd.f32 0.05243302, %v3555_v30  ;;  %v3237_v30 = vmul.f32 0.5, %v7032_v32 }
 0x866   :  { %v3520_v50 = vadd.f32 1.1283791, %v3519_v20 }
 0x867   :  { %4565 = vrcp.f32 %v3531_v41  ;;  %v3568_v6 = vmul.f32 %v3567_v27, %v3550_v17  ;;  %v3557_v18 = vmul.f32 %v3556_v1, %v3550_v17  ;;  %v3543_v23 = vand.u32 2147483648, %v3531_v41  ;;  %v7048_v1 = vld [vmem:[%s7393_s8] ss:$0 sm:$0xff] }
 0x868   :  { %v3541_v33 = vand.u32 2147483647, %v3531_v41  ;;  %vm3537_vm10 = vweird.f32 %v3531_v41  ;;  %v3521_v9 = vmul.f32 %v3520_v50, %v7014_v35 }
 0x869   :  { %v3569_v3 = vadd.f32 0.4994258, %v3568_v6  ;;  %v3558_v4 = vadd.f32 0.18741608, %v3557_v18  ;;  %v3544_v24 = vor.u32 1.1754944e-38, %v3543_v23 }
 0x86a   :  { %vm3542_vm12 = vcmp.eq.f32.partialorder %v3541_v33, 8.507059e+37 }
 0x86b   :  { %v3570_v44 = vmul.f32 %v3569_v3, %v3550_v17  ;;  %v3559_v13 = vmul.f32 %v3558_v4, %v3550_v17 }
 0x86d   :  { %v4566_v48 = vpop.eup %4565  ;;  %v3571_v16 = vadd.f32 1.0, %v3570_v44  ;;  %v3560_v47 = vadd.f32 1.1283791, %v3559_v13 }
 0x86e   :  { %v3533_v5 = vmul.f32 %v4566_v48, %v3531_v41  ;;  %vm3538_vm9 = vweird.f32 %v4566_v48  ;;  %v3236_v41 = vmul.f32 0.5, %v7010_v57 }
 0x86f   :  { %4567 = vrcp.f32 %v3571_v16  ;;  %vm3539_vm11 = vmor %vm3537_vm10, %vm3538_vm9  ;;  %v3583_v61 = vand.u32 2147483648, %v3571_v16  ;;  %v3581_v62 = vand.u32 2147483647, %v3571_v16  ;;  %vm3577_vm2 = vweird.f32 %v3571_v16 }
 0x870   :  { %v3534_v25 = vsub.f32 1.0, %v3533_v5  ;;  %v3561_v39 = vmul.f32 %v3560_v47, %v7037_v21 }
 0x871   :  { %v3584_v7 = vor.u32 1.1754944e-38, %v3583_v61  ;;  %vm3582_vm7 = vcmp.eq.f32.partialorder %v3581_v62, 8.507059e+37 }
 0x872   :  { %v3535_v59 = vmul.f32 %v4566_v48, %v3534_v25 }
 0x874   :  { %v3536_v60 = vadd.f32 %v4566_v48, %v3535_v59 }
 0x875   :  { %v4568_v56 = vpop.eup %4567 }
 0x876   :  { %v3540_v8 = vsel %vm3539_vm11, %v4566_v48, %v3536_v60  ;;  %v3573_v51 = vmul.f32 %v4568_v56, %v3571_v16  ;;  %vm3578_vm13 = vweird.f32 %v4568_v56 }
 0x877   :  { %v3545_v55 = vsel %vm3542_vm12, %v3544_v24, %v3540_v8  ;;  %vm3579_vm1 = vmor %vm3577_vm2, %vm3578_vm13 }
 0x878   :  { %v3574_v10 = vsub.f32 1.0, %v3573_v51  ;;  %v3546_v38 = vmul.f32 %v3545_v55, %v3521_v9 }
 0x87a   :  { %v3575_v54 = vmul.f32 %v4568_v56, %v3574_v10  ;;  %v4220_v58 = vclamps-f32 %v3546_v38, 1.0 }
 0x87c   :  { %v3576_v34 = vadd.f32 %v4568_v56, %v3575_v54  ;;  %v3915_v12 = vadd.f32 1.0, %v4220_v58 }
 0x87e   :  { %v3580_v17 = vsel %vm3579_vm1, %v4568_v56, %v3576_v34  ;;  %v3931_v6 = vmul.f32 %v3915_v12, %v3236_v41 }
 0x87f   :  { %v3585_v0 = vsel %vm3582_vm7, %v3584_v7, %v3580_v17 }
 0x880   :  { %v3586_v11 = vmul.f32 %v3585_v0, %v3561_v39 }
 0x882   :  { %v4221_v35 = vclamps-f32 %v3586_v11, 1.0 }
 0x884   :  { %v3916_v27 = vadd.f32 1.0, %v4221_v35 }
 0x886   :  { %v3932_v2 = vmul.f32 %v3916_v27, %v3237_v30 }
 0x888   :  { %v3944_v3 = vpack.c.bf16 %v3932_v2, %v3931_v6 }
 0x88a   :  { %4040 = vmatmul.bf16.gmra.mxu0 %v3944_v3 }
 0x88b   :  { %v4026_v21 = vpop.f32.mrf.mxu0 }
 0x88c   :  { %v4027_v44 = vadd.f32 %v7048_v1, %v4026_v21 }
 0x88e   :  { %v4066_v48 = vadd.f32 %v4027_v44, %v6715_v28 }
 0x890   :  { %4082 = vst.msk [vmem:[%s7394_s9] sm:$0xff] %vm77_vm0, %v4066_v48 }
 0x893   :  { %v4028_v57 = vpop.f32.mrf.mxu0 }
 0x894   :  { %v4029_v32 = vadd.f32 %v7048_v1, %v4028_v57 }
 0x896   :  { %v4067_v29 = vadd.f32 %v4029_v32, %v6720_v42 }
 0x898   :  { %4083 = vst.msk [vmem:[%s7394_s9 + $0x8] sm:$0xff] %vm77_vm0, %v4067_v29 }
 0x89a   :  { %v3210_v5 = vpop.f32.mrf.mxu3 }
 0x89b   :  { %v7063_v18 = vadd.f32 %v6800_v40, %v3210_v5 }
 0x89d   :  { %v7067_v28 = vmul.f32 %v6802_v14, %v7063_v18 }
 0x89f   :  { %v3589_v16 = vmul.f32 %v7067_v28, %v7067_v28 }
 0x8a1   :  { %v7071_v25 = vmin.f32 %v3589_v16, 16.0 }
 0x8a2   :  { %v3212_v20 = vpop.f32.mrf.mxu3 }
 0x8a3   :  { %v3591_v42 = vmul.f32 2.1237322e-06, %v7071_v25  ;;  %v3602_v59 = vmul.f32 3.8918573e-05, %v7071_v25  ;;  %v7076_v23 = vadd.f32 %v6800_v40, %v3212_v20 }
 0x8a5   :  { %v3592_v4 = vadd.f32 0.00028619796, %v3591_v42  ;;  %v3603_v33 = vadd.f32 0.001143296, %v3602_v59  ;;  %v7080_v60 = vmul.f32 %v6802_v14, %v7076_v23 }
 0x8a7   :  { %v3593_v50 = vmul.f32 %v3592_v4, %v7071_v25  ;;  %v3604_v56 = vmul.f32 %v3603_v33, %v7071_v25  ;;  %v3629_v8 = vmul.f32 %v7080_v60, %v7080_v60 }
 0x8a9   :  { %v3605_v24 = vadd.f32 0.014752088, %v3604_v56  ;;  %v7086_v13 = vmin.f32 %v3629_v8, 16.0  ;;  %v3594_v55 = vadd.f32 0.0036580483, %v3593_v50 }
 0x8aa   :  { %v3215_v51 = vpop.f32.mrf.mxu3 }
 0x8ab   :  { %v3606_v9 = vmul.f32 %v3605_v24, %v7071_v25  ;;  %v3631_v10 = vmul.f32 2.1237322e-06, %v7086_v13  ;;  %v3642_v47 = vmul.f32 3.8918573e-05, %v7086_v13  ;;  %v7092_v61 = vadd.f32 %v6800_v40, %v3215_v51 }
 0x8ac   :  { %v3595_v7 = vmul.f32 %v3594_v55, %v7071_v25 }
 0x8ad   :  { %v3607_v38 = vadd.f32 0.112945676, %v3606_v9  ;;  %v3632_v54 = vadd.f32 0.00028619796, %v3631_v10  ;;  %v3643_v62 = vadd.f32 0.001143296, %v3642_v47  ;;  %v7096_v34 = vmul.f32 %v6802_v14, %v7092_v61 }
 0x8ae   :  { %v3596_v2 = vadd.f32 0.05243302, %v3595_v7 }
 0x8af   :  { %v3608_v58 = vmul.f32 %v3607_v38, %v7071_v25  ;;  %v3633_v39 = vmul.f32 %v3632_v54, %v7086_v13  ;;  %v3644_v17 = vmul.f32 %v3643_v62, %v7086_v13  ;;  %v3669_v0 = vmul.f32 %v7096_v34, %v7096_v34 }
 0x8b1   :  { %v3609_v11 = vadd.f32 0.4994258, %v3608_v58  ;;  %v3634_v12 = vadd.f32 0.0036580483, %v3633_v39  ;;  %v4031_v35 = vpop.f32.mrf.mxu0  ;;  %v3645_v41 = vadd.f32 0.014752088, %v3644_v17 }
 0x8b2   :  { %v7104_v30 = vmin.f32 %v3669_v0, 16.0  ;;  %v4032_v27 = vadd.f32 %v7048_v1, %v4031_v35  ;;  %v3217_v6 = vpop.f32.mrf.mxu3 }
 0x8b3   :  { %v3610_v3 = vmul.f32 %v3609_v11, %v7071_v25  ;;  %v3635_v21 = vmul.f32 %v3634_v12, %v7086_v13  ;;  %v7110_v44 = vadd.f32 %v6800_v40, %v3217_v6  ;;  %v3646_v48 = vmul.f32 %v3645_v41, %v7086_v13 }
 0x8b4   :  { %v3671_v57 = vmul.f32 2.1237322e-06, %v7104_v30  ;;  %v3682_v32 = vmul.f32 3.8918573e-05, %v7104_v30  ;;  %v4068_v29 = vadd.f32 %v4032_v27, %v6734_v63  ;;  %v3597_v40 = vmul.f32 %v3596_v2, %v7071_v25 }
 0x8b5   :  { %v7116_v5 = vadd.f32 1.0, %v3610_v3  ;;  %v3647_v16 = vadd.f32 0.112945676, %v3646_v48  ;;  %v7120_v59 = vmul.f32 %v6802_v14, %v7110_v44  ;;  %v3636_v4 = vadd.f32 0.05243302, %v3635_v21 }
 0x8b6   :  { %v3672_v20 = vadd.f32 0.00028619796, %v3671_v57  ;;  %v3683_v42 = vadd.f32 0.001143296, %v3682_v32  ;;  %4084 = vst.msk [vmem:[%s7394_s9 + $0x10] sm:$0xff] %vm77_vm0, %v4068_v29 }
 0x8b7   :  { %4569 = vrcp.f32 %v7116_v5  ;;  %v3648_v63 = vmul.f32 %v3647_v16, %v7086_v13  ;;  %v3709_v56 = vmul.f32 %v7120_v59, %v7120_v59  ;;  %v3598_v55 = vadd.f32 0.18741608, %v3597_v40 }
 0x8b8   :  { %v3673_v33 = vmul.f32 %v3672_v20, %v7104_v30  ;;  %v3684_v50 = vmul.f32 %v3683_v42, %v7104_v30  ;;  %v3637_v47 = vmul.f32 %v3636_v4, %v7086_v13  ;;  %v3623_v6 = vand.u32 2147483648, %v7116_v5 }
 0x8b9   :  { %v4033_v8 = vpop.f32.mrf.mxu0  ;;  %v3649_v24 = vadd.f32 0.4994258, %v3648_v63  ;;  %v7134_v10 = vmin.f32 %v3709_v56, 16.0  ;;  %v3599_v12 = vmul.f32 %v3598_v55, %v7071_v25  ;;  %vm3617_vm15 = vweird.f32 %v7116_v5 }
 0x8ba   :  { %v4034_v51 = vadd.f32 %v7048_v1, %v4033_v8  ;;  %v3685_v9 = vadd.f32 0.014752088, %v3684_v50  ;;  %v3674_v7 = vadd.f32 0.0036580483, %v3673_v33  ;;  %v3638_v27 = vadd.f32 0.18741608, %v3637_v47 }
 0x8bb   :  { %v3650_v38 = vmul.f32 %v3649_v24, %v7086_v13  ;;  %v3711_v39 = vmul.f32 2.1237322e-06, %v7134_v10  ;;  %v3722_v11 = vmul.f32 3.8918573e-05, %v7134_v10  ;;  %v3600_v29 = vadd.f32 1.1283791, %v3599_v12 }
 0x8bc   :  { %v4069_v54 = vadd.f32 %v4034_v51, %v6739_v43  ;;  %v3686_v58 = vmul.f32 %v3685_v9, %v7104_v30  ;;  %v3675_v2 = vmul.f32 %v3674_v7, %v7104_v30  ;;  %v3621_v25 = vand.u32 2147483647, %v7116_v5  ;;  %v7163_v50 = vld [vmem:[%s7391_s6] ss:$0 sm:$0xff] }
 0x8bd   :  { %v4570_v62 = vpop.eup %4569  ;;  %v7142_v0 = vadd.f32 1.0, %v3650_v38  ;;  %v3712_v35 = vadd.f32 0.00028619796, %v3711_v39  ;;  %v3723_v57 = vadd.f32 0.001143296, %v3722_v11  ;;  %v3639_v42 = vmul.f32 %v3638_v27, %v7086_v13 }
 0x8be   :  { %v3613_v17 = vmul.f32 %v4570_v62, %v7116_v5  ;;  %4085 = vst.msk [vmem:[%s7394_s9 + $0x18] sm:$0xff] %vm77_vm0, %v4069_v54  ;;  %v3687_v43 = vadd.f32 0.112945676, %v3686_v58  ;;  %vm3618_vm14 = vweird.f32 %v4570_v62  ;;  %v3624_v63 = vor.u32 1.1754944e-38, %v3623_v6 }
 0x8bf   :  { %4571 = vrcp.f32 %v7142_v0  ;;  %v3713_v48 = vmul.f32 %v3712_v35, %v7134_v10  ;;  %v3724_v4 = vmul.f32 %v3723_v57, %v7134_v10  ;;  %vm3619_vm3 = vmor %vm3617_vm15, %vm3618_vm14  ;;  %v3676_v24 = vadd.f32 0.05243302, %v3675_v2 }
 0x8c0   :  { %v3614_v41 = vsub.f32 1.0, %v3613_v17  ;;  %v3688_v3 = vmul.f32 %v3687_v43, %v7104_v30  ;;  %v3601_v55 = vmul.f32 %v3600_v29, %v7067_v28  ;;  %vm3622_vm4 = vcmp.eq.f32.partialorder %v3621_v25, 8.507059e+37 }
 0x8c1   :  { %v3714_v40 = vadd.f32 0.0036580483, %v3713_v48  ;;  %v3725_v51 = vadd.f32 0.014752088, %v3724_v4  ;;  %v3640_v54 = vadd.f32 1.1283791, %v3639_v42  ;;  %v3677_v43 = vmul.f32 %v3676_v24, %v7104_v30 }
 0x8c2   :  { %v3615_v21 = vmul.f32 %v4570_v62, %v3614_v41  ;;  %v3689_v16 = vadd.f32 0.4994258, %v3688_v3  ;;  %v3661_v28 = vand.u32 2147483647, %v7142_v0  ;;  %v3663_v12 = vand.u32 2147483648, %v7142_v0 }
 0x8c3   :  { %v3715_v13 = vmul.f32 %v3714_v40, %v7134_v10  ;;  %v3726_v58 = vmul.f32 %v3725_v51, %v7134_v10  ;;  %v3641_v2 = vmul.f32 %v3640_v54, %v7080_v60  ;;  %vm3657_vm8 = vweird.f32 %v7142_v0 }
 0x8c4   :  { %v3616_v20 = vadd.f32 %v4570_v62, %v3615_v21  ;;  %v3690_v33 = vmul.f32 %v3689_v16, %v7104_v30  ;;  %v4036_v47 = vpop.f32.mrf.mxu0  ;;  %vm3662_vm9 = vcmp.eq.f32.partialorder %v3661_v28, 8.507059e+37  ;;  %v3664_v29 = vor.u32 1.1754944e-38, %v3663_v12 }
 0x8c5   :  { %v4572_v5 = vpop.eup %4571  ;;  %v3716_v17 = vadd.f32 0.05243302, %v3715_v13  ;;  %v3727_v6 = vadd.f32 0.112945676, %v3726_v58  ;;  %v3678_v25 = vadd.f32 0.18741608, %v3677_v43 }
 0x8c6   :  { %v3220_v32 = vpop.f32.mrf.mxu3  ;;  %v3620_v8 = vsel %vm3619_vm3, %v4570_v62, %v3616_v20  ;;  %v3653_v9 = vmul.f32 %v4572_v5, %v7142_v0  ;;  %v7171_v7 = vadd.f32 1.0, %v3690_v33  ;;  %v4037_v62 = vadd.f32 %v7048_v1, %v4036_v47 }
 0x8c7   :  { %v7166_v56 = vadd.f32 %v7163_v50, %v3220_v32  ;;  %v3625_v38 = vsel %vm3622_vm4, %v3624_v63, %v3620_v8  ;;  %vm3658_vm5 = vweird.f32 %v4572_v5  ;;  %v3717_v57 = vmul.f32 %v3716_v17, %v7134_v10 }
 0x8c8   :  { %v3654_v39 = vsub.f32 1.0, %v3653_v9  ;;  %4573 = vrcp.f32 %v7171_v7  ;;  %v3626_v41 = vmul.f32 %v3625_v38, %v3601_v55  ;;  %v4070_v3 = vadd.f32 %v4037_v62, %v6752_v52  ;;  %vm3659_vm6 = vmor %vm3657_vm8, %vm3658_vm5 }
 0x8c9   :  { %v7177_v11 = vmul.f32 %v6802_v14, %v7166_v56  ;;  %v3728_v32 = vmul.f32 %v3727_v6, %v7134_v10  ;;  %v3238_v24 = vmul.f32 0.5, %v7063_v18  ;;  %v3718_v55 = vadd.f32 0.18741608, %v3717_v57 }
 0x8ca   :  { %v3655_v27 = vmul.f32 %v4572_v5, %v3654_v39  ;;  %4086 = vst.msk [vmem:[%s7394_s9 + $0x20] sm:$0xff] %vm77_vm0, %v4070_v3  ;;  %v4222_v60 = vclamps-f32 %v3626_v41, 1.0  ;;  %v3239_v39 = vmul.f32 0.5, %v7076_v23  ;;  %v3703_v3 = vand.u32 2147483648, %v7171_v7 }
 0x8cb   :  { %v3749_v21 = vmul.f32 %v7177_v11, %v7177_v11  ;;  %v3729_v20 = vadd.f32 0.4994258, %v3728_v32  ;;  %v3719_v23 = vmul.f32 %v3718_v55, %v7134_v10  ;;  %vm3697_vm11 = vweird.f32 %v7171_v7 }
 0x8cc   :  { %v3656_v48 = vadd.f32 %v4572_v5, %v3655_v27  ;;  %v4038_v42 = vpop.f32.mrf.mxu0  ;;  %v3917_v58 = vadd.f32 1.0, %v4222_v60  ;;  %v3701_v27 = vand.u32 2147483647, %v7171_v7 }
 0x8cd   :  { %v7194_v52 = vmin.f32 %v3749_v21, 16.0  ;;  %v4039_v8 = vadd.f32 %v7048_v1, %v4038_v42  ;;  %v3730_v9 = vmul.f32 %v3729_v20, %v7134_v10  ;;  %v3704_v42 = vor.u32 1.1754944e-38, %v3703_v3 }
 0x8ce   :  { %v3222_v35 = vpop.f32.mrf.mxu3  ;;  %v3660_v16 = vsel %vm3659_vm6, %v4572_v5, %v3656_v48  ;;  %v4574_v40 = vpop.eup %4573  ;;  %v3679_v5 = vmul.f32 %v3678_v25, %v7104_v30  ;;  %v3933_v48 = vmul.f32 %v3917_v58, %v3238_v24  ;;  %vm3702_vm13 = vcmp.eq.f32.partialorder %v3701_v27, 8.507059e+37 }
 0x8cf   :  { %v7197_v0 = vadd.f32 %v7163_v50, %v3222_v35  ;;  %v3665_v4 = vsel %vm3662_vm9, %v3664_v29, %v3660_v16  ;;  %v3751_v63 = vmul.f32 2.1237322e-06, %v7194_v52  ;;  %v3762_v33 = vmul.f32 3.8918573e-05, %v7194_v52 }
 0x8d0   :  { %v3666_v13 = vmul.f32 %v3665_v4, %v3641_v2  ;;  %v3693_v51 = vmul.f32 %v4574_v40, %v7171_v7  ;;  %v4071_v38 = vadd.f32 %v4039_v8, %v6757_v46  ;;  %v7208_v28 = vadd.f32 1.0, %v3730_v9 }
 0x8d1   :  { %v3763_v47 = vadd.f32 0.001143296, %v3762_v33  ;;  %v3752_v18 = vadd.f32 0.00028619796, %v3751_v63  ;;  %v7217_v30 = vmul.f32 %v6802_v14, %v7197_v0  ;;  %v3680_v41 = vadd.f32 1.1283791, %v3679_v5 }
 0x8d2   :  { %v4223_v17 = vclamps-f32 %v3666_v13, 1.0  ;;  %v3694_v62 = vsub.f32 1.0, %v3693_v51  ;;  %4087 = vst.msk [vmem:[%s7394_s9 + $0x28] sm:$0xff] %vm77_vm0, %v4071_v38  ;;  %vm3698_vm10 = vweird.f32 %v4574_v40  ;;  %4575 = vrcp.f32 %v7208_v28 }
 0x8d3   :  { %v3764_v12 = vmul.f32 %v3763_v47, %v7194_v52  ;;  %v3753_v57 = vmul.f32 %v3752_v18, %v7194_v52  ;;  %v3789_v10 = vmul.f32 %v7217_v30, %v7217_v30  ;;  %vm7230_vm12 = vmor %vm3697_vm11, %vm3698_vm10  ;;  %v3720_v29 = vadd.f32 1.1283791, %v3719_v23 }
 0x8d4   :  { %v3918_v46 = vadd.f32 1.0, %v4223_v17  ;;  %v3695_v43 = vmul.f32 %v4574_v40, %v3694_v62  ;;  %v3681_v8 = vmul.f32 %v3680_v41, %v7096_v34  ;;  %vm3737_vm2 = vweird.f32 %v7208_v28 }
 0x8d5   :  { %v3765_v21 = vadd.f32 0.014752088, %v3764_v12  ;;  %v7241_v7 = vmin.f32 %v3789_v10, 16.0  ;;  %v3754_v24 = vadd.f32 0.0036580483, %v3753_v57  ;;  %v3721_v5 = vmul.f32 %v3720_v29, %v7120_v59 }
 0x8d6   :  { %v3225_v54 = vpop.f32.mrf.mxu3  ;;  %v3934_v6 = vmul.f32 %v3918_v46, %v3239_v39  ;;  %v3696_v2 = vadd.f32 %v4574_v40, %v3695_v43  ;;  %v3741_v39 = vand.u32 2147483647, %v7208_v28  ;;  %v3743_v17 = vand.u32 2147483648, %v7208_v28 }
 0x8d7   :  { %v7221_v35 = vadd.f32 %v7163_v50, %v3225_v54  ;;  %v3766_v25 = vmul.f32 %v3765_v21, %v7194_v52  ;;  %v3791_v13 = vmul.f32 2.1237322e-06, %v7241_v7  ;;  %v3802_v51 = vmul.f32 3.8918573e-05, %v7241_v7 }
 0x8d8   :  { %v3700_v16 = vsel %vm7230_vm12, %v4574_v40, %v3696_v2  ;;  %v3945_v20 = vpack.c.bf16 %v3934_v6, %v3933_v48  ;;  %v4576_v33 = vpop.eup %4575  ;;  %v3755_v59 = vmul.f32 %v3754_v24, %v7194_v52  ;;  %vm3742_vm7 = vcmp.eq.f32.partialorder %v3741_v39, 8.507059e+37 }
 0x8d9   :  { %v7237_v60 = vmul.f32 %v6802_v14, %v7221_v35  ;;  %v3767_v4 = vadd.f32 0.112945676, %v3766_v25  ;;  %v3705_v40 = vsel %vm3702_vm13, %v3704_v42, %v3700_v16  ;;  %v3733_v9 = vmul.f32 %v4576_v33, %v7208_v28 }
 0x8da   :  { %4045 = vmatmul.bf16.gmra.mxu0 %v3945_v20  ;;  %v3792_v38 = vadd.f32 0.00028619796, %v3791_v13  ;;  %v3803_v54 = vadd.f32 0.001143296, %v3802_v51  ;;  %v3706_v43 = vmul.f32 %v3705_v40, %v3681_v8  ;;  %vm3738_vm1 = vweird.f32 %v4576_v33 }
 0x8db   :  { %v3829_v63 = vmul.f32 %v7237_v60, %v7237_v60  ;;  %v3768_v47 = vmul.f32 %v3767_v4, %v7194_v52  ;;  %v3734_v34 = vsub.f32 1.0, %v3733_v9  ;;  %vm3739_vm14 = vmor %vm3737_vm2, %vm3738_vm1  ;;  %v3744_v57 = vor.u32 1.1754944e-38, %v3743_v17 }
 0x8dc   :  { %v3793_v12 = vmul.f32 %v3792_v38, %v7241_v7  ;;  %v3804_v46 = vmul.f32 %v3803_v54, %v7241_v7  ;;  %v3756_v10 = vadd.f32 0.05243302, %v3755_v59  ;;  %v4224_v25 = vclamps-f32 %v3706_v43, 1.0 }
 0x8dd   :  { %v7252_v58 = vmin.f32 %v3829_v63, 16.0  ;;  %v3769_v18 = vadd.f32 0.4994258, %v3768_v47  ;;  %v3735_v23 = vmul.f32 %v4576_v33, %v3734_v34  ;;  %v3240_v24 = vmul.f32 0.5, %v7092_v61 }
 0x8de   :  { %v3227_v55 = vpop.f32.mrf.mxu3  ;;  %v3794_v6 = vadd.f32 0.0036580483, %v3793_v12  ;;  %v3805_v2 = vadd.f32 0.014752088, %v3804_v46  ;;  %v3757_v40 = vmul.f32 %v3756_v10, %v7194_v52 }
 0x8df   :  { %v7257_v62 = vadd.f32 %v7163_v50, %v3227_v55  ;;  %v3842_v41 = vmul.f32 3.8918573e-05, %v7252_v58  ;;  %v3770_v27 = vmul.f32 %v3769_v18, %v7194_v52  ;;  %v3831_v3 = vmul.f32 2.1237322e-06, %v7252_v58 }
 0x8e0   :  { %v3736_v50 = vadd.f32 %v4576_v33, %v3735_v23  ;;  %v3806_v29 = vmul.f32 %v3805_v2, %v7241_v7  ;;  %v3919_v55 = vadd.f32 1.0, %v4224_v25 }
 0x8e1   :  { %v3843_v21 = vadd.f32 0.001143296, %v3842_v41  ;;  %v7267_v48 = vmul.f32 %v6802_v14, %v7257_v62  ;;  %v7271_v32 = vadd.f32 1.0, %v3770_v27  ;;  %v3795_v14 = vmul.f32 %v3794_v6, %v7241_v7 }
 0x8e2   :  { %v3740_v16 = vsel %vm3739_vm14, %v4576_v33, %v3736_v50  ;;  %v3832_v28 = vadd.f32 0.00028619796, %v3831_v3  ;;  %v3807_v8 = vadd.f32 0.112945676, %v3806_v29  ;;  %v3935_v46 = vmul.f32 %v3919_v55, %v3240_v24 }
 0x8e3   :  { %v3844_v20 = vmul.f32 %v3843_v21, %v7252_v58  ;;  %v3869_v42 = vmul.f32 %v7267_v48, %v7267_v48  ;;  %v3745_v4 = vsel %vm3742_vm7, %v3744_v57, %v3740_v16  ;;  %4577 = vrcp.f32 %v7271_v32 }
 0x8e4   :  { %v3746_v63 = vmul.f32 %v3745_v4, %v3721_v5  ;;  %v3808_v9 = vmul.f32 %v3807_v8, %v7241_v7  ;;  %v3796_v47 = vadd.f32 0.05243302, %v3795_v14  ;;  %v3833_v38 = vmul.f32 %v3832_v28, %v7252_v58 }
 0x8e5   :  { %v3845_v13 = vadd.f32 0.014752088, %v3844_v20  ;;  %v7280_v51 = vmin.f32 %v3869_v42, 16.0  ;;  %v3241_v5 = vmul.f32 0.5, %v7110_v44  ;;  %v3758_v41 = vadd.f32 0.18741608, %v3757_v40 }
 0x8e6   :  { %v4225_v33 = vclamps-f32 %v3746_v63, 1.0  ;;  %v3809_v61 = vadd.f32 0.4994258, %v3808_v9  ;;  %v3834_v6 = vadd.f32 0.0036580483, %v3833_v38  ;;  %v3797_v44 = vmul.f32 %v3796_v47, %v7241_v7 }
 0x8e7   :  { %v3846_v54 = vmul.f32 %v3845_v13, %v7252_v58  ;;  %v3871_v34 = vmul.f32 2.1237322e-06, %v7280_v51  ;;  %v3882_v17 = vmul.f32 3.8918573e-05, %v7280_v51  ;;  %v3759_v20 = vmul.f32 %v3758_v41, %v7194_v52 }
 0x8e8   :  { %v3920_v39 = vadd.f32 1.0, %v4225_v33  ;;  %v3810_v27 = vmul.f32 %v3809_v61, %v7241_v7  ;;  %v3835_v42 = vmul.f32 %v3834_v6, %v7252_v58  ;;  %v3798_v14 = vadd.f32 0.18741608, %v3797_v44 }
 0x8e9   :  { %v4578_v59 = vpop.eup %4577  ;;  %v3847_v18 = vadd.f32 0.112945676, %v3846_v54  ;;  %v3872_v12 = vadd.f32 0.00028619796, %v3871_v34  ;;  %v3883_v50 = vadd.f32 0.001143296, %v3882_v17  ;;  %vm3777_vm3 = vweird.f32 %v7271_v32 }
 0x8ea   :  { %v3936_v43 = vmul.f32 %v3920_v39, %v3241_v5  ;;  %v3773_v23 = vmul.f32 %v4578_v59, %v7271_v32  ;;  %v3811_v57 = vadd.f32 1.0, %v3810_v27  ;;  %vm3778_vm15 = vweird.f32 %v4578_v59 }
 0x8eb   :  { %v3848_v2 = vmul.f32 %v3847_v18, %v7252_v58  ;;  %v3873_v29 = vmul.f32 %v3872_v12, %v7280_v51  ;;  %v3884_v16 = vmul.f32 %v3883_v50, %v7280_v51  ;;  %v3783_v63 = vand.u32 2147483648, %v7271_v32  ;;  %vm3779_vm4 = vmor %vm3777_vm3, %vm3778_vm15 }
 0x8ec   :  { %v3774_v3 = vsub.f32 1.0, %v3773_v23  ;;  %v3946_v21 = vpack.c.bf16 %v3936_v43, %v3935_v46  ;;  %4579 = vrcp.f32 %v3811_v57  ;;  %v3781_v13 = vand.u32 2147483647, %v7271_v32 }
 0x8ed   :  { %v3849_v10 = vadd.f32 0.4994258, %v3848_v2  ;;  %v3874_v8 = vadd.f32 0.0036580483, %v3873_v29  ;;  %v3885_v24 = vadd.f32 0.014752088, %v3884_v16  ;;  %v3799_v9 = vmul.f32 %v3798_v14, %v7241_v7 }
 0x8ee   :  { %v3775_v25 = vmul.f32 %v4578_v59, %v3774_v3  ;;  %4050 = vmatmul.bf16.gmra.mxu0 %v3946_v21  ;;  %v3760_v33 = vadd.f32 1.1283791, %v3759_v20  ;;  %v3836_v47 = vadd.f32 0.05243302, %v3835_v42  ;;  %v3784_v54 = vor.u32 1.1754944e-38, %v3783_v63 }
 0x8ef   :  { %v3850_v28 = vmul.f32 %v3849_v10, %v7252_v58  ;;  %v3886_v52 = vmul.f32 %v3885_v24, %v7280_v51  ;;  %v3875_v34 = vmul.f32 %v3874_v8, %v7280_v51  ;;  %vm3782_vm5 = vcmp.eq.f32.partialorder %v3781_v13, 8.507059e+37 }
 0x8f0   :  { %v3776_v4 = vadd.f32 %v4578_v59, %v3775_v25  ;;  %v3761_v17 = vmul.f32 %v3760_v33, %v7177_v11  ;;  %v3800_v18 = vadd.f32 1.1283791, %v3799_v9  ;;  %v3823_v7 = vand.u32 2147483648, %v3811_v57 }
 0x8f1   :  { %v7301_v55 = vadd.f32 1.0, %v3850_v28  ;;  %v3887_v5 = vadd.f32 0.112945676, %v3886_v52  ;;  %v3876_v46 = vadd.f32 0.05243302, %v3875_v34  ;;  %vm3817_vm6 = vweird.f32 %v3811_v57 }
 0x8f2   :  { %v3780_v40 = vsel %vm3779_vm4, %v4578_v59, %v3776_v4  ;;  %v4580_v38 = vpop.eup %4579  ;;  %v3837_v59 = vmul.f32 %v3836_v47, %v7252_v58  ;;  %v3821_v6 = vand.u32 2147483647, %v3811_v57  ;;  %v3824_v11 = vor.u32 1.1754944e-38, %v3823_v7 }
 0x8f3   :  { %4581 = vrcp.f32 %v7301_v55  ;;  %v3813_v39 = vmul.f32 %v4580_v38, %v3811_v57  ;;  %v3785_v32 = vsel %vm3782_vm5, %v3784_v54, %v3780_v40  ;;  %v3888_v61 = vmul.f32 %v3887_v5, %v7280_v51 }
 0x8f4   :  { %v3786_v41 = vmul.f32 %v3785_v32, %v3761_v17  ;;  %vm3818_vm8 = vweird.f32 %v4580_v38  ;;  %v3838_v50 = vadd.f32 0.18741608, %v3837_v59  ;;  %v3877_v10 = vmul.f32 %v3876_v46, %v7280_v51 }
 0x8f5   :  { %v3814_v12 = vsub.f32 1.0, %v3813_v39  ;;  %v3889_v43 = vadd.f32 0.4994258, %v3888_v61  ;;  %vm3819_vm9 = vmor %vm3817_vm6, %vm3818_vm8  ;;  %v3801_v16 = vmul.f32 %v3800_v18, %v7217_v30  ;;  %vm3822_vm10 = vcmp.eq.f32.partialorder %v3821_v6, 8.507059e+37 }
 0x8f6   :  { %v4226_v25 = vclamps-f32 %v3786_v41, 1.0  ;;  %v3839_v28 = vmul.f32 %v3838_v50, %v7252_v58  ;;  %vm3857_vm12 = vweird.f32 %v7301_v55  ;;  %v3863_v63 = vand.u32 2147483648, %v7301_v55 }
 0x8f7   :  { %v3815_v27 = vmul.f32 %v4580_v38, %v3814_v12  ;;  %v3890_v3 = vmul.f32 %v3889_v43, %v7280_v51  ;;  %v3878_v8 = vadd.f32 0.18741608, %v3877_v10  ;;  %v3861_v30 = vand.u32 2147483647, %v7301_v55 }
 0x8f8   :  { %v3921_v13 = vadd.f32 1.0, %v4226_v25  ;;  %v3242_v40 = vmul.f32 0.5, %v7166_v56  ;;  %v3243_v9 = vmul.f32 0.5, %v7197_v0  ;;  %v3840_v47 = vadd.f32 1.1283791, %v3839_v28 }
 0x8f9   :  { %v4582_v23 = vpop.eup %4581  ;;  %v3816_v44 = vadd.f32 %v4580_v38, %v3815_v27  ;;  %v3891_v29 = vadd.f32 1.0, %v3890_v3  ;;  %v3864_v5 = vor.u32 1.1754944e-38, %v3863_v63  ;;  %v3879_v39 = vmul.f32 %v3878_v8, %v7280_v51 }
 0x8fa   :  { %v3853_v2 = vmul.f32 %v4582_v23, %v7301_v55  ;;  %vm3858_vm11 = vweird.f32 %v4582_v23  ;;  %v3937_v32 = vmul.f32 %v3921_v13, %v3242_v40  ;;  %vm3862_vm2 = vcmp.eq.f32.partialorder %v3861_v30, 8.507059e+37 }
 0x8fb   :  { %v3820_v20 = vsel %vm3819_vm9, %v4580_v38, %v3816_v44  ;;  %4583 = vrcp.f32 %v3891_v29  ;;  %vm3859_vm13 = vmor %vm3857_vm12, %vm3858_vm11  ;;  %v3841_v0 = vmul.f32 %v3840_v47, %v7237_v60  ;;  %v3880_v12 = vadd.f32 1.1283791, %v3879_v39 }
 0x8fc   :  { %v3854_v21 = vsub.f32 1.0, %v3853_v2  ;;  %v3825_v42 = vsel %vm3822_vm10, %v3824_v11, %v3820_v20  ;;  %v3903_v59 = vand.u32 2147483648, %v3891_v29  ;;  %vm3897_vm7 = vweird.f32 %v3891_v29 }
 0x8fd   :  { %v3826_v14 = vmul.f32 %v3825_v42, %v3801_v16  ;;  %v3881_v60 = vmul.f32 %v3880_v12, %v7267_v48 }
 0x8fe   :  { %v3855_v4 = vmul.f32 %v4582_v23, %v3854_v21  ;;  %v3904_v27 = vor.u32 1.1754944e-38, %v3903_v59  ;;  %v3244_v21 = vmul.f32 0.5, %v7221_v35 }
 0x8ff   :  { %v4227_v33 = vclamps-f32 %v3826_v14, 1.0 }
 0x900   :  { %v3856_v57 = vadd.f32 %v4582_v23, %v3855_v4 }
 0x901   :  { %v3922_v58 = vadd.f32 1.0, %v4227_v33  ;;  %v4584_v34 = vpop.eup %4583 }
 0x902   :  { %v3860_v38 = vsel %vm3859_vm13, %v4582_v23, %v3856_v57  ;;  %v3893_v55 = vmul.f32 %v4584_v34, %v3891_v29  ;;  %vm3898_vm1 = vweird.f32 %v4584_v34 }
 0x903   :  { %v3938_v61 = vmul.f32 %v3922_v58, %v3243_v9  ;;  %v3865_v56 = vsel %vm3862_vm2, %v3864_v5, %v3860_v38  ;;  %vm3899_vm14 = vmor %vm3897_vm7, %vm3898_vm1 }
 0x904   :  { %v3894_v17 = vsub.f32 1.0, %v3893_v55  ;;  %v3866_v46 = vmul.f32 %v3865_v56, %v3841_v0 }
 0x905   :  { %v3947_v18 = vpack.c.bf16 %v3938_v61, %v3937_v32 }
 0x906   :  { %v3895_v51 = vmul.f32 %v4584_v34, %v3894_v17  ;;  %v4228_v6 = vclamps-f32 %v3866_v46, 1.0 }
 0x907   :  { %v4041_v24 = vpop.f32.mrf.mxu0  ;;  %4055 = vmatmul.bf16.gmra.mxu0 %v3947_v18 }
 0x908   :  { %v4042_v52 = vadd.f32 %v7048_v1, %v4041_v24  ;;  %v3896_v23 = vadd.f32 %v4584_v34, %v3895_v51  ;;  %v3923_v50 = vadd.f32 1.0, %v4228_v6 }
 0x90a   :  { %v4072_v54 = vadd.f32 %v4042_v52, %v6786_v15  ;;  %v3901_v15 = vand.u32 2147483647, %v3891_v29  ;;  %v3900_v2 = vsel %vm3899_vm14, %v4584_v34, %v3896_v23  ;;  %v3939_v29 = vmul.f32 %v3923_v50, %v3244_v21 }
 0x90c   :  { %4088 = vst.msk [vmem:[%s7394_s9 + $0x30] sm:$0xff] %vm77_vm0, %v4072_v54  ;;  %vm3902_vm15 = vcmp.eq.f32.partialorder %v3901_v15, 8.507059e+37 }
 0x90d   :  { %v3905_v3 = vsel %vm3902_vm15, %v3904_v27, %v3900_v2 }
 0x90e   :  { %v3906_v44 = vmul.f32 %v3905_v3, %v3881_v60 }
 0x90f   :  { %v4043_v7 = vpop.f32.mrf.mxu0 }
 0x910   :  { %v4044_v43 = vadd.f32 %v7048_v1, %v4043_v7  ;;  %v4229_v11 = vclamps-f32 %v3906_v44, 1.0 }
 0x912   :  { %v4073_v41 = vadd.f32 %v4044_v43, %v6791_v45  ;;  %v3245_v45 = vmul.f32 0.5, %v7257_v62  ;;  %v3924_v10 = vadd.f32 1.0, %v4229_v11 }
 0x914   :  { %4089 = vst.msk [vmem:[%s7394_s9 + $0x38] sm:$0xff] %vm77_vm0, %v4073_v41  ;;  %v3940_v25 = vmul.f32 %v3924_v10, %v3245_v45 }
 0x916   :  { %v3948_v16 = vpack.c.bf16 %v3940_v25, %v3939_v29 }
 0x918   :  { %4060 = vmatmul.bf16.gmra.mxu0 %v3948_v16 }
 0x957   :  { %v4046_v48 = vpop.f32.mrf.mxu0 }
 0x958   :  { %v4047_v20 = vadd.f32 %v7048_v1, %v4046_v48 }
 0x95a   :  { %v4074_v42 = vadd.f32 %v4047_v20, %v6919_v36 }
 0x95c   :  { %4090 = vst.msk [vmem:[%s7394_s9 + $0x40] sm:$0xff] %vm77_vm0, %v4074_v42 }
 0x95f   :  { %v4048_v4 = vpop.f32.mrf.mxu0 }
 0x960   :  { %v4049_v35 = vadd.f32 %v7048_v1, %v4048_v4 }
 0x962   :  { %v4075_v62 = vadd.f32 %v4049_v35, %v6924_v37 }
 0x964   :  { %4091 = vst.msk [vmem:[%s7394_s9 + $0x48] sm:$0xff] %vm77_vm0, %v4075_v62 }
 0x96b   :  { %v4051_v14 = vpop.f32.mrf.mxu0 }
 0x96c   :  { %v4052_v28 = vadd.f32 %v7048_v1, %v4051_v14 }
 0x96e   :  { %v4076_v36 = vadd.f32 %v4052_v28, %v6962_v22 }
 0x970   :  { %4092 = vst.msk [vmem:[%s7394_s9 + $0x50] sm:$0xff] %vm77_vm0, %v4076_v36 }
 0x973   :  { %v4053_v57 = vpop.f32.mrf.mxu0 }
 0x974   :  { %v4054_v63 = vadd.f32 %v7048_v1, %v4053_v57 }
 0x976   :  { %v4077_v37 = vadd.f32 %v4054_v63, %v6956_v26 }
 0x978   :  { %4093 = vst.msk [vmem:[%s7394_s9 + $0x58] sm:$0xff] %vm77_vm0, %v4077_v37 }
 0x984   :  { %v4056_v8 = vpop.f32.mrf.mxu0 }
 0x985   :  { %v4057_v24 = vadd.f32 %v7048_v1, %v4056_v8 }
 0x987   :  { %v4078_v22 = vadd.f32 %v4057_v24, %v6995_v53 }
 0x989   :  { %4094 = vst.msk [vmem:[%s7394_s9 + $0x60] sm:$0xff] %vm77_vm0, %v4078_v22 }
 0x98c   :  { %v4058_v13 = vpop.f32.mrf.mxu0 }
 0x98d   :  { %v4059_v33 = vadd.f32 %v7048_v1, %v4058_v13 }
 0x98f   :  { %v4079_v26 = vadd.f32 %v4059_v33, %v7000_v49 }
 0x991   :  { %4095 = vst.msk [vmem:[%s7394_s9 + $0x68] sm:$0xff] %vm77_vm0, %v4079_v26 }
 0x995   :  { %v4061_v30 = vpop.f32.mrf.mxu0 }
 0x996   :  { %v4062_v52 = vadd.f32 %v7048_v1, %v4061_v30 }
 0x998   :  { %v4080_v53 = vadd.f32 %v4062_v52, %v7020_v19 }
 0x99a   :  { %4096 = vst.msk [vmem:[%s7394_s9 + $0x70] sm:$0xff] %vm77_vm0, %v4080_v53 }
 0x99d   :  { %v4063_v40 = vpop.f32.mrf.mxu0 }
 0x99e   :  { %v4064_v9 = vadd.f32 %v7048_v1, %v4063_v40 }
 0x9a0   :  { %v4081_v49 = vadd.f32 %v4064_v9, %v7027_v31 }
 0x9a2   :  { %4097 = vst.msk [vmem:[%s7394_s9 + $0x78] sm:$0xff] %vm77_vm0, %v4081_v49 }

</bundles_post_ra>
